<compile_context>
chip_gen: v7x
topology: tpu7x:2x2x1
jax: 0.10.0
libtpu: 0.0.40
codegen_flags: <defaults>
</compile_context>

<pallas_src>
import math

import numpy as np
import jax
import jax.numpy as jnp
from jax import lax
from jax.experimental import pallas as pl
from jax.experimental.pallas import tpu as pltpu


# ---------------------------------------------------------------------------
# helpers: per-level segment lengths & static gather matrices
# ---------------------------------------------------------------------------
def _conv_len(L, kernel_size, stride, padding):
    return (L + 2 * padding - kernel_size) // stride + 1


def _level_lens(seg_lens, n_layers, kernel_size, stride, padding):
    lens = [list(seg_lens)]
    for _ in range(n_layers):
        lens.append([_conv_len(L, kernel_size, stride, padding) for L in lens[-1]])
    return lens


def _enc_gather(in_lens, out_lens, kernel_size, stride, padding):
    """Conv1d per segment: G[k, r, c] = 1 iff output row r reads input row c at
    tap k (out-of-segment taps -> implicit zero padding)."""
    G = np.zeros((kernel_size, sum(out_lens), sum(in_lens)), np.float32)
    a = b = 0
    for Li, Lo in zip(in_lens, out_lens):
        for r in range(Lo):
            for k in range(kernel_size):
                c = r * stride + k - padding
                if 0 <= c < Li:
                    G[k, b + r, a + c] = 1.0
        a += Li
        b += Lo
    return G


def _dec_gather(in_lens, out_lens, kernel_size, stride, padding_t):
    """ConvTranspose1d per segment (stride, padding_t) followed by
    CutSequence(offset=0) down to out_lens (keep the head, trim the tail)."""
    G = np.zeros((kernel_size, sum(out_lens), sum(in_lens)), np.float32)
    a = b = 0
    for Li, Lo in zip(in_lens, out_lens):
        for j in range(Li):
            for k in range(kernel_size):
                l = j * stride + k - padding_t
                if 0 <= l < Lo:
                    G[k, b + l, a + j] = 1.0
        a += Li
        b += Lo
    return G


# ---------------------------------------------------------------------------
# the single fused Pallas kernel
# ---------------------------------------------------------------------------
def _make_forward_kernel(layer_meta):
    """layer_meta: tuple of (kernel_size, negative_slope, norm_idx_or_None, eps)
    in layer-processing order (enc 0..n-1, dec n-1..0)."""
    n_lay = len(layer_meta)

    def kernel(*refs):
        x_ref = refs[0]                                  # (1, L0, C)
        w_refs = refs[1:1 + n_lay]                       # each (K, C, C)
        g_refs = refs[1 + n_lay:1 + 2 * n_lay]           # each (K, Lout, Lin)
        gamma_ref = refs[1 + 2 * n_lay]                  # (n_norm, 1, C)
        beta_ref = refs[2 + 2 * n_lay]                   # (n_norm, 1, C)
        out_ref = refs[3 + 2 * n_lay]                    # (1, L0, C)

        x = x_ref[0]                                     # (L0, C) f32, VMEM
        for li, (K, slope, norm_idx, eps) in enumerate(layer_meta):
            w_ref, g_ref = w_refs[li], g_refs[li]
            # conv / conv-transpose (+segment zero-pad, +cut) = 2 MXU ops / tap
            y = jnp.dot(g_ref[0],
                        jnp.dot(x, w_ref[0], preferred_element_type=jnp.float32),
                        preferred_element_type=jnp.float32)
            for k in range(1, K):
                y = y + jnp.dot(
                    g_ref[k],
                    jnp.dot(x, w_ref[k], preferred_element_type=jnp.float32),
                    preferred_element_type=jnp.float32)
            if norm_idx is not None:
                # LeakyReLU / ReLU + InstanceNorm1d epilogue (per-(n,c) stats
                # over L, biased variance, affine) on the VMEM-resident tile.
                y = jnp.where(y >= 0.0, y, slope * y)
                mean = jnp.mean(y, axis=0, keepdims=True)                 # (1,C)
                var = jnp.mean(jnp.square(y - mean), axis=0, keepdims=True)
                y = (y - mean) * lax.rsqrt(var + eps)
                y = y * gamma_ref[norm_idx] + beta_ref[norm_idx]
            x = y
        out_ref[0] = x.astype(out_ref.dtype)

    return kernel


def _forward_pallas(x_pad, w_list, g_list, gamma, beta, layer_meta):
    N, L0, C = x_pad.shape
    kernel = _make_forward_kernel(layer_meta)

    def _const3(n):
        return (0, 0, 0)                                 # resident across grid

    in_specs = [pl.BlockSpec((1, L0, C), lambda n: (n, 0, 0))]
    in_specs += [pl.BlockSpec(w.shape, _const3) for w in w_list]
    in_specs += [pl.BlockSpec(g.shape, _const3) for g in g_list]
    in_specs += [pl.BlockSpec(gamma.shape, _const3),
                 pl.BlockSpec(beta.shape, _const3)]

    return pl.pallas_call(
        kernel,
        out_shape=jax.ShapeDtypeStruct((N, L0, C), x_pad.dtype),
        grid=(N,),
        in_specs=in_specs,
        out_specs=pl.BlockSpec((1, L0, C), lambda n: (n, 0, 0)),
        compiler_params=pltpu.CompilerParams(
            dimension_semantics=("arbitrary",)),         # keep tiny work on 1 TC
    )(x_pad, *w_list, *g_list, gamma, beta)


# ---------------------------------------------------------------------------
# AESeqConvDeconv forward (parameter packing + single pallas_call)
# ---------------------------------------------------------------------------
def ae_seq_conv_deconv_forward(params, seq_ncl, seg_lens, n_layers,
                               kernel_size=3, stride=2, padding=1, eps=1e-5):
    """seq_ncl: (N, input_size, L_total), exactly like the PyTorch module."""
    N, input_size, L_total = seq_ncl.shape
    lens = _level_lens(seg_lens, n_layers, kernel_size, stride, padding)
    assert sum(lens[0]) == L_total

    ch_dims = []
    for i in range(n_layers):
        ch_dims += list(params[f"enc_w_{i}"].shape[:2])
        ch_dims += list(params[f"dec_w_{i}"].shape[:2])
    c_pad = 128 * ((max(ch_dims) + 127) // 128)          # lane-dense channel slab

    w_list, g_list, gammas, betas, layer_meta = [], [], [], [], []
    n_norm = 0

    # ----- encoder layers (processing order) -----
    for i in range(n_layers):
        w = params[f"enc_w_{i}"]                          # Conv1d: (Cout, Cin, K)
        cout, cin, K = w.shape
        wk = jnp.zeros((K, c_pad, c_pad), jnp.float32)
        wk = wk.at[:, :cin, :cout].set(jnp.transpose(w, (2, 1, 0)))
        w_list.append(wk)
        g_list.append(jnp.asarray(
            _enc_gather(lens[i], lens[i + 1], K, stride, padding)))
        if i < n_layers - 1:
            slope = 0.2 if i == 0 else 0.01
            gammas.append(jnp.zeros((c_pad,), jnp.float32)
                          .at[:cout].set(params[f"enc_gamma_{i}"]))
            betas.append(jnp.zeros((c_pad,), jnp.float32)
                         .at[:cout].set(params[f"enc_beta_{i}"]))
            layer_meta.append((K, slope, n_norm, eps))
            n_norm += 1
        else:
            layer_meta.append((K, 0.0, None, eps))        # last encoder: no post

    # ----- decoder layers -----
    for i in range(n_layers - 1, -1, -1):
        w = params[f"dec_w_{i}"]                          # ConvT1d: (Cin, Cout, K)
        cin, cout, K = w.shape
        wk = jnp.zeros((K, c_pad, c_pad), jnp.float32)
        wk = wk.at[:, :cin, :cout].set(jnp.transpose(w, (2, 0, 1)))
        w_list.append(wk)
        g_list.append(jnp.asarray(
            _dec_gather(lens[i + 1], lens[i], K, stride, padding - 1)))
        if i > 0:
            gammas.append(jnp.zeros((c_pad,), jnp.float32)
                          .at[:cout].set(params[f"dec_gamma_{i}"]))
            betas.append(jnp.zeros((c_pad,), jnp.float32)
                         .at[:cout].set(params[f"dec_beta_{i}"]))
            layer_meta.append((K, 0.0, n_norm, eps))      # ReLU + InstanceNorm
            n_norm += 1
        else:
            layer_meta.append((K, 0.0, None, eps))        # last decoder: no post

    if gammas:
        gamma = jnp.stack(gammas)[:, None, :]             # (n_norm, 1, C)
        beta = jnp.stack(betas)[:, None, :]
    else:
        gamma = jnp.zeros((1, 1, c_pad), jnp.float32)
        beta = jnp.zeros((1, 1, c_pad), jnp.float32)

    # NCL -> NLC, channels zero-padded to the 128-lane slab (zero-padded weight
    # columns keep padded channels exactly zero, so real outputs are exact).
    x = jnp.transpose(seq_ncl, (0, 2, 1)).astype(jnp.float32)
    x = jnp.pad(x, ((0, 0), (0, 0), (0, c_pad - input_size)))

    y = _forward_pallas(x, w_list, g_list, gamma, beta, tuple(layer_meta))
    return jnp.transpose(y[:, :, :input_size], (0, 2, 1))  # back to NCL


# ---------------------------------------------------------------------------
# parameters + plain-JAX reference (for verification only)
# ---------------------------------------------------------------------------
def init_params(key, n_layers, input_size=20, hidden_size=32, kernel_size=3):
    params = {}
    cin = input_size
    for i in range(n_layers):
        cout = cin * 2 if i > 0 else hidden_size
        key, k1, k2, k3 = jax.random.split(key, 4)
        params[f"enc_w_{i}"] = (
            jax.random.normal(k1, (cout, cin, kernel_size), jnp.float32)
            / math.sqrt(cin * kernel_size))
        if i < n_layers - 1:
            params[f"enc_gamma_{i}"] = 1.0 + 0.1 * jax.random.normal(k2, (cout,))
            params[f"enc_beta_{i}"] = 0.1 * jax.random.normal(k3, (cout,))
        cin = cout
    for i in range(n_layers - 1, -1, -1):
        cout = cin // 2 if i > 0 else input_size
        key, k1, k2, k3 = jax.random.split(key, 4)
        params[f"dec_w_{i}"] = (
            jax.random.normal(k1, (cin, cout, kernel_size), jnp.float32)
            / math.sqrt(cin * kernel_size))
        if i > 0:
            params[f"dec_gamma_{i}"] = 1.0 + 0.1 * jax.random.normal(k2, (cout,))
            params[f"dec_beta_{i}"] = 0.1 * jax.random.normal(k3, (cout,))
        cin = cout
    return params


def reference_forward(params, seq_ncl, seg_lens, n_layers,
                      kernel_size=3, stride=2, padding=1, eps=1e-5):
    """Independent plain-JAX (lax.conv) reference mirroring the PyTorch forward."""
    lens = _level_lens(seg_lens, n_layers, kernel_size, stride, padding)
    hi = lax.Precision.HIGHEST
    x = seq_ncl.astype(jnp.float32)

    for i in range(n_layers):
        w = params[f"enc_w_{i}"]
        pieces, start = [], 0
        for Li in lens[i]:
            xd = x[:, :, start:start + Li]
            y = lax.conv_general_dilated(
                xd, w, window_strides=(stride,), padding=[(padding, padding)],
                dimension_numbers=("NCH", "OIH", "NCH"), precision=hi)
            pieces.append(y)
            start += Li
        x = jnp.concatenate(pieces, axis=2)
        if i < n_layers - 1:
            slope = 0.2 if i == 0 else 0.01
            x = jnp.where(x >= 0, x, slope * x)
            mean = jnp.mean(x, axis=2, keepdims=True)
            var = jnp.mean(jnp.square(x - mean), axis=2, keepdims=True)
            x = (x - mean) * lax.rsqrt(var + eps)
            x = (x * params[f"enc_gamma_{i}"][None, :, None]
                 + params[f"enc_beta_{i}"][None, :, None])

    for i in range(n_layers - 1, -1, -1):
        w = params[f"dec_w_{i}"]                              # (Cin, Cout, K)
        w_eff = jnp.flip(w, axis=2).transpose(1, 0, 2)        # (Cout, Cin, K)
        pad_t = padding - 1
        pieces, start = [], 0
        for s in range(len(seg_lens)):
            Li, Lo = lens[i + 1][s], lens[i][s]
            xd = x[:, :, start:start + Li]
            y = lax.conv_general_dilated(
                xd, w_eff, window_strides=(1,),
                padding=[(kernel_size - 1 - pad_t, kernel_size - 1 - pad_t)],
                lhs_dilation=(stride,),
                dimension_numbers=("NCH", "OIH", "NCH"), precision=hi)
            pieces.append(y[:, :, :Lo])                       # CutSequence(0)
            start += Li
        x = jnp.concatenate(pieces, axis=2)
        if i > 0:
            x = jnp.maximum(x, 0.0)
            mean = jnp.mean(x, axis=2, keepdims=True)
            var = jnp.mean(jnp.square(x - mean), axis=2, keepdims=True)
            x = (x - mean) * lax.rsqrt(var + eps)
            x = (x * params[f"dec_gamma_{i}"][None, :, None]
                 + params[f"dec_beta_{i}"][None, :, None])
    return x


# ---------------------------------------------------------------------------
if __name__ == "__main__":
    n_layers = 3
    input_size = 20
    hidden_size = 32          # channels 20 -> 32 -> 64 -> 128, all <= 128 lanes
    batch = 2
    seg_lens = (12, 20)       # two independently-convolved segments, L_total=32

    key = jax.random.PRNGKey(0)
    key, kp, kx = jax.random.split(key, 3)
    params = init_params(kp, n_layers, input_size, hidden_size)
    seq = jax.random.normal(kx, (batch, input_size, sum(seg_lens)), jnp.float32)

    out = ae_seq_conv_deconv_forward(params, seq, seg_lens, n_layers)
    out = jax.block_until_ready(out)

    assert out.shape == seq.shape, out.shape
    assert bool(jnp.all(jnp.isfinite(out)))

    ref = jax.block_until_ready(
        reference_forward(params, seq, seg_lens, n_layers))
    np.testing.assert_allclose(np.asarray(out), np.asarray(ref),
                               rtol=1e-2, atol=1e-2)
    print("KERNEL_OK")
</pallas_src>

<mosaic_0001>
module attributes {stable_mosaic.version = 11 : i64} {
  func.func @kernel(%arg0: i32, %arg1: memref<1x32x128xf32, #tpu.memory_space<vmem>>, %arg2: memref<3x128x128xf32, #tpu.memory_space<vmem>>, %arg3: memref<3x128x128xf32, #tpu.memory_space<vmem>>, %arg4: memref<3x128x128xf32, #tpu.memory_space<vmem>>, %arg5: memref<3x128x128xf32, #tpu.memory_space<vmem>>, %arg6: memref<3x128x128xf32, #tpu.memory_space<vmem>>, %arg7: memref<3x128x128xf32, #tpu.memory_space<vmem>>, %arg8: memref<3x16x32xf32, #tpu.memory_space<vmem>>, %arg9: memref<3x8x16xf32, #tpu.memory_space<vmem>>, %arg10: memref<3x5x8xf32, #tpu.memory_space<vmem>>, %arg11: memref<3x8x5xf32, #tpu.memory_space<vmem>>, %arg12: memref<3x16x8xf32, #tpu.memory_space<vmem>>, %arg13: memref<3x32x16xf32, #tpu.memory_space<vmem>>, %arg14: memref<4x1x128xf32, #tpu.memory_space<vmem>>, %arg15: memref<4x1x128xf32, #tpu.memory_space<vmem>>, %arg16: memref<1x32x128xf32, #tpu.memory_space<vmem>>) attributes {dimension_semantics = [#tpu.dimension_semantics<arbitrary>], iteration_bounds = array<i64: 2>, scalar_prefetch = 0 : i64, scratch_operands = 0 : i64, tpu.core_type = #tpu.core_type<tc>, window_params = [{transform_indices = @transform_0, window_bounds = array<i64: 1, 32, 128>}, {pipeline_mode = #tpu.pipeline_mode<synchronous>, transform_indices = @transform_1, window_bounds = array<i64: 3, 128, 128>}, {pipeline_mode = #tpu.pipeline_mode<synchronous>, transform_indices = @transform_2, window_bounds = array<i64: 3, 128, 128>}, {pipeline_mode = #tpu.pipeline_mode<synchronous>, transform_indices = @transform_3, window_bounds = array<i64: 3, 128, 128>}, {pipeline_mode = #tpu.pipeline_mode<synchronous>, transform_indices = @transform_4, window_bounds = array<i64: 3, 128, 128>}, {pipeline_mode = #tpu.pipeline_mode<synchronous>, transform_indices = @transform_5, window_bounds = array<i64: 3, 128, 128>}, {pipeline_mode = #tpu.pipeline_mode<synchronous>, transform_indices = @transform_6, window_bounds = array<i64: 3, 128, 128>}, {pipeline_mode = #tpu.pipeline_mode<synchronous>, transform_indices = @transform_7, window_bounds = array<i64: 3, 16, 32>}, {pipeline_mode = #tpu.pipeline_mode<synchronous>, transform_indices = @transform_8, window_bounds = array<i64: 3, 8, 16>}, {pipeline_mode = #tpu.pipeline_mode<synchronous>, transform_indices = @transform_9, window_bounds = array<i64: 3, 5, 8>}, {pipeline_mode = #tpu.pipeline_mode<synchronous>, transform_indices = @transform_10, window_bounds = array<i64: 3, 8, 5>}, {pipeline_mode = #tpu.pipeline_mode<synchronous>, transform_indices = @transform_11, window_bounds = array<i64: 3, 16, 8>}, {pipeline_mode = #tpu.pipeline_mode<synchronous>, transform_indices = @transform_12, window_bounds = array<i64: 3, 32, 16>}, {pipeline_mode = #tpu.pipeline_mode<synchronous>, transform_indices = @transform_13, window_bounds = array<i64: 4, 1, 128>}, {pipeline_mode = #tpu.pipeline_mode<synchronous>, transform_indices = @transform_14, window_bounds = array<i64: 4, 1, 128>}, {transform_indices = @transform_15, window_bounds = array<i64: 1, 32, 128>}]} {
    %c0 = arith.constant 0 : index
    %c0_0 = arith.constant 0 : index
    %c0_1 = arith.constant 0 : index
    %0 = vector.load %arg1[%c0, %c0_0, %c0_1] : memref<1x32x128xf32, #tpu.memory_space<vmem>>, vector<1x32x128xf32>
    %1 = vector.shape_cast %0 : vector<1x32x128xf32> to vector<32x128xf32>
    %c0_2 = arith.constant 0 : index
    %c0_3 = arith.constant 0 : index
    %c0_4 = arith.constant 0 : index
    %2 = vector.load %arg8[%c0_2, %c0_3, %c0_4] : memref<3x16x32xf32, #tpu.memory_space<vmem>>, vector<1x16x32xf32>
    %3 = vector.shape_cast %2 : vector<1x16x32xf32> to vector<16x32xf32>
    %c0_5 = arith.constant 0 : index
    %c0_6 = arith.constant 0 : index
    %c0_7 = arith.constant 0 : index
    %4 = vector.load %arg2[%c0_5, %c0_6, %c0_7] : memref<3x128x128xf32, #tpu.memory_space<vmem>>, vector<1x128x128xf32>
    %5 = vector.shape_cast %4 : vector<1x128x128xf32> to vector<128x128xf32>
    %cst = arith.constant dense<0.000000e+00> : vector<32x128xf32>
    %6 = tpu.matmul %1, %5, %cst {dimension_numbers = #tpu.dot_dimension_numbers<[1], [0], [0], [1], [0, 0, 1, 1], [], []>} : vector<32x128xf32>, vector<128x128xf32>, vector<32x128xf32> -> vector<32x128xf32>
    %cst_8 = arith.constant dense<0.000000e+00> : vector<16x128xf32>
    %7 = tpu.matmul %3, %6, %cst_8 {dimension_numbers = #tpu.dot_dimension_numbers<[1], [0], [0], [1], [0, 0, 1, 1], [], []>} : vector<16x32xf32>, vector<32x128xf32>, vector<16x128xf32> -> vector<16x128xf32>
    %c1 = arith.constant 1 : index
    %c0_9 = arith.constant 0 : index
    %c0_10 = arith.constant 0 : index
    %8 = vector.load %arg8[%c1, %c0_9, %c0_10] : memref<3x16x32xf32, #tpu.memory_space<vmem>>, vector<1x16x32xf32>
    %9 = vector.shape_cast %8 : vector<1x16x32xf32> to vector<16x32xf32>
    %c1_11 = arith.constant 1 : index
    %c0_12 = arith.constant 0 : index
    %c0_13 = arith.constant 0 : index
    %10 = vector.load %arg2[%c1_11, %c0_12, %c0_13] : memref<3x128x128xf32, #tpu.memory_space<vmem>>, vector<1x128x128xf32>
    %11 = vector.shape_cast %10 : vector<1x128x128xf32> to vector<128x128xf32>
    %cst_14 = arith.constant dense<0.000000e+00> : vector<32x128xf32>
    %12 = tpu.matmul %1, %11, %cst_14 {dimension_numbers = #tpu.dot_dimension_numbers<[1], [0], [0], [1], [0, 0, 1, 1], [], []>} : vector<32x128xf32>, vector<128x128xf32>, vector<32x128xf32> -> vector<32x128xf32>
    %cst_15 = arith.constant dense<0.000000e+00> : vector<16x128xf32>
    %13 = tpu.matmul %9, %12, %cst_15 {dimension_numbers = #tpu.dot_dimension_numbers<[1], [0], [0], [1], [0, 0, 1, 1], [], []>} : vector<16x32xf32>, vector<32x128xf32>, vector<16x128xf32> -> vector<16x128xf32>
    %14 = arith.addf %7, %13 : vector<16x128xf32>
    %c2 = arith.constant 2 : index
    %c0_16 = arith.constant 0 : index
    %c0_17 = arith.constant 0 : index
    %15 = vector.load %arg8[%c2, %c0_16, %c0_17] : memref<3x16x32xf32, #tpu.memory_space<vmem>>, vector<1x16x32xf32>
    %16 = vector.shape_cast %15 : vector<1x16x32xf32> to vector<16x32xf32>
    %c2_18 = arith.constant 2 : index
    %c0_19 = arith.constant 0 : index
    %c0_20 = arith.constant 0 : index
    %17 = vector.load %arg2[%c2_18, %c0_19, %c0_20] : memref<3x128x128xf32, #tpu.memory_space<vmem>>, vector<1x128x128xf32>
    %18 = vector.shape_cast %17 : vector<1x128x128xf32> to vector<128x128xf32>
    %cst_21 = arith.constant dense<0.000000e+00> : vector<32x128xf32>
    %19 = tpu.matmul %1, %18, %cst_21 {dimension_numbers = #tpu.dot_dimension_numbers<[1], [0], [0], [1], [0, 0, 1, 1], [], []>} : vector<32x128xf32>, vector<128x128xf32>, vector<32x128xf32> -> vector<32x128xf32>
    %cst_22 = arith.constant dense<0.000000e+00> : vector<16x128xf32>
    %20 = tpu.matmul %16, %19, %cst_22 {dimension_numbers = #tpu.dot_dimension_numbers<[1], [0], [0], [1], [0, 0, 1, 1], [], []>} : vector<16x32xf32>, vector<32x128xf32>, vector<16x128xf32> -> vector<16x128xf32>
    %21 = arith.addf %14, %20 : vector<16x128xf32>
    %cst_23 = arith.constant 0.000000e+00 : f32
    %22 = vector.broadcast %cst_23 : f32 to vector<16x128xf32>
    %23 = arith.cmpf oge, %21, %22 : vector<16x128xf32>
    %cst_24 = arith.constant 2.000000e-01 : f32
    %24 = vector.broadcast %cst_24 : f32 to vector<16x128xf32>
    %25 = arith.mulf %24, %21 : vector<16x128xf32>
    %26 = arith.select %23, %21, %25 : vector<16x128xi1>, vector<16x128xf32>
    %cst_25 = arith.constant dense<0.000000e+00> : vector<128xf32>
    %27 = vector.multi_reduction <add>, %26, %cst_25 [0] : vector<16x128xf32> to vector<128xf32>
    %28 = vector.shape_cast %27 : vector<128xf32> to vector<1x128xf32>
    %cst_26 = arith.constant 1.600000e+01 : f32
    %29 = vector.broadcast %cst_26 : f32 to vector<1x128xf32>
    %30 = arith.divf %28, %29 : vector<1x128xf32>
    %31 = vector.broadcast %30 : vector<1x128xf32> to vector<16x128xf32>
    %32 = arith.subf %26, %31 : vector<16x128xf32>
    %33 = arith.mulf %32, %32 : vector<16x128xf32>
    %cst_27 = arith.constant dense<0.000000e+00> : vector<128xf32>
    %34 = vector.multi_reduction <add>, %33, %cst_27 [0] : vector<16x128xf32> to vector<128xf32>
    %35 = vector.shape_cast %34 : vector<128xf32> to vector<1x128xf32>
    %cst_28 = arith.constant 1.600000e+01 : f32
    %36 = vector.broadcast %cst_28 : f32 to vector<1x128xf32>
    %37 = arith.divf %35, %36 : vector<1x128xf32>
    %38 = vector.broadcast %30 : vector<1x128xf32> to vector<16x128xf32>
    %39 = arith.subf %26, %38 : vector<16x128xf32>
    %cst_29 = arith.constant 9.99999974E-6 : f32
    %40 = vector.broadcast %cst_29 : f32 to vector<1x128xf32>
    %41 = arith.addf %37, %40 : vector<1x128xf32>
    %42 = math.rsqrt %41 : vector<1x128xf32>
    %43 = vector.broadcast %42 : vector<1x128xf32> to vector<16x128xf32>
    %44 = arith.mulf %39, %43 : vector<16x128xf32>
    %c0_30 = arith.constant 0 : index
    %c0_31 = arith.constant 0 : index
    %c0_32 = arith.constant 0 : index
    %45 = vector.load %arg14[%c0_30, %c0_31, %c0_32] : memref<4x1x128xf32, #tpu.memory_space<vmem>>, vector<1x1x128xf32>
    %46 = vector.shape_cast %45 : vector<1x1x128xf32> to vector<1x128xf32>
    %47 = vector.broadcast %46 : vector<1x128xf32> to vector<16x128xf32>
    %48 = arith.mulf %44, %47 : vector<16x128xf32>
    %c0_33 = arith.constant 0 : index
    %c0_34 = arith.constant 0 : index
    %c0_35 = arith.constant 0 : index
    %49 = vector.load %arg15[%c0_33, %c0_34, %c0_35] : memref<4x1x128xf32, #tpu.memory_space<vmem>>, vector<1x1x128xf32>
    %50 = vector.shape_cast %49 : vector<1x1x128xf32> to vector<1x128xf32>
    %51 = vector.broadcast %50 : vector<1x128xf32> to vector<16x128xf32>
    %52 = arith.addf %48, %51 : vector<16x128xf32>
    %c0_36 = arith.constant 0 : index
    %c0_37 = arith.constant 0 : index
    %c0_38 = arith.constant 0 : index
    %53 = vector.load %arg9[%c0_36, %c0_37, %c0_38] : memref<3x8x16xf32, #tpu.memory_space<vmem>>, vector<1x8x16xf32>
    %54 = vector.shape_cast %53 : vector<1x8x16xf32> to vector<8x16xf32>
    %c0_39 = arith.constant 0 : index
    %c0_40 = arith.constant 0 : index
    %c0_41 = arith.constant 0 : index
    %55 = vector.load %arg3[%c0_39, %c0_40, %c0_41] : memref<3x128x128xf32, #tpu.memory_space<vmem>>, vector<1x128x128xf32>
    %56 = vector.shape_cast %55 : vector<1x128x128xf32> to vector<128x128xf32>
    %cst_42 = arith.constant dense<0.000000e+00> : vector<16x128xf32>
    %57 = tpu.matmul %52, %56, %cst_42 {dimension_numbers = #tpu.dot_dimension_numbers<[1], [0], [0], [1], [0, 0, 1, 1], [], []>} : vector<16x128xf32>, vector<128x128xf32>, vector<16x128xf32> -> vector<16x128xf32>
    %cst_43 = arith.constant dense<0.000000e+00> : vector<8x128xf32>
    %58 = tpu.matmul %54, %57, %cst_43 {dimension_numbers = #tpu.dot_dimension_numbers<[1], [0], [0], [1], [0, 0, 1, 1], [], []>} : vector<8x16xf32>, vector<16x128xf32>, vector<8x128xf32> -> vector<8x128xf32>
    %c1_44 = arith.constant 1 : index
    %c0_45 = arith.constant 0 : index
    %c0_46 = arith.constant 0 : index
    %59 = vector.load %arg9[%c1_44, %c0_45, %c0_46] : memref<3x8x16xf32, #tpu.memory_space<vmem>>, vector<1x8x16xf32>
    %60 = vector.shape_cast %59 : vector<1x8x16xf32> to vector<8x16xf32>
    %c1_47 = arith.constant 1 : index
    %c0_48 = arith.constant 0 : index
    %c0_49 = arith.constant 0 : index
    %61 = vector.load %arg3[%c1_47, %c0_48, %c0_49] : memref<3x128x128xf32, #tpu.memory_space<vmem>>, vector<1x128x128xf32>
    %62 = vector.shape_cast %61 : vector<1x128x128xf32> to vector<128x128xf32>
    %cst_50 = arith.constant dense<0.000000e+00> : vector<16x128xf32>
    %63 = tpu.matmul %52, %62, %cst_50 {dimension_numbers = #tpu.dot_dimension_numbers<[1], [0], [0], [1], [0, 0, 1, 1], [], []>} : vector<16x128xf32>, vector<128x128xf32>, vector<16x128xf32> -> vector<16x128xf32>
    %cst_51 = arith.constant dense<0.000000e+00> : vector<8x128xf32>
    %64 = tpu.matmul %60, %63, %cst_51 {dimension_numbers = #tpu.dot_dimension_numbers<[1], [0], [0], [1], [0, 0, 1, 1], [], []>} : vector<8x16xf32>, vector<16x128xf32>, vector<8x128xf32> -> vector<8x128xf32>
    %65 = arith.addf %58, %64 : vector<8x128xf32>
    %c2_52 = arith.constant 2 : index
    %c0_53 = arith.constant 0 : index
    %c0_54 = arith.constant 0 : index
    %66 = vector.load %arg9[%c2_52, %c0_53, %c0_54] : memref<3x8x16xf32, #tpu.memory_space<vmem>>, vector<1x8x16xf32>
    %67 = vector.shape_cast %66 : vector<1x8x16xf32> to vector<8x16xf32>
    %c2_55 = arith.constant 2 : index
    %c0_56 = arith.constant 0 : index
    %c0_57 = arith.constant 0 : index
    %68 = vector.load %arg3[%c2_55, %c0_56, %c0_57] : memref<3x128x128xf32, #tpu.memory_space<vmem>>, vector<1x128x128xf32>
    %69 = vector.shape_cast %68 : vector<1x128x128xf32> to vector<128x128xf32>
    %cst_58 = arith.constant dense<0.000000e+00> : vector<16x128xf32>
    %70 = tpu.matmul %52, %69, %cst_58 {dimension_numbers = #tpu.dot_dimension_numbers<[1], [0], [0], [1], [0, 0, 1, 1], [], []>} : vector<16x128xf32>, vector<128x128xf32>, vector<16x128xf32> -> vector<16x128xf32>
    %cst_59 = arith.constant dense<0.000000e+00> : vector<8x128xf32>
    %71 = tpu.matmul %67, %70, %cst_59 {dimension_numbers = #tpu.dot_dimension_numbers<[1], [0], [0], [1], [0, 0, 1, 1], [], []>} : vector<8x16xf32>, vector<16x128xf32>, vector<8x128xf32> -> vector<8x128xf32>
    %72 = arith.addf %65, %71 : vector<8x128xf32>
    %cst_60 = arith.constant 0.000000e+00 : f32
    %73 = vector.broadcast %cst_60 : f32 to vector<8x128xf32>
    %74 = arith.cmpf oge, %72, %73 : vector<8x128xf32>
    %cst_61 = arith.constant 0.00999999977 : f32
    %75 = vector.broadcast %cst_61 : f32 to vector<8x128xf32>
    %76 = arith.mulf %75, %72 : vector<8x128xf32>
    %77 = arith.select %74, %72, %76 : vector<8x128xi1>, vector<8x128xf32>
    %cst_62 = arith.constant dense<0.000000e+00> : vector<128xf32>
    %78 = vector.multi_reduction <add>, %77, %cst_62 [0] : vector<8x128xf32> to vector<128xf32>
    %79 = vector.shape_cast %78 : vector<128xf32> to vector<1x128xf32>
    %cst_63 = arith.constant 8.000000e+00 : f32
    %80 = vector.broadcast %cst_63 : f32 to vector<1x128xf32>
    %81 = arith.divf %79, %80 : vector<1x128xf32>
    %82 = vector.broadcast %81 : vector<1x128xf32> to vector<8x128xf32>
    %83 = arith.subf %77, %82 : vector<8x128xf32>
    %84 = arith.mulf %83, %83 : vector<8x128xf32>
    %cst_64 = arith.constant dense<0.000000e+00> : vector<128xf32>
    %85 = vector.multi_reduction <add>, %84, %cst_64 [0] : vector<8x128xf32> to vector<128xf32>
    %86 = vector.shape_cast %85 : vector<128xf32> to vector<1x128xf32>
    %cst_65 = arith.constant 8.000000e+00 : f32
    %87 = vector.broadcast %cst_65 : f32 to vector<1x128xf32>
    %88 = arith.divf %86, %87 : vector<1x128xf32>
    %89 = vector.broadcast %81 : vector<1x128xf32> to vector<8x128xf32>
    %90 = arith.subf %77, %89 : vector<8x128xf32>
    %cst_66 = arith.constant 9.99999974E-6 : f32
    %91 = vector.broadcast %cst_66 : f32 to vector<1x128xf32>
    %92 = arith.addf %88, %91 : vector<1x128xf32>
    %93 = math.rsqrt %92 : vector<1x128xf32>
    %94 = vector.broadcast %93 : vector<1x128xf32> to vector<8x128xf32>
    %95 = arith.mulf %90, %94 : vector<8x128xf32>
    %c1_67 = arith.constant 1 : index
    %c0_68 = arith.constant 0 : index
    %c0_69 = arith.constant 0 : index
    %96 = vector.load %arg14[%c1_67, %c0_68, %c0_69] : memref<4x1x128xf32, #tpu.memory_space<vmem>>, vector<1x1x128xf32>
    %97 = vector.shape_cast %96 : vector<1x1x128xf32> to vector<1x128xf32>
    %98 = vector.broadcast %97 : vector<1x128xf32> to vector<8x128xf32>
    %99 = arith.mulf %95, %98 : vector<8x128xf32>
    %c1_70 = arith.constant 1 : index
    %c0_71 = arith.constant 0 : index
    %c0_72 = arith.constant 0 : index
    %100 = vector.load %arg15[%c1_70, %c0_71, %c0_72] : memref<4x1x128xf32, #tpu.memory_space<vmem>>, vector<1x1x128xf32>
    %101 = vector.shape_cast %100 : vector<1x1x128xf32> to vector<1x128xf32>
    %102 = vector.broadcast %101 : vector<1x128xf32> to vector<8x128xf32>
    %103 = arith.addf %99, %102 : vector<8x128xf32>
    %c0_73 = arith.constant 0 : index
    %c0_74 = arith.constant 0 : index
    %c0_75 = arith.constant 0 : index
    %104 = vector.load %arg10[%c0_73, %c0_74, %c0_75] : memref<3x5x8xf32, #tpu.memory_space<vmem>>, vector<1x5x8xf32>
    %105 = vector.shape_cast %104 : vector<1x5x8xf32> to vector<5x8xf32>
    %c0_76 = arith.constant 0 : index
    %c0_77 = arith.constant 0 : index
    %c0_78 = arith.constant 0 : index
    %106 = vector.load %arg4[%c0_76, %c0_77, %c0_78] : memref<3x128x128xf32, #tpu.memory_space<vmem>>, vector<1x128x128xf32>
    %107 = vector.shape_cast %106 : vector<1x128x128xf32> to vector<128x128xf32>
    %cst_79 = arith.constant dense<0.000000e+00> : vector<8x128xf32>
    %108 = tpu.matmul %103, %107, %cst_79 {dimension_numbers = #tpu.dot_dimension_numbers<[1], [0], [0], [1], [0, 0, 1, 1], [], []>} : vector<8x128xf32>, vector<128x128xf32>, vector<8x128xf32> -> vector<8x128xf32>
    %cst_80 = arith.constant dense<0.000000e+00> : vector<5x128xf32>
    %109 = tpu.matmul %105, %108, %cst_80 {dimension_numbers = #tpu.dot_dimension_numbers<[1], [0], [0], [1], [0, 0, 1, 1], [], []>} : vector<5x8xf32>, vector<8x128xf32>, vector<5x128xf32> -> vector<5x128xf32>
    %c1_81 = arith.constant 1 : index
    %c0_82 = arith.constant 0 : index
    %c0_83 = arith.constant 0 : index
    %110 = vector.load %arg10[%c1_81, %c0_82, %c0_83] : memref<3x5x8xf32, #tpu.memory_space<vmem>>, vector<1x5x8xf32>
    %111 = vector.shape_cast %110 : vector<1x5x8xf32> to vector<5x8xf32>
    %c1_84 = arith.constant 1 : index
    %c0_85 = arith.constant 0 : index
    %c0_86 = arith.constant 0 : index
    %112 = vector.load %arg4[%c1_84, %c0_85, %c0_86] : memref<3x128x128xf32, #tpu.memory_space<vmem>>, vector<1x128x128xf32>
    %113 = vector.shape_cast %112 : vector<1x128x128xf32> to vector<128x128xf32>
    %cst_87 = arith.constant dense<0.000000e+00> : vector<8x128xf32>
    %114 = tpu.matmul %103, %113, %cst_87 {dimension_numbers = #tpu.dot_dimension_numbers<[1], [0], [0], [1], [0, 0, 1, 1], [], []>} : vector<8x128xf32>, vector<128x128xf32>, vector<8x128xf32> -> vector<8x128xf32>
    %cst_88 = arith.constant dense<0.000000e+00> : vector<5x128xf32>
    %115 = tpu.matmul %111, %114, %cst_88 {dimension_numbers = #tpu.dot_dimension_numbers<[1], [0], [0], [1], [0, 0, 1, 1], [], []>} : vector<5x8xf32>, vector<8x128xf32>, vector<5x128xf32> -> vector<5x128xf32>
    %116 = arith.addf %109, %115 : vector<5x128xf32>
    %c2_89 = arith.constant 2 : index
    %c0_90 = arith.constant 0 : index
    %c0_91 = arith.constant 0 : index
    %117 = vector.load %arg10[%c2_89, %c0_90, %c0_91] : memref<3x5x8xf32, #tpu.memory_space<vmem>>, vector<1x5x8xf32>
    %118 = vector.shape_cast %117 : vector<1x5x8xf32> to vector<5x8xf32>
    %c2_92 = arith.constant 2 : index
    %c0_93 = arith.constant 0 : index
    %c0_94 = arith.constant 0 : index
    %119 = vector.load %arg4[%c2_92, %c0_93, %c0_94] : memref<3x128x128xf32, #tpu.memory_space<vmem>>, vector<1x128x128xf32>
    %120 = vector.shape_cast %119 : vector<1x128x128xf32> to vector<128x128xf32>
    %cst_95 = arith.constant dense<0.000000e+00> : vector<8x128xf32>
    %121 = tpu.matmul %103, %120, %cst_95 {dimension_numbers = #tpu.dot_dimension_numbers<[1], [0], [0], [1], [0, 0, 1, 1], [], []>} : vector<8x128xf32>, vector<128x128xf32>, vector<8x128xf32> -> vector<8x128xf32>
    %cst_96 = arith.constant dense<0.000000e+00> : vector<5x128xf32>
    %122 = tpu.matmul %118, %121, %cst_96 {dimension_numbers = #tpu.dot_dimension_numbers<[1], [0], [0], [1], [0, 0, 1, 1], [], []>} : vector<5x8xf32>, vector<8x128xf32>, vector<5x128xf32> -> vector<5x128xf32>
    %123 = arith.addf %116, %122 : vector<5x128xf32>
    %c0_97 = arith.constant 0 : index
    %c0_98 = arith.constant 0 : index
    %c0_99 = arith.constant 0 : index
    %124 = vector.load %arg11[%c0_97, %c0_98, %c0_99] : memref<3x8x5xf32, #tpu.memory_space<vmem>>, vector<1x8x5xf32>
    %125 = vector.shape_cast %124 : vector<1x8x5xf32> to vector<8x5xf32>
    %c0_100 = arith.constant 0 : index
    %c0_101 = arith.constant 0 : index
    %c0_102 = arith.constant 0 : index
    %126 = vector.load %arg5[%c0_100, %c0_101, %c0_102] : memref<3x128x128xf32, #tpu.memory_space<vmem>>, vector<1x128x128xf32>
    %127 = vector.shape_cast %126 : vector<1x128x128xf32> to vector<128x128xf32>
    %cst_103 = arith.constant dense<0.000000e+00> : vector<5x128xf32>
    %128 = tpu.matmul %123, %127, %cst_103 {dimension_numbers = #tpu.dot_dimension_numbers<[1], [0], [0], [1], [0, 0, 1, 1], [], []>} : vector<5x128xf32>, vector<128x128xf32>, vector<5x128xf32> -> vector<5x128xf32>
    %cst_104 = arith.constant dense<0.000000e+00> : vector<8x128xf32>
    %129 = tpu.matmul %125, %128, %cst_104 {dimension_numbers = #tpu.dot_dimension_numbers<[1], [0], [0], [1], [0, 0, 1, 1], [], []>} : vector<8x5xf32>, vector<5x128xf32>, vector<8x128xf32> -> vector<8x128xf32>
    %c1_105 = arith.constant 1 : index
    %c0_106 = arith.constant 0 : index
    %c0_107 = arith.constant 0 : index
    %130 = vector.load %arg11[%c1_105, %c0_106, %c0_107] : memref<3x8x5xf32, #tpu.memory_space<vmem>>, vector<1x8x5xf32>
    %131 = vector.shape_cast %130 : vector<1x8x5xf32> to vector<8x5xf32>
    %c1_108 = arith.constant 1 : index
    %c0_109 = arith.constant 0 : index
    %c0_110 = arith.constant 0 : index
    %132 = vector.load %arg5[%c1_108, %c0_109, %c0_110] : memref<3x128x128xf32, #tpu.memory_space<vmem>>, vector<1x128x128xf32>
    %133 = vector.shape_cast %132 : vector<1x128x128xf32> to vector<128x128xf32>
    %cst_111 = arith.constant dense<0.000000e+00> : vector<5x128xf32>
    %134 = tpu.matmul %123, %133, %cst_111 {dimension_numbers = #tpu.dot_dimension_numbers<[1], [0], [0], [1], [0, 0, 1, 1], [], []>} : vector<5x128xf32>, vector<128x128xf32>, vector<5x128xf32> -> vector<5x128xf32>
    %cst_112 = arith.constant dense<0.000000e+00> : vector<8x128xf32>
    %135 = tpu.matmul %131, %134, %cst_112 {dimension_numbers = #tpu.dot_dimension_numbers<[1], [0], [0], [1], [0, 0, 1, 1], [], []>} : vector<8x5xf32>, vector<5x128xf32>, vector<8x128xf32> -> vector<8x128xf32>
    %136 = arith.addf %129, %135 : vector<8x128xf32>
    %c2_113 = arith.constant 2 : index
    %c0_114 = arith.constant 0 : index
    %c0_115 = arith.constant 0 : index
    %137 = vector.load %arg11[%c2_113, %c0_114, %c0_115] : memref<3x8x5xf32, #tpu.memory_space<vmem>>, vector<1x8x5xf32>
    %138 = vector.shape_cast %137 : vector<1x8x5xf32> to vector<8x5xf32>
    %c2_116 = arith.constant 2 : index
    %c0_117 = arith.constant 0 : index
    %c0_118 = arith.constant 0 : index
    %139 = vector.load %arg5[%c2_116, %c0_117, %c0_118] : memref<3x128x128xf32, #tpu.memory_space<vmem>>, vector<1x128x128xf32>
    %140 = vector.shape_cast %139 : vector<1x128x128xf32> to vector<128x128xf32>
    %cst_119 = arith.constant dense<0.000000e+00> : vector<5x128xf32>
    %141 = tpu.matmul %123, %140, %cst_119 {dimension_numbers = #tpu.dot_dimension_numbers<[1], [0], [0], [1], [0, 0, 1, 1], [], []>} : vector<5x128xf32>, vector<128x128xf32>, vector<5x128xf32> -> vector<5x128xf32>
    %cst_120 = arith.constant dense<0.000000e+00> : vector<8x128xf32>
    %142 = tpu.matmul %138, %141, %cst_120 {dimension_numbers = #tpu.dot_dimension_numbers<[1], [0], [0], [1], [0, 0, 1, 1], [], []>} : vector<8x5xf32>, vector<5x128xf32>, vector<8x128xf32> -> vector<8x128xf32>
    %143 = arith.addf %136, %142 : vector<8x128xf32>
    %cst_121 = arith.constant 0.000000e+00 : f32
    %144 = vector.broadcast %cst_121 : f32 to vector<8x128xf32>
    %145 = arith.cmpf oge, %143, %144 : vector<8x128xf32>
    %cst_122 = arith.constant 0.000000e+00 : f32
    %146 = vector.broadcast %cst_122 : f32 to vector<8x128xf32>
    %147 = arith.mulf %146, %143 : vector<8x128xf32>
    %148 = arith.select %145, %143, %147 : vector<8x128xi1>, vector<8x128xf32>
    %cst_123 = arith.constant dense<0.000000e+00> : vector<128xf32>
    %149 = vector.multi_reduction <add>, %148, %cst_123 [0] : vector<8x128xf32> to vector<128xf32>
    %150 = vector.shape_cast %149 : vector<128xf32> to vector<1x128xf32>
    %cst_124 = arith.constant 8.000000e+00 : f32
    %151 = vector.broadcast %cst_124 : f32 to vector<1x128xf32>
    %152 = arith.divf %150, %151 : vector<1x128xf32>
    %153 = vector.broadcast %152 : vector<1x128xf32> to vector<8x128xf32>
    %154 = arith.subf %148, %153 : vector<8x128xf32>
    %155 = arith.mulf %154, %154 : vector<8x128xf32>
    %cst_125 = arith.constant dense<0.000000e+00> : vector<128xf32>
    %156 = vector.multi_reduction <add>, %155, %cst_125 [0] : vector<8x128xf32> to vector<128xf32>
    %157 = vector.shape_cast %156 : vector<128xf32> to vector<1x128xf32>
    %cst_126 = arith.constant 8.000000e+00 : f32
    %158 = vector.broadcast %cst_126 : f32 to vector<1x128xf32>
    %159 = arith.divf %157, %158 : vector<1x128xf32>
    %160 = vector.broadcast %152 : vector<1x128xf32> to vector<8x128xf32>
    %161 = arith.subf %148, %160 : vector<8x128xf32>
    %cst_127 = arith.constant 9.99999974E-6 : f32
    %162 = vector.broadcast %cst_127 : f32 to vector<1x128xf32>
    %163 = arith.addf %159, %162 : vector<1x128xf32>
    %164 = math.rsqrt %163 : vector<1x128xf32>
    %165 = vector.broadcast %164 : vector<1x128xf32> to vector<8x128xf32>
    %166 = arith.mulf %161, %165 : vector<8x128xf32>
    %c2_128 = arith.constant 2 : index
    %c0_129 = arith.constant 0 : index
    %c0_130 = arith.constant 0 : index
    %167 = vector.load %arg14[%c2_128, %c0_129, %c0_130] : memref<4x1x128xf32, #tpu.memory_space<vmem>>, vector<1x1x128xf32>
    %168 = vector.shape_cast %167 : vector<1x1x128xf32> to vector<1x128xf32>
    %169 = vector.broadcast %168 : vector<1x128xf32> to vector<8x128xf32>
    %170 = arith.mulf %166, %169 : vector<8x128xf32>
    %c2_131 = arith.constant 2 : index
    %c0_132 = arith.constant 0 : index
    %c0_133 = arith.constant 0 : index
    %171 = vector.load %arg15[%c2_131, %c0_132, %c0_133] : memref<4x1x128xf32, #tpu.memory_space<vmem>>, vector<1x1x128xf32>
    %172 = vector.shape_cast %171 : vector<1x1x128xf32> to vector<1x128xf32>
    %173 = vector.broadcast %172 : vector<1x128xf32> to vector<8x128xf32>
    %174 = arith.addf %170, %173 : vector<8x128xf32>
    %c0_134 = arith.constant 0 : index
    %c0_135 = arith.constant 0 : index
    %c0_136 = arith.constant 0 : index
    %175 = vector.load %arg12[%c0_134, %c0_135, %c0_136] : memref<3x16x8xf32, #tpu.memory_space<vmem>>, vector<1x16x8xf32>
    %176 = vector.shape_cast %175 : vector<1x16x8xf32> to vector<16x8xf32>
    %c0_137 = arith.constant 0 : index
    %c0_138 = arith.constant 0 : index
    %c0_139 = arith.constant 0 : index
    %177 = vector.load %arg6[%c0_137, %c0_138, %c0_139] : memref<3x128x128xf32, #tpu.memory_space<vmem>>, vector<1x128x128xf32>
    %178 = vector.shape_cast %177 : vector<1x128x128xf32> to vector<128x128xf32>
    %cst_140 = arith.constant dense<0.000000e+00> : vector<8x128xf32>
    %179 = tpu.matmul %174, %178, %cst_140 {dimension_numbers = #tpu.dot_dimension_numbers<[1], [0], [0], [1], [0, 0, 1, 1], [], []>} : vector<8x128xf32>, vector<128x128xf32>, vector<8x128xf32> -> vector<8x128xf32>
    %cst_141 = arith.constant dense<0.000000e+00> : vector<16x128xf32>
    %180 = tpu.matmul %176, %179, %cst_141 {dimension_numbers = #tpu.dot_dimension_numbers<[1], [0], [0], [1], [0, 0, 1, 1], [], []>} : vector<16x8xf32>, vector<8x128xf32>, vector<16x128xf32> -> vector<16x128xf32>
    %c1_142 = arith.constant 1 : index
    %c0_143 = arith.constant 0 : index
    %c0_144 = arith.constant 0 : index
    %181 = vector.load %arg12[%c1_142, %c0_143, %c0_144] : memref<3x16x8xf32, #tpu.memory_space<vmem>>, vector<1x16x8xf32>
    %182 = vector.shape_cast %181 : vector<1x16x8xf32> to vector<16x8xf32>
    %c1_145 = arith.constant 1 : index
    %c0_146 = arith.constant 0 : index
    %c0_147 = arith.constant 0 : index
    %183 = vector.load %arg6[%c1_145, %c0_146, %c0_147] : memref<3x128x128xf32, #tpu.memory_space<vmem>>, vector<1x128x128xf32>
    %184 = vector.shape_cast %183 : vector<1x128x128xf32> to vector<128x128xf32>
    %cst_148 = arith.constant dense<0.000000e+00> : vector<8x128xf32>
    %185 = tpu.matmul %174, %184, %cst_148 {dimension_numbers = #tpu.dot_dimension_numbers<[1], [0], [0], [1], [0, 0, 1, 1], [], []>} : vector<8x128xf32>, vector<128x128xf32>, vector<8x128xf32> -> vector<8x128xf32>
    %cst_149 = arith.constant dense<0.000000e+00> : vector<16x128xf32>
    %186 = tpu.matmul %182, %185, %cst_149 {dimension_numbers = #tpu.dot_dimension_numbers<[1], [0], [0], [1], [0, 0, 1, 1], [], []>} : vector<16x8xf32>, vector<8x128xf32>, vector<16x128xf32> -> vector<16x128xf32>
    %187 = arith.addf %180, %186 : vector<16x128xf32>
    %c2_150 = arith.constant 2 : index
    %c0_151 = arith.constant 0 : index
    %c0_152 = arith.constant 0 : index
    %188 = vector.load %arg12[%c2_150, %c0_151, %c0_152] : memref<3x16x8xf32, #tpu.memory_space<vmem>>, vector<1x16x8xf32>
    %189 = vector.shape_cast %188 : vector<1x16x8xf32> to vector<16x8xf32>
    %c2_153 = arith.constant 2 : index
    %c0_154 = arith.constant 0 : index
    %c0_155 = arith.constant 0 : index
    %190 = vector.load %arg6[%c2_153, %c0_154, %c0_155] : memref<3x128x128xf32, #tpu.memory_space<vmem>>, vector<1x128x128xf32>
    %191 = vector.shape_cast %190 : vector<1x128x128xf32> to vector<128x128xf32>
    %cst_156 = arith.constant dense<0.000000e+00> : vector<8x128xf32>
    %192 = tpu.matmul %174, %191, %cst_156 {dimension_numbers = #tpu.dot_dimension_numbers<[1], [0], [0], [1], [0, 0, 1, 1], [], []>} : vector<8x128xf32>, vector<128x128xf32>, vector<8x128xf32> -> vector<8x128xf32>
    %cst_157 = arith.constant dense<0.000000e+00> : vector<16x128xf32>
    %193 = tpu.matmul %189, %192, %cst_157 {dimension_numbers = #tpu.dot_dimension_numbers<[1], [0], [0], [1], [0, 0, 1, 1], [], []>} : vector<16x8xf32>, vector<8x128xf32>, vector<16x128xf32> -> vector<16x128xf32>
    %194 = arith.addf %187, %193 : vector<16x128xf32>
    %cst_158 = arith.constant 0.000000e+00 : f32
    %195 = vector.broadcast %cst_158 : f32 to vector<16x128xf32>
    %196 = arith.cmpf oge, %194, %195 : vector<16x128xf32>
    %cst_159 = arith.constant 0.000000e+00 : f32
    %197 = vector.broadcast %cst_159 : f32 to vector<16x128xf32>
    %198 = arith.mulf %197, %194 : vector<16x128xf32>
    %199 = arith.select %196, %194, %198 : vector<16x128xi1>, vector<16x128xf32>
    %cst_160 = arith.constant dense<0.000000e+00> : vector<128xf32>
    %200 = vector.multi_reduction <add>, %199, %cst_160 [0] : vector<16x128xf32> to vector<128xf32>
    %201 = vector.shape_cast %200 : vector<128xf32> to vector<1x128xf32>
    %cst_161 = arith.constant 1.600000e+01 : f32
    %202 = vector.broadcast %cst_161 : f32 to vector<1x128xf32>
    %203 = arith.divf %201, %202 : vector<1x128xf32>
    %204 = vector.broadcast %203 : vector<1x128xf32> to vector<16x128xf32>
    %205 = arith.subf %199, %204 : vector<16x128xf32>
    %206 = arith.mulf %205, %205 : vector<16x128xf32>
    %cst_162 = arith.constant dense<0.000000e+00> : vector<128xf32>
    %207 = vector.multi_reduction <add>, %206, %cst_162 [0] : vector<16x128xf32> to vector<128xf32>
    %208 = vector.shape_cast %207 : vector<128xf32> to vector<1x128xf32>
    %cst_163 = arith.constant 1.600000e+01 : f32
    %209 = vector.broadcast %cst_163 : f32 to vector<1x128xf32>
    %210 = arith.divf %208, %209 : vector<1x128xf32>
    %211 = vector.broadcast %203 : vector<1x128xf32> to vector<16x128xf32>
    %212 = arith.subf %199, %211 : vector<16x128xf32>
    %cst_164 = arith.constant 9.99999974E-6 : f32
    %213 = vector.broadcast %cst_164 : f32 to vector<1x128xf32>
    %214 = arith.addf %210, %213 : vector<1x128xf32>
    %215 = math.rsqrt %214 : vector<1x128xf32>
    %216 = vector.broadcast %215 : vector<1x128xf32> to vector<16x128xf32>
    %217 = arith.mulf %212, %216 : vector<16x128xf32>
    %c3 = arith.constant 3 : index
    %c0_165 = arith.constant 0 : index
    %c0_166 = arith.constant 0 : index
    %218 = vector.load %arg14[%c3, %c0_165, %c0_166] : memref<4x1x128xf32, #tpu.memory_space<vmem>>, vector<1x1x128xf32>
    %219 = vector.shape_cast %218 : vector<1x1x128xf32> to vector<1x128xf32>
    %220 = vector.broadcast %219 : vector<1x128xf32> to vector<16x128xf32>
    %221 = arith.mulf %217, %220 : vector<16x128xf32>
    %c3_167 = arith.constant 3 : index
    %c0_168 = arith.constant 0 : index
    %c0_169 = arith.constant 0 : index
    %222 = vector.load %arg15[%c3_167, %c0_168, %c0_169] : memref<4x1x128xf32, #tpu.memory_space<vmem>>, vector<1x1x128xf32>
    %223 = vector.shape_cast %222 : vector<1x1x128xf32> to vector<1x128xf32>
    %224 = vector.broadcast %223 : vector<1x128xf32> to vector<16x128xf32>
    %225 = arith.addf %221, %224 : vector<16x128xf32>
    %c0_170 = arith.constant 0 : index
    %c0_171 = arith.constant 0 : index
    %c0_172 = arith.constant 0 : index
    %226 = vector.load %arg13[%c0_170, %c0_171, %c0_172] : memref<3x32x16xf32, #tpu.memory_space<vmem>>, vector<1x32x16xf32>
    %227 = vector.shape_cast %226 : vector<1x32x16xf32> to vector<32x16xf32>
    %c0_173 = arith.constant 0 : index
    %c0_174 = arith.constant 0 : index
    %c0_175 = arith.constant 0 : index
    %228 = vector.load %arg7[%c0_173, %c0_174, %c0_175] : memref<3x128x128xf32, #tpu.memory_space<vmem>>, vector<1x128x128xf32>
    %229 = vector.shape_cast %228 : vector<1x128x128xf32> to vector<128x128xf32>
    %cst_176 = arith.constant dense<0.000000e+00> : vector<16x128xf32>
    %230 = tpu.matmul %225, %229, %cst_176 {dimension_numbers = #tpu.dot_dimension_numbers<[1], [0], [0], [1], [0, 0, 1, 1], [], []>} : vector<16x128xf32>, vector<128x128xf32>, vector<16x128xf32> -> vector<16x128xf32>
    %cst_177 = arith.constant dense<0.000000e+00> : vector<32x128xf32>
    %231 = tpu.matmul %227, %230, %cst_177 {dimension_numbers = #tpu.dot_dimension_numbers<[1], [0], [0], [1], [0, 0, 1, 1], [], []>} : vector<32x16xf32>, vector<16x128xf32>, vector<32x128xf32> -> vector<32x128xf32>
    %c1_178 = arith.constant 1 : index
    %c0_179 = arith.constant 0 : index
    %c0_180 = arith.constant 0 : index
    %232 = vector.load %arg13[%c1_178, %c0_179, %c0_180] : memref<3x32x16xf32, #tpu.memory_space<vmem>>, vector<1x32x16xf32>
    %233 = vector.shape_cast %232 : vector<1x32x16xf32> to vector<32x16xf32>
    %c1_181 = arith.constant 1 : index
    %c0_182 = arith.constant 0 : index
    %c0_183 = arith.constant 0 : index
    %234 = vector.load %arg7[%c1_181, %c0_182, %c0_183] : memref<3x128x128xf32, #tpu.memory_space<vmem>>, vector<1x128x128xf32>
    %235 = vector.shape_cast %234 : vector<1x128x128xf32> to vector<128x128xf32>
    %cst_184 = arith.constant dense<0.000000e+00> : vector<16x128xf32>
    %236 = tpu.matmul %225, %235, %cst_184 {dimension_numbers = #tpu.dot_dimension_numbers<[1], [0], [0], [1], [0, 0, 1, 1], [], []>} : vector<16x128xf32>, vector<128x128xf32>, vector<16x128xf32> -> vector<16x128xf32>
    %cst_185 = arith.constant dense<0.000000e+00> : vector<32x128xf32>
    %237 = tpu.matmul %233, %236, %cst_185 {dimension_numbers = #tpu.dot_dimension_numbers<[1], [0], [0], [1], [0, 0, 1, 1], [], []>} : vector<32x16xf32>, vector<16x128xf32>, vector<32x128xf32> -> vector<32x128xf32>
    %238 = arith.addf %231, %237 : vector<32x128xf32>
    %c2_186 = arith.constant 2 : index
    %c0_187 = arith.constant 0 : index
    %c0_188 = arith.constant 0 : index
    %239 = vector.load %arg13[%c2_186, %c0_187, %c0_188] : memref<3x32x16xf32, #tpu.memory_space<vmem>>, vector<1x32x16xf32>
    %240 = vector.shape_cast %239 : vector<1x32x16xf32> to vector<32x16xf32>
    %c2_189 = arith.constant 2 : index
    %c0_190 = arith.constant 0 : index
    %c0_191 = arith.constant 0 : index
    %241 = vector.load %arg7[%c2_189, %c0_190, %c0_191] : memref<3x128x128xf32, #tpu.memory_space<vmem>>, vector<1x128x128xf32>
    %242 = vector.shape_cast %241 : vector<1x128x128xf32> to vector<128x128xf32>
    %cst_192 = arith.constant dense<0.000000e+00> : vector<16x128xf32>
    %243 = tpu.matmul %225, %242, %cst_192 {dimension_numbers = #tpu.dot_dimension_numbers<[1], [0], [0], [1], [0, 0, 1, 1], [], []>} : vector<16x128xf32>, vector<128x128xf32>, vector<16x128xf32> -> vector<16x128xf32>
    %cst_193 = arith.constant dense<0.000000e+00> : vector<32x128xf32>
    %244 = tpu.matmul %240, %243, %cst_193 {dimension_numbers = #tpu.dot_dimension_numbers<[1], [0], [0], [1], [0, 0, 1, 1], [], []>} : vector<32x16xf32>, vector<16x128xf32>, vector<32x128xf32> -> vector<32x128xf32>
    %245 = arith.addf %238, %244 : vector<32x128xf32>
    %c0_194 = arith.constant 0 : index
    %c0_195 = arith.constant 0 : index
    %c0_196 = arith.constant 0 : index
    %246 = vector.load %arg16[%c0_194, %c0_195, %c0_196] : memref<1x32x128xf32, #tpu.memory_space<vmem>>, vector<1x32x128xf32>
    %247 = vector.shape_cast %246 : vector<1x32x128xf32> to vector<32x128xf32>
    %248 = vector.shape_cast %245 : vector<32x128xf32> to vector<1x32x128xf32>
    tpu.vector_store %arg16[%c0_194, %c0_195, %c0_196], %248 {strides = array<i32>} : memref<1x32x128xf32, #tpu.memory_space<vmem>>, vector<1x32x128xf32>,
    return
  }
  func.func @transform_0(%arg0: i32) -> (i32, i32, i32) {
    %c0_i32 = arith.constant 0 : i32
    %c0_i32_0 = arith.constant 0 : i32
    %c0_i32_1 = arith.constant 0 : i32
    return %arg0, %c0_i32, %c0_i32_0 : i32, i32, i32
  }
  func.func @transform_1(%arg0: i32) -> (i32, i32, i32) {
    %c0_i32 = arith.constant 0 : i32
    %c0_i32_0 = arith.constant 0 : i32
    %c0_i32_1 = arith.constant 0 : i32
    %c0_i32_2 = arith.constant 0 : i32
    return %c0_i32, %c0_i32_0, %c0_i32_1 : i32, i32, i32
  }
  func.func @transform_2(%arg0: i32) -> (i32, i32, i32) {
    %c0_i32 = arith.constant 0 : i32
    %c0_i32_0 = arith.constant 0 : i32
    %c0_i32_1 = arith.constant 0 : i32
    %c0_i32_2 = arith.constant 0 : i32
    return %c0_i32, %c0_i32_0, %c0_i32_1 : i32, i32, i32
  }
  func.func @transform_3(%arg0: i32) -> (i32, i32, i32) {
    %c0_i32 = arith.constant 0 : i32
    %c0_i32_0 = arith.constant 0 : i32
    %c0_i32_1 = arith.constant 0 : i32
    %c0_i32_2 = arith.constant 0 : i32
    return %c0_i32, %c0_i32_0, %c0_i32_1 : i32, i32, i32
  }
  func.func @transform_4(%arg0: i32) -> (i32, i32, i32) {
    %c0_i32 = arith.constant 0 : i32
    %c0_i32_0 = arith.constant 0 : i32
    %c0_i32_1 = arith.constant 0 : i32
    %c0_i32_2 = arith.constant 0 : i32
    return %c0_i32, %c0_i32_0, %c0_i32_1 : i32, i32, i32
  }
  func.func @transform_5(%arg0: i32) -> (i32, i32, i32) {
    %c0_i32 = arith.constant 0 : i32
    %c0_i32_0 = arith.constant 0 : i32
    %c0_i32_1 = arith.constant 0 : i32
    %c0_i32_2 = arith.constant 0 : i32
    return %c0_i32, %c0_i32_0, %c0_i32_1 : i32, i32, i32
  }
  func.func @transform_6(%arg0: i32) -> (i32, i32, i32) {
    %c0_i32 = arith.constant 0 : i32
    %c0_i32_0 = arith.constant 0 : i32
    %c0_i32_1 = arith.constant 0 : i32
    %c0_i32_2 = arith.constant 0 : i32
    return %c0_i32, %c0_i32_0, %c0_i32_1 : i32, i32, i32
  }
  func.func @transform_7(%arg0: i32) -> (i32, i32, i32) {
    %c0_i32 = arith.constant 0 : i32
    %c0_i32_0 = arith.constant 0 : i32
    %c0_i32_1 = arith.constant 0 : i32
    %c0_i32_2 = arith.constant 0 : i32
    return %c0_i32, %c0_i32_0, %c0_i32_1 : i32, i32, i32
  }
  func.func @transform_8(%arg0: i32) -> (i32, i32, i32) {
    %c0_i32 = arith.constant 0 : i32
    %c0_i32_0 = arith.constant 0 : i32
    %c0_i32_1 = arith.constant 0 : i32
    %c0_i32_2 = arith.constant 0 : i32
    return %c0_i32, %c0_i32_0, %c0_i32_1 : i32, i32, i32
  }
  func.func @transform_9(%arg0: i32) -> (i32, i32, i32) {
    %c0_i32 = arith.constant 0 : i32
    %c0_i32_0 = arith.constant 0 : i32
    %c0_i32_1 = arith.constant 0 : i32
    %c0_i32_2 = arith.constant 0 : i32
    return %c0_i32, %c0_i32_0, %c0_i32_1 : i32, i32, i32
  }
  func.func @transform_10(%arg0: i32) -> (i32, i32, i32) {
    %c0_i32 = arith.constant 0 : i32
    %c0_i32_0 = arith.constant 0 : i32
    %c0_i32_1 = arith.constant 0 : i32
    %c0_i32_2 = arith.constant 0 : i32
    return %c0_i32, %c0_i32_0, %c0_i32_1 : i32, i32, i32
  }
  func.func @transform_11(%arg0: i32) -> (i32, i32, i32) {
    %c0_i32 = arith.constant 0 : i32
    %c0_i32_0 = arith.constant 0 : i32
    %c0_i32_1 = arith.constant 0 : i32
    %c0_i32_2 = arith.constant 0 : i32
    return %c0_i32, %c0_i32_0, %c0_i32_1 : i32, i32, i32
  }
  func.func @transform_12(%arg0: i32) -> (i32, i32, i32) {
    %c0_i32 = arith.constant 0 : i32
    %c0_i32_0 = arith.constant 0 : i32
    %c0_i32_1 = arith.constant 0 : i32
    %c0_i32_2 = arith.constant 0 : i32
    return %c0_i32, %c0_i32_0, %c0_i32_1 : i32, i32, i32
  }
  func.func @transform_13(%arg0: i32) -> (i32, i32, i32) {
    %c0_i32 = arith.constant 0 : i32
    %c0_i32_0 = arith.constant 0 : i32
    %c0_i32_1 = arith.constant 0 : i32
    %c0_i32_2 = arith.constant 0 : i32
    return %c0_i32, %c0_i32_0, %c0_i32_1 : i32, i32, i32
  }
  func.func @transform_14(%arg0: i32) -> (i32, i32, i32) {
    %c0_i32 = arith.constant 0 : i32
    %c0_i32_0 = arith.constant 0 : i32
    %c0_i32_1 = arith.constant 0 : i32
    %c0_i32_2 = arith.constant 0 : i32
    return %c0_i32, %c0_i32_0, %c0_i32_1 : i32, i32, i32
  }
  func.func @transform_15(%arg0: i32) -> (i32, i32, i32) {
    %c0_i32 = arith.constant 0 : i32
    %c0_i32_0 = arith.constant 0 : i32
    %c0_i32_1 = arith.constant 0 : i32
    return %arg0, %c0_i32, %c0_i32_0 : i32, i32, i32
  }
}

</mosaic_0001>

<bundles_post_ra>
// kernel: tpu_custom_call.1
= control target key start
LH: loop header
LB: loop body
LE: loop exit
PB: predicated region body
PF: predicated region fallthrough
CT: control target
= control target key end

     0   :  { %s6916_s0 = inlined_call_operand.vmem [shape: f32[2,32,128], index: 0, kind: input, shape index: {}]   ;;  %s6917_s1 = inlined_call_operand.hbm [shape: f32[3,128,128], index: 1, kind: input, shape index: {}]   ;;  %s6918_s2 = inlined_call_operand.hbm [shape: f32[3,128,128], index: 2, kind: input, shape index: {}]   ;;  %s6919_s3 = inlined_call_operand.hbm [shape: f32[3,128,128], index: 3, kind: input, shape index: {}]   ;;  %s6920_s4 = inlined_call_operand.hbm [shape: f32[3,128,128], index: 4, kind: input, shape index: {}]   ;;  %s6921_s5 = inlined_call_operand.hbm [shape: f32[3,128,128], index: 5, kind: input, shape index: {}]   ;;  %s6922_s6 = inlined_call_operand.hbm [shape: f32[3,128,128], index: 6, kind: input, shape index: {}]   ;;  %s6923_s7 = inlined_call_operand.vmem [shape: f32[3,16,32], index: 7, kind: input, shape index: {}]   ;;  %s6924_s8 = inlined_call_operand.vmem [shape: f32[3,8,16], index: 8, kind: input, shape index: {}]   ;;  %s6925_s9 = inlined_call_operand.vmem [shape: f32[3,5,8], index: 9, kind: input, shape index: {}]   ;;  %s6926_s10 = inlined_call_operand.vmem [shape: f32[3,8,5], index: 10, kind: input, shape index: {}]   ;;  %s6927_s11 = inlined_call_operand.vmem [shape: f32[3,16,8], index: 11, kind: input, shape index: {}]   ;;  %s6928_s12 = inlined_call_operand.vmem [shape: f32[3,32,16], index: 12, kind: input, shape index: {}]   ;;  %s6929_s13 = inlined_call_operand.vmem [shape: f32[4,1,128], index: 13, kind: input, shape index: {}]   ;;  %s6930_s14 = inlined_call_operand.vmem [shape: f32[4,1,128], index: 14, kind: input, shape index: {}]   ;;  %s6931_s15 = inlined_call_operand.hbm [shape: f32[2,32,128], index: 15, kind: output, shape index: {}]  }
   0x1   :  { %6947 = sst [smem:[#allocation27_spill]] %s6918_s2 }
   0x2   :  { %6948 = sst [smem:[#allocation28_spill]] %s6927_s11 }
   0x3   :  { %6949 = sst [smem:[#allocation29_spill]] %s6928_s12 }
   0x4   :  { %6950 = sst [smem:[#allocation30_spill]] %s6931_s15 }
   0x5   :  { %20 = vsyncpa [#allocation3], 0 }
   0x6   :  { %21 = vsyncpa [#allocation6], 0 }
   0x7   :  { %22 = vsyncpa [#allocation9], 0 }
   0x8   :  { %23 = vsyncpa [#allocation12], 0 }
   0x9   :  { %24 = vsyncpa [#allocation4], 0 }
   0xa   :  { %26 = vsyncpa [#allocation4 + $0x1], 0  ;;  %s6331_s18 = smov 0   ;;  %s6333_s19 = smov 0  }
   0xb   :  { %s6335_s20 = smov 0   ;;  %s6337_s21 = smov 0  }
   0xc LB: > { %6951 = sst [smem:[#allocation19_spill]] %s6223_s18  ;;  %s6352_s22 = sadd.s32 4294967295, %s6235_s21   ;;  %s6235_s21 = sphi %s6337_s21, %s6987_s21   ;;  %s6231_s20 = sphi %s6335_s20, %s6990_s20   ;;  %s6227_s19 = sphi %s6333_s19, %s6989_s19   ;;  %s6223_s18 = sphi %s6331_s18, %s6988_s18  }
   0xd   : > { %6952 = sst [smem:[#allocation20_spill]] %s6227_s19  ;;  %s4044_s23 = sadd.s32 4294967294, %s6235_s21  }
   0xe   : > { %6953 = sst [smem:[#allocation21_spill]] %s6231_s20  ;;  %s6356_s24 = sadd.s32 1, %s6235_s21  }
   0xf   : > { %6954 = sst [smem:[#allocation22_spill]] %s6235_s21  ;;  %s359_s25 = sadd.s32 1, %s6231_s20 }
  0x10   : > { %6955 = sst [smem:[#allocation23_spill]] %s6356_s24  ;;  %s356_s26 = ssub.s32 %s6235_s21, %s6356_s24 }
  0x11   : > { %p369_p0 = scmp.ne.s32.totalorder %s6231_s20, %s6227_s19  ;;  %p357_p1 = scmp.eq.s32.totalorder %s356_s26, 0 }
  0x12   : > { %p370_p2 = scmp.eq.s32.totalorder %s6352_s22, 1  ;;  %p375_p3 = scmp.ne.s32.totalorder %s6227_s19, %s6223_s18 }
  0x13   : > { %p376_p4 = scmp.eq.s32.totalorder %s4044_s23, 1  ;;  %p4045_p7 = scmp.ge.s32.totalorder %s6235_s21, 1 }
  0x14   : > { %s6367_s27 = scalar_select %p357_p1, %s6231_s20, %s359_s25  }
  0x15   : > { %p6369_p5 = por %p370_p2, %p369_p0  ;;  %p6373_p6 = por %p376_p4, %p375_p3 }
  0x16   : > { %6956 = sst [smem:[#allocation24_spill]] %s6367_s27  ;;  %p383_p8 = scmp.lt.s32.totalorder %s6235_s21, 3 }
  0x17   : > { %s6957_s28 = scalar_select %p6369_p5, 1, 0 }
  0x18   : > { %s6959_s29 = scalar_select %p6373_p6, 1, 0 }
  0x19   : > { %6958 = sst [smem:[#allocation25_spill]] %s6957_s28  ;;  %p6939_p9 = scmp.eq.s32.totalorder %s6352_s22, 0 }
  0x1a   : > { %6960 = sst [smem:[#allocation26_spill]] %s6959_s29  ;;  %p6380_p10 = pnand %p4045_p7, %p383_p8 }
  0x1b   : > { %s6237_s16 = smov [#allocation5]   ;;  %s6238_s25 = smov [#allocation8]  }
  0x1c   : > { %s6961_s30 = scalar_select %p6380_p10, 1, 0 }
  0x1d   : > { %p5900_p11 = pneg %p6380_p10  ;;  %s408_s17 = sshll.u32 %s6237_s16, 4  ;;  %s6386_s17 = int_to_ptr.vmem [resolvable:$true] %s408_s17 }
  0x1e   : > { %s434_s26 = sshll.u32 %s6238_s25, 4  ;;  %s6239_s27 = smov [#allocation2]   ;;  %s6394_s26 = int_to_ptr.vmem [resolvable:$true] %s434_s26 }
  0x1f   : > { %p6390_p12 = pnand %p6939_p9, %p5900_p11  ;;  %s6396_s20 = sshll.u32 %s6239_s27, 4  ;;  %s396_s20 = int_to_ptr.vmem [resolvable:$true] %s6396_s20 }
  0x20   : > { %s6963_s2 = sld [smem:[#allocation27_spill]] }
  0x21   : > { %p6406_p0 = pneg %p6390_p12 }
  0x26   : > { %s5989_s18 = scalar_lea.hbm %s6963_s2, 6144 }
  0x27   : > { %p5990_p13 = scmp.ne.s32.totalorder %s6963_s2, %s5989_s18  ;;  %p5996_p3 = scmp.lt.u32.totalorder %s5989_s18, %s6963_s2 }
  0x29   : > { %p5992_p1 = pnand %p6406_p0, %p5990_p13 }
  0x2b   : > { %p5993_p2 = pneg %p5992_p1 }
  0x2d   : > { %p5998_p4 = pnand %p5996_p3, %p5993_p2 }
  0x2f   : > { %6001 = shalt.err (!%p5998_p4)
}
  0x30   : > { %s6002_s21 = scalar_lea.vmem %s6386_s17, 6144  ;;  %p6010_p9 = scmp.lt.s32.totalorder %s6386_s17, %s6386_s17 }
  0x31   : > { %p6003_p7 = scmp.ne.s32.totalorder %s6386_s17, %s6002_s21  ;;  %p6011_p6 = scmp.lt.s32.totalorder %s6002_s21, %s6002_s21 }
  0x33   : > { %p6005_p8 = pnand %p6003_p7, %p6406_p0  ;;  %p6012_p13 = por %p6011_p6, %p6010_p9 }
  0x35   : > { %p6006_p11 = pneg %p6005_p8 }
  0x37   : > { %p6013_p1 = pnand %p6012_p13, %p6006_p11 }
  0x39   : > { %6016 = shalt.err (!%p6013_p1)
}
  0x3a   : > { %s6240_s24 = smov 128   ;;  %s6241_s18 = smov 8  }
  0x3b   : > { %5906 = dma.hbm_to_vmem [thread:$0]  (!%p6390_p12), %s6963_s2, 6144, %s6386_s17, [#allocation6], %s6240_s24, %s6240_s24, %s6241_s18  }
  0x3c   : > { %s6017_s21 = scalar_lea.hbm %s6920_s4, 6144 }
  0x3d   : > { %p6018_p6 = scmp.ne.s32.totalorder %s6920_s4, %s6017_s21  ;;  %p6024_p3 = scmp.lt.u32.totalorder %s6017_s21, %s6920_s4 }
  0x3f   : > { %p6020_p9 = pnand %p6018_p6, %p6406_p0 }
  0x41   : > { %p6021_p2 = pneg %p6020_p9 }
  0x43   : > { %p6026_p4 = pnand %p6024_p3, %p6021_p2 }
  0x45   : > { %6029 = shalt.err (!%p6026_p4)
}
  0x46   : > { %s6030_s17 = scalar_lea.vmem %s6394_s26, 6144  ;;  %p6038_p13 = scmp.lt.s32.totalorder %s6394_s26, %s6394_s26 }
  0x47   : > { %p6031_p7 = scmp.ne.s32.totalorder %s6394_s26, %s6030_s17  ;;  %p6039_p1 = scmp.lt.s32.totalorder %s6030_s17, %s6030_s17 }
  0x49   : > { %p6033_p8 = pnand %p6031_p7, %p6406_p0  ;;  %p6040_p6 = por %p6039_p1, %p6038_p13 }
  0x4b   : > { %p6034_p11 = pneg %p6033_p8 }
  0x4d   : > { %p6041_p9 = pnand %p6040_p6, %p6034_p11 }
  0x4f   : > { %6044 = shalt.err (!%p6041_p9)
}
  0x50   : > { %5912 = dma.hbm_to_vmem [thread:$0]  (!%p6390_p12), %s6920_s4, 6144, %s6394_s26, [#allocation9], %s6240_s24, %s6240_s24, %s6241_s18  }
  0x51   : > { %s6045_s29 = scalar_lea.hbm %s6917_s1, 6144 }
  0x52   : > { %p6046_p2 = scmp.ne.s32.totalorder %s6917_s1, %s6045_s29  ;;  %p6052_p7 = scmp.lt.u32.totalorder %s6045_s29, %s6917_s1 }
  0x54   : > { %p6048_p3 = pnand %p6046_p2, %p6406_p0 }
  0x56   : > { %p6049_p4 = pneg %p6048_p3 }
  0x58   : > { %p6054_p8 = pnand %p6052_p7, %p6049_p4 }
  0x5a   : > { %6057 = shalt.err (!%p6054_p8)
}
  0x5b   : > { %s6058_s17 = scalar_lea.vmem %s396_s20, 6144  ;;  %p6066_p6 = scmp.lt.s32.totalorder %s396_s20, %s396_s20 }
  0x5c   : > { %p6059_p11 = scmp.ne.s32.totalorder %s396_s20, %s6058_s17  ;;  %p6067_p9 = scmp.lt.s32.totalorder %s6058_s17, %s6058_s17 }
  0x5e   : > { %p6061_p13 = pnand %p6059_p11, %p6406_p0  ;;  %p6068_p5 = por %p6067_p9, %p6066_p6 }
  0x60   : > { %p6062_p1 = pneg %p6061_p13 }
  0x62   : > { %p6069_p10 = pnand %p6068_p5, %p6062_p1 }
  0x64   : > { %6072 = shalt.err (!%p6069_p10)
}
  0x65   : > { %5903 = dma.hbm_to_vmem [thread:$0]  (!%p6390_p12), %s6917_s1, 6144, %s396_s20, [#allocation3], %s6240_s24, %s6240_s24, %s6241_s18  }
  0x66   : > { %s6242_s12 = smov [#allocation7]   ;;  %s6243_s28 = smov [#allocation10]  }
  0x67   : > { %s421_s19 = sshll.u32 %s6242_s12, 4  ;;  %s447_s29 = sshll.u32 %s6243_s28, 4  ;;  %s422_s19 = int_to_ptr.vmem [resolvable:$true] %s421_s19  ;;  %s448_s29 = int_to_ptr.vmem [resolvable:$true] %s447_s29 }
  0x68   : > { %s6073_s27 = scalar_lea.hbm %s6919_s3, 6144 }
  0x69   : > { %p6074_p5 = scmp.ne.s32.totalorder %s6919_s3, %s6073_s27  ;;  %p6080_p3 = scmp.lt.u32.totalorder %s6073_s27, %s6919_s3 }
  0x6b   : > { %p6076_p10 = pnand %p6074_p5, %p6406_p0 }
  0x6d   : > { %p6077_p2 = pneg %p6076_p10 }
  0x6f   : > { %p6082_p4 = pnand %p6080_p3, %p6077_p2 }
  0x71   : > { %6085 = shalt.err (!%p6082_p4)
}
  0x72   : > { %s6086_s20 = scalar_lea.vmem %s422_s19, 6144  ;;  %p6094_p13 = scmp.lt.s32.totalorder %s422_s19, %s422_s19 }
  0x73   : > { %p6087_p7 = scmp.ne.s32.totalorder %s422_s19, %s6086_s20  ;;  %p6095_p1 = scmp.lt.s32.totalorder %s6086_s20, %s6086_s20 }
  0x75   : > { %p6089_p8 = pnand %p6087_p7, %p6406_p0  ;;  %p6096_p6 = por %p6095_p1, %p6094_p13 }
  0x77   : > { %p6090_p11 = pneg %p6089_p8 }
  0x79   : > { %p6097_p9 = pnand %p6096_p6, %p6090_p11 }
  0x7b   : > { %6100 = shalt.err (!%p6097_p9)
}
  0x7c   : > { %5909 = dma.hbm_to_vmem [thread:$0]  (!%p6390_p12), %s6919_s3, 6144, %s422_s19, [#allocation6], %s6240_s24, %s6240_s24, %s6241_s18  }
  0x7d   : > { %s6101_s16 = scalar_lea.hbm %s6921_s5, 6144 }
  0x7e   : > { %p6102_p5 = scmp.ne.s32.totalorder %s6921_s5, %s6101_s16  ;;  %p6108_p3 = scmp.lt.u32.totalorder %s6101_s16, %s6921_s5 }
  0x80   : > { %p6104_p10 = pnand %p6102_p5, %p6406_p0 }
  0x82   : > { %p6105_p2 = pneg %p6104_p10 }
  0x84   : > { %p6110_p4 = pnand %p6108_p3, %p6105_p2 }
  0x86   : > { %6113 = shalt.err (!%p6110_p4)
}
  0x87   : > { %s6114_s26 = scalar_lea.vmem %s448_s29, 6144  ;;  %p6122_p13 = scmp.lt.s32.totalorder %s448_s29, %s448_s29 }
  0x88   : > { %p6115_p7 = scmp.ne.s32.totalorder %s448_s29, %s6114_s26  ;;  %p6123_p1 = scmp.lt.s32.totalorder %s6114_s26, %s6114_s26 }
  0x8a   : > { %p6117_p8 = pnand %p6115_p7, %p6406_p0  ;;  %p6124_p6 = por %p6123_p1, %p6122_p13 }
  0x8c   : > { %p6118_p11 = pneg %p6117_p8 }
  0x8e   : > { %p6125_p9 = pnand %p6124_p6, %p6118_p11 }
  0x90   : > { %6128 = shalt.err (!%p6125_p9)
}
  0x91   : > { %5915 = dma.hbm_to_vmem [thread:$0]  (!%p6390_p12), %s6921_s5, 6144, %s448_s29, [#allocation9], %s6240_s24, %s6240_s24, %s6241_s18  }
  0x92   : > { %s6244_s2 = smov [#allocation11]   ;;  %s6129_s16 = scalar_lea.hbm %s6922_s6, 6144 }
  0x93   : > { %s460_s11 = sshll.u32 %s6244_s2, 4  ;;  %p6130_p5 = scmp.ne.s32.totalorder %s6922_s6, %s6129_s16  ;;  %s461_s11 = int_to_ptr.vmem [resolvable:$true] %s460_s11 }
  0x94   : > { %p6136_p3 = scmp.lt.u32.totalorder %s6129_s16, %s6922_s6 }
  0x95   : > { %p6132_p10 = pnand %p6130_p5, %p6406_p0 }
  0x97   : > { %p6133_p2 = pneg %p6132_p10 }
  0x99   : > { %p6138_p4 = pnand %p6136_p3, %p6133_p2 }
  0x9b   : > { %6141 = shalt.err (!%p6138_p4)
}
  0x9c   : > { %s6142_s29 = scalar_lea.vmem %s461_s11, 6144  ;;  %p6150_p13 = scmp.lt.s32.totalorder %s461_s11, %s461_s11 }
  0x9d   : > { %p6143_p7 = scmp.ne.s32.totalorder %s461_s11, %s6142_s29  ;;  %p6151_p1 = scmp.lt.s32.totalorder %s6142_s29, %s6142_s29 }
  0x9f   : > { %p6145_p8 = pnand %p6143_p7, %p6406_p0  ;;  %p6152_p6 = por %p6151_p1, %p6150_p13 }
  0xa1   : > { %p6146_p11 = pneg %p6145_p8 }
  0xa3   : > { %p6153_p9 = pnand %p6152_p6, %p6146_p11 }
  0xa5   : > { %6156 = shalt.err (!%p6153_p9)
}
  0xa6   : > { %5918 = dma.hbm_to_vmem [thread:$0]  (!%p6390_p12), %s6922_s6, 6144, %s461_s11, [#allocation12], %s6240_s24, %s6240_s24, %s6241_s18  }
  0xa7   : > { %p6965_p5 = scmp.ne.s32.totalorder %s6961_s30, 0 }
  0xa8   : > { %p6966_p0 = scmp.eq.s32.totalorder (!%p6965_p5), %s6352_s22, 0 }
  0xa9   : > { %508 = sbr.rel (%p6965_p5) target bundleno = 4376 (0x1118), region = 80 }
  0xb0   : > { %6202 = dma.done.wait (%p6966_p0), [#allocation3], 6144   ;;  %p6967_p10 = pmov %p6966_p0 }
  0xb1   : > { %p6968_p2 = pmov %p6966_p0 }
  0xb2   : > { %6204 = vsyncadd (%p6967_p10), [#allocation3], 4294961152 }
  0xb3   : > { %6206 = dma.done.wait (%p6968_p2), [#allocation6], 12288   ;;  %p6969_p3 = pmov %p6966_p0 }
  0xb4   : > { %p6970_p4 = pmov %p6966_p0 }
  0xb5   : > { %6208 = vsyncadd (%p6969_p3), [#allocation6], 4294955008 }
  0xb6   : > { %6210 = dma.done.wait (%p6970_p4), [#allocation9], 12288   ;;  %p6971_p12 = pmov %p6966_p0 }
  0xb7   : > { %p6972_p7 = pmov %p6966_p0 }
  0xb8   : > { %6212 = vsyncadd (%p6971_p12), [#allocation9], 4294955008 }
  0xb9   : > { %6214 = dma.done.wait (%p6972_p7), [#allocation12], 6144   ;;  %p6973_p8 = pmov %p6966_p0 }
  0xba   : > { %p576_p11 = scmp.lt.s32.totalorder %s6352_s22, 1  ;;  %v692_v0 = vld [vmem:[#allocation2 + $0x80] sm:$0xff]  ;;  %v693_v1 = vld [vmem:[#allocation2 + $0x88] sm:$0xff]  ;;  %v694_v2 = vld [vmem:[#allocation2 + $0x90] sm:$0xff]  ;;  %vm793_vm0 = vcmask 261120   ;;  %vm6246_vm3 = vmmov 0  }
  0xbb   : > { %6216 = vsyncadd (%p6973_p8), [#allocation12], 4294961152  ;;  %v5329_v3 = vpack.c.bf16 %v693_v1, %v692_v0  ;;  %v695_v4 = vld [vmem:[#allocation2 + $0x98] sm:$0xff]  ;;  %v696_v6 = vld [vmem:[#allocation2 + $0xa0] sm:$0xff]  ;;  %vm1379_vm4 = vcmask 130048   ;;  %vm1911_vm6 = vcmask 64512  }
  0xbc   : > { %s577_s15 = scalar_select %p576_p11, %s6352_s22, 1  ;;  %v5333_v5 = vpack.c.bf16 %v695_v4, %v694_v2  ;;  %v697_v7 = vld [vmem:[#allocation2 + $0xa8] sm:$0xff]  ;;  %v587_v8 = vld [vmem:[#allocation2] sm:$0xff]  ;;  %v589_v12 = vld [vmem:[#allocation2 + $0x10] sm:$0xff]  ;;  %vm2401_vm7 = vcmask 1044480   ;;  %vm2397_vm8 = vcmask 39936  }
  0xbd   : > { %5330 = vmatprep.subr.bf16.mxu1 %v5329_v3  ;;  %v588_v9 = vld [vmem:[#allocation2 + $0x8] sm:$0xff]  ;;  %v5337_v10 = vpack.c.bf16 %v697_v7, %v696_v6  ;;  %v590_v13 = vld [vmem:[#allocation2 + $0x18] sm:$0xff]  ;;  %v698_v14 = vld [vmem:[#allocation2 + $0xb0] sm:$0xff]  ;;  %s6974_s21 = sld [smem:[#allocation28_spill]]  ;;  %s6978_s26 = sld [smem:[#allocation20_spill]] }
  0xbe   : > { %s4140_s30 = sshll.u32 %s577_s15, 5  ;;  %5332 = vmatpush3.bf16.msra.mxu1 %v5329_v3  ;;  %v5297_v11 = vpack.c.bf16 %v588_v9, %v587_v8  ;;  %v699_v15 = vld [vmem:[#allocation2 + $0xb8] sm:$0xff]  ;;  %v5301_v16 = vpack.c.bf16 %v590_v13, %v589_v12  ;;  %v591_v17 = vld [vmem:[#allocation2 + $0x20] sm:$0xff]  ;;  %v592_v18 = vld [vmem:[#allocation2 + $0x28] sm:$0xff]  ;;  %s6979_s28 = sld [smem:[#allocation25_spill]] }
  0xbf   : > { %s6564_s18 = scalar_lea.vmem %s6916_s0, %s4140_s30  ;;  %5334 = vmatprep.subr.bf16.mxu1 %v5333_v5  ;;  %v5341_v20 = vpack.c.bf16 %v699_v15, %v698_v14  ;;  %v700_v21 = vld [vmem:[#allocation2 + $0xc0] sm:$0xff]  ;;  %v5305_v22 = vpack.c.bf16 %v592_v18, %v591_v17  ;;  %v701_v23 = vld [vmem:[#allocation2 + $0xc8] sm:$0xff]  ;;  %v593_v24 = vld [vmem:[#allocation2 + $0x30] sm:$0xff]  ;;  %s4141_s16 = sshll.u32 %s6352_s22, 9 }
  0xc0   : > { %5298 = vmatprep.subr.bf16.mxu0 %v5297_v11  ;;  %v6567_v19 = vld [vmem:[%s6564_s18] sm:$0xff]  ;;  %v594_v25 = vld [vmem:[#allocation2 + $0x38] sm:$0xff]  ;;  %v5345_v26 = vpack.c.bf16 %v701_v23, %v700_v21  ;;  %v702_v27 = vld [vmem:[#allocation2 + $0xd0] sm:$0xff]  ;;  %s6248_s30 = smov [#allocation13]  }
  0xc1   : > { %5300 = vmatpush3.bf16.msra.mxu0 %v5297_v11  ;;  %4599 = vmatprep.mubr.f32.mxu1 %v6567_v19  ;;  %v5309_v28 = vpack.c.bf16 %v594_v25, %v593_v24  ;;  %v703_v29 = vld [vmem:[#allocation2 + $0xd8] sm:$0xff]  ;;  %v595_v30 = vld [vmem:[#allocation2 + $0x40] sm:$0xff]  ;;  %v596_v31 = vld [vmem:[#allocation2 + $0x48] sm:$0xff]  ;;  %s6161_s23 = sshll.u32 %s6248_s30, 4  ;;  %s6162_s23 = int_to_ptr.vmem [resolvable:$false] %s6161_s23 }
  0xc2   : > { %5336 = vmatpush3.bf16.msra.mxu1 %v5333_v5  ;;  %5302 = vmatprep.subr.bf16.mxu0 %v5301_v16  ;;  %v5349_v32 = vpack.c.bf16 %v703_v29, %v702_v27  ;;  %v704_v33 = vld [vmem:[#allocation2 + $0xe0] sm:$0xff]  ;;  %v5313_v34 = vpack.c.bf16 %v596_v31, %v595_v30  ;;  %v705_v35 = vld [vmem:[#allocation2 + $0xe8] sm:$0xff]  ;;  %v597_v36 = vld [vmem:[#allocation2 + $0x50] sm:$0xff]  ;;  %s6163_s24 = scalar_lea.vmem %s6162_s23, 1024 }
  0xc3   : > { %5338 = vmatprep.subr.bf16.mxu1 %v5337_v10  ;;  %4561 = vmatprep.mubr.f32.mxu0 %v6567_v19  ;;  %v598_v37 = vld [vmem:[#allocation2 + $0x58] sm:$0xff]  ;;  %v5353_v38 = vpack.c.bf16 %v705_v35, %v704_v33  ;;  %v706_v39 = vld [vmem:[#allocation2 + $0xf0] sm:$0xff]  ;;  %v599_v42 = vld [vmem:[#allocation2 + $0x60] sm:$0xff]  ;;  %s6975_s17 = smov %s6974_s21  ;;  %s573_s20 = sand.u32 1, %s6978_s26  }
  0xc4   : > { %v5317_v40 = vpack.c.bf16 %v598_v37, %v597_v36  ;;  %v707_v41 = vld [vmem:[#allocation2 + $0xf8] sm:$0xff]  ;;  %v600_v43 = vld [vmem:[#allocation2 + $0x68] sm:$0xff]  ;;  %v960_v45 = vld [vmem:[#allocation2 + $0x100] sm:$0xff]  ;;  %s4060_s2 = sshll.u32 %s573_s20, 5  ;;  %s6875_s15 = scalar_lea.sflag [#allocation4], %s573_s20 }
  0xc5   : > { %5304 = vmatpush3.bf16.msra.mxu0 %v5301_v16  ;;  %v5357_v44 = vpack.c.bf16 %v707_v41, %v706_v39  ;;  %v5321_v46 = vpack.c.bf16 %v600_v43, %v599_v42  ;;  %v961_v47 = vld [vmem:[#allocation2 + $0x108] sm:$0xff]  ;;  %v601_v48 = vld [vmem:[#allocation2 + $0x70] sm:$0xff]  ;;  %v602_v49 = vld [vmem:[#allocation2 + $0x78] sm:$0xff]  ;;  %s575_s11 = scalar_lea.vmem [#allocation13], %s4060_s2  ;;  %p6982_p1 = scmp.ne.s32.totalorder %s6979_s28, 0 }
  0xc6   : > { %5340 = vmatpush3.bf16.msra.mxu1 %v5337_v10  ;;  %5306 = vmatprep.subr.bf16.mxu0 %v5305_v22  ;;  %v5377_v50 = vpack.c.bf16 %v961_v47, %v960_v45  ;;  %v5325_v51 = vpack.c.bf16 %v602_v49, %v601_v48  ;;  %v962_v52 = vld [vmem:[#allocation2 + $0x110] sm:$0xff]  ;;  %v963_v53 = vld [vmem:[#allocation2 + $0x118] sm:$0xff]  ;;  %v582_v54 = vld [vmem:[%s6564_s18 + $0x8] sm:$0xff]  ;;  %s3922_s12 = sshll.u32 %s575_s11, 4  ;;  %s6868_s12 = int_to_ptr.vmem [resolvable:$true] %s3922_s12 }
  0xc7   : > { %5342 = vmatprep.subr.bf16.mxu1 %v5341_v20  ;;  %v5381_v55 = vpack.c.bf16 %v963_v53, %v962_v52  ;;  %v583_v56 = vld [vmem:[%s6564_s18 + $0x10] sm:$0xff]  ;;  %v964_v57 = vld [vmem:[#allocation2 + $0x120] sm:$0xff]  ;;  %v965_v58 = vld [vmem:[#allocation2 + $0x128] sm:$0xff]  ;;  %s6157_s22 = scalar_lea.vmem %s6868_s12, 512  ;;  %p6164_p5 = scmp.lt.s32.totalorder %s6868_s12, %s6162_s23 }
  0xc8   : > { %v584_v59 = vld [vmem:[%s6564_s18 + $0x18] sm:$0xff]  ;;  %v5385_v60 = vpack.c.bf16 %v965_v58, %v964_v57  ;;  %v966_v61 = vld [vmem:[#allocation2 + $0x130] sm:$0xff]  ;;  %v968_v0 = vld [vmem:[#allocation2 + $0x140] sm:$0xff]  ;;  %p6158_p13 = scmp.ne.s32.totalorder %s6868_s12, %s6157_s22  ;;  %p6165_p0 = scmp.lt.s32.totalorder %s6163_s24, %s6157_s22 }
  0xc9   : > { %5308 = vmatpush3.bf16.msra.mxu0 %v5305_v22  ;;  %v967_v62 = vld [vmem:[#allocation2 + $0x138] sm:$0xff]  ;;  %v969_v1 = vld [vmem:[#allocation2 + $0x148] sm:$0xff]  ;;  %v970_v3 = vld [vmem:[#allocation2 + $0x150] sm:$0xff] }
  0xca   : > { %5344 = vmatpush3.bf16.msra.mxu1 %v5341_v20  ;;  %5310 = vmatprep.subr.bf16.mxu0 %v5309_v28  ;;  %v5389_v63 = vpack.c.bf16 %v967_v62, %v966_v61  ;;  %v5393_v2 = vpack.c.bf16 %v969_v1, %v968_v0  ;;  %v971_v4 = vld [vmem:[#allocation2 + $0x158] sm:$0xff]  ;;  %v972_v6 = vld [vmem:[#allocation2 + $0x160] sm:$0xff]  ;;  %v973_v7 = vld [vmem:[#allocation2 + $0x168] sm:$0xff]  ;;  %p6159_p6 = pnand %p6158_p13, %p6982_p1  ;;  %p6166_p10 = por %p6165_p0, %p6164_p5 }
  0xcb   : > { %5346 = vmatprep.subr.bf16.mxu1 %v5345_v26  ;;  %v5397_v5 = vpack.c.bf16 %v971_v4, %v970_v3  ;;  %v5401_v8 = vpack.c.bf16 %v973_v7, %v972_v6  ;;  %v974_v9 = vld [vmem:[#allocation2 + $0x170] sm:$0xff]  ;;  %v975_v10 = vld [vmem:[#allocation2 + $0x178] sm:$0xff]  ;;  %v585_v25 = vld [vmem:[%s6923_s7] sm:$0xff] }
  0xcc   : > { %v5405_v11 = vpack.c.bf16 %v975_v10, %v974_v9  ;;  %v4063_v12 = vld [vmem:[%s6923_s7 + $0x10] sm:$0xff]  ;;  %v4064_v23 = vld [vmem:[%s6923_s7 + $0x18] sm:$0xff]  ;;  %v586_v27 = vld [vmem:[%s6923_s7 + $0x8] sm:$0xff]  ;;  %p6160_p9 = pneg %p6159_p6 }
  0xcd   : > { %5312 = vmatpush3.bf16.msra.mxu0 %v5309_v28  ;;  %v4069_v28 = vld [vmem:[%s6923_s7 + $0x20] sm:$0xff]  ;;  %v4070_v35 = vld [vmem:[%s6923_s7 + $0x28] sm:$0xff]  ;;  %v1196_v42 = vld [vmem:[#allocation5 + $0x10] sm:$0xff] }
  0xce   : > { %5348 = vmatpush3.bf16.msra.mxu1 %v5345_v26  ;;  %5314 = vmatprep.subr.bf16.mxu0 %v5313_v34  ;;  %v1194_v36 = vld [vmem:[#allocation5] sm:$0xff]  ;;  %v1195_v37 = vld [vmem:[#allocation5 + $0x8] sm:$0xff]  ;;  %v1197_v43 = vld [vmem:[#allocation5 + $0x18] sm:$0xff]  ;;  %p6167_p2 = pnand %p6166_p10, %p6160_p9 }
  0xcf   : > { %5350 = vmatprep.subr.bf16.mxu1 %v5349_v32  ;;  %v5417_v39 = vpack.c.bf16 %v1195_v37, %v1194_v36  ;;  %v5421_v45 = vpack.c.bf16 %v1197_v43, %v1196_v42  ;;  %v1198_v48 = vld [vmem:[#allocation5 + $0x20] sm:$0xff]  ;;  %v1199_v49 = vld [vmem:[#allocation5 + $0x28] sm:$0xff]  ;;  %v1295_v58 = vld [vmem:[#allocation5 + $0xb8] sm:$0xff] }
  0xd0   : > { %v1293_v52 = vld [vmem:[#allocation5 + $0xa8] sm:$0xff]  ;;  %v1296_v62 = vld [vmem:[#allocation5 + $0xc0] sm:$0xff]  ;;  %v1205_v3 = vld [vmem:[#allocation5 + $0x58] sm:$0xff] }
  0xd1   : > { %5316 = vmatpush3.bf16.msra.mxu0 %v5313_v34  ;;  %v1203_v61 = vld [vmem:[#allocation5 + $0x48] sm:$0xff]  ;;  %v1298_v4 = vld [vmem:[#allocation5 + $0xd0] sm:$0xff]  ;;  %v1299_v6 = vld [vmem:[#allocation5 + $0xd8] sm:$0xff] }
  0xd2   : > { %5352 = vmatpush3.bf16.msra.mxu1 %v5349_v32  ;;  %5318 = vmatprep.subr.bf16.mxu0 %v5317_v40  ;;  %v1297_v0 = vld [vmem:[#allocation5 + $0xc8] sm:$0xff]  ;;  %v5469_v7 = vpack.c.bf16 %v1299_v6, %v1298_v4  ;;  %v1300_v10 = vld [vmem:[#allocation5 + $0xe0] sm:$0xff]  ;;  %v1531_v4 = vld [vmem:[#allocation5 + $0x110] sm:$0xff] }
  0xd3   : > { %5354 = vmatprep.subr.bf16.mxu1 %v5353_v38  ;;  %v5465_v1 = vpack.c.bf16 %v1297_v0, %v1296_v62  ;;  %v1207_v9 = vld [vmem:[#allocation5 + $0x68] sm:$0xff]  ;;  %v1529_v0 = vld [vmem:[#allocation5 + $0x100] sm:$0xff] }
  0xd4   : > { %v1193_v6 = vld [vmem:[%s6924_s8] sm:$0xff] }
  0xd5   : > { %5320 = vmatpush3.bf16.msra.mxu0 %v5317_v40  ;;  %v1289_v40 = vld [vmem:[#allocation5 + $0x88] sm:$0xff] }
  0xd6   : > { %5356 = vmatpush3.bf16.msra.mxu1 %v5353_v38  ;;  %5322 = vmatprep.subr.bf16.mxu0 %v5321_v46  ;;  %v1288_v38 = vld [vmem:[#allocation5 + $0x80] sm:$0xff] }
  0xd7   : > { %5358 = vmatprep.subr.bf16.mxu1 %v5357_v44  ;;  %v5449_v41 = vpack.c.bf16 %v1289_v40, %v1288_v38 }
  0xd9   : > { %5324 = vmatpush3.bf16.msra.mxu0 %v5321_v46  ;;  %v1291_v46 = vld [vmem:[#allocation5 + $0x98] sm:$0xff] }
  0xda   : > { %5360 = vmatpush3.bf16.msra.mxu1 %v5357_v44  ;;  %5326 = vmatprep.subr.bf16.mxu0 %v5325_v51  ;;  %v1290_v44 = vld [vmem:[#allocation5 + $0x90] sm:$0xff] }
  0xdb   : > { %5378 = vmatprep.subr.bf16.mxu1 %v5377_v50  ;;  %v5453_v47 = vpack.c.bf16 %v1291_v46, %v1290_v44 }
  0xdd   : > { %4600 = vmatmul.mubr.f32.vlgmr.msra.gmra.mrb[0].mxu1 %v582_v54  ;;  %5328 = vmatpush3.bf16.msra.mxu0 %v5325_v51  ;;  %v5425_v51 = vpack.c.bf16 %v1199_v49, %v1198_v48  ;;  %v4073_v48 = vld [vmem:[%s6929_s13] ss:$0 sm:$0xff] }
  0xde   : > { %5380 = vmatpush3.bf16.msra.mxu1 %v5377_v50  ;;  %4602 = vmatprep.mubr.f32.mxu1 %v583_v56  ;;  %v1292_v50 = vld [vmem:[#allocation5 + $0xa0] sm:$0xff] }
  0xdf   : > { %5382 = vmatprep.subr.bf16.mxu1 %v5381_v55  ;;  %v5457_v53 = vpack.c.bf16 %v1293_v52, %v1292_v50 }
  0xe0   : > { %4562 = vmatmul.mubr.f32.vlgmr.msra.gmra.mrb[0].mxu0 %v582_v54 }
  0xe1   : > { %4603 = vmatmul.mubr.f32.gmra.mrb[2].mxu1 %v584_v59  ;;  %4564 = vmatprep.mubr.f32.mxu0 %v583_v56 }
  0xe2   : > { %5384 = vmatpush3.bf16.msra.mxu1 %v5381_v55  ;;  %4659 = vmatprep.mubr.f32.mxu1 %v6567_v19  ;;  %v1201_v55 = vld [vmem:[#allocation5 + $0x38] sm:$0xff] }
  0xe3   : > { %5386 = vmatprep.subr.bf16.mxu1 %v5385_v60 }
  0xe4   : > { %4565 = vmatmul.mubr.f32.gmra.mrb[2].mxu0 %v584_v59 }
  0xe5   : > { %4613 = vmatprep.mubr.msk.f32.mxu0 %vm793_vm0, %v4063_v12  ;;  %v1301_v12 = vld [vmem:[#allocation5 + $0xe8] sm:$0xff] }
  0xe6   : > { %5388 = vmatpush3.bf16.msra.mxu1 %v5385_v60  ;;  %v1202_v60 = vld [vmem:[#allocation5 + $0x40] sm:$0xff] }
  0xe7   : > { %5390 = vmatprep.subr.bf16.mxu1 %v5389_v63 }
  0xea   : > { %5392 = vmatpush3.bf16.msra.mxu1 %v5389_v63  ;;  %v5433_v63 = vpack.c.bf16 %v1203_v61, %v1202_v60 }
  0xeb   : > { %5394 = vmatprep.subr.bf16.mxu1 %v5393_v2 }
  0xee   : > { %5396 = vmatpush3.bf16.msra.mxu1 %v5393_v2  ;;  %v1204_v2 = vld [vmem:[#allocation5 + $0x50] sm:$0xff] }
  0xef   : > { %5398 = vmatprep.subr.bf16.mxu1 %v5397_v5 }
  0xf2   : > { %5400 = vmatpush3.bf16.msra.mxu1 %v5397_v5  ;;  %v5437_v5 = vpack.c.bf16 %v1205_v3, %v1204_v2  ;;  %v4075_v2 = vld [vmem:[%s6924_s8 + $0x8] sm:$0xff] }
  0xf3   : > { %5402 = vmatprep.subr.bf16.mxu1 %v5401_v8 }
  0xf6   : > { %5404 = vmatpush3.bf16.msra.mxu1 %v5401_v8  ;;  %v1206_v8 = vld [vmem:[#allocation5 + $0x60] sm:$0xff] }
  0xf7   : > { %5406 = vmatprep.subr.bf16.mxu1 %v5405_v11 }
  0xfa   : > { %5408 = vmatpush3.bf16.msra.mxu1 %v5405_v11  ;;  %v5441_v11 = vpack.c.bf16 %v1207_v9, %v1206_v8  ;;  %v1533_v8 = vld [vmem:[#allocation5 + $0x120] sm:$0xff]  ;;  %v1534_v9 = vld [vmem:[#allocation5 + $0x128] sm:$0xff] }
  0xfb   : > { %5450 = vmatprep.subr.bf16.mxu1 %v5449_v41 }
  0xfd   : > { %4660 = vmatmul.mubr.f32.vlgmr.msra.gmra.mrb[4].mxu1 %v582_v54  ;;  %v1200_v54 = vld [vmem:[#allocation5 + $0x30] sm:$0xff] }
  0xfe   : > { %4662 = vmatprep.mubr.f32.mxu1 %v583_v56  ;;  %5452 = vmatpush3.bf16.msra.mxu1 %v5449_v41  ;;  %v1294_v56 = vld [vmem:[#allocation5 + $0xb0] sm:$0xff]  ;;  %v5429_v57 = vpack.c.bf16 %v1201_v55, %v1200_v54 }
  0xff   : > { %5454 = vmatprep.subr.bf16.mxu1 %v5453_v47 }
 0x101   : > { %4663 = vmatmul.mubr.f32.gmra.mrb[6].mxu1 %v584_v59  ;;  %v5461_v59 = vpack.c.bf16 %v1295_v58, %v1294_v56  ;;  %v6245_v56 = vmov 0.0|0.0  }
 0x102   : > { %5456 = vmatpush3.bf16.msra.mxu1 %v5453_v47 }
 0x103   : > { %5458 = vmatprep.subr.bf16.mxu1 %v5457_v53 }
 0x106   : > { %5460 = vmatpush3.bf16.msra.mxu1 %v5457_v53 }
 0x107   : > { %5462 = vmatprep.subr.bf16.mxu1 %v5461_v59 }
 0x10a   : > { %5464 = vmatpush3.bf16.msra.mxu1 %v5461_v59 }
 0x10b   : > { %5466 = vmatprep.subr.bf16.mxu1 %v5465_v1 }
 0x10e   : > { %5468 = vmatpush3.bf16.msra.mxu1 %v5465_v1  ;;  %v1530_v1 = vld [vmem:[#allocation5 + $0x108] sm:$0xff] }
 0x10f   : > { %5470 = vmatprep.subr.bf16.mxu1 %v5469_v7  ;;  %v5487_v3 = vpack.c.bf16 %v1530_v1, %v1529_v0 }
 0x112   : > { %5472 = vmatpush3.bf16.msra.mxu1 %v5469_v7 }
 0x1b0   : > { %v4601_v13 = vpop.f32.mrb[0].mxu1 }
 0x1b1   : > { %v774_v14 = vpop.f32.mrb[1].mxu1 }
 0x1b2   : > { %v5361_v15 = vpack.c.bf16 %v4601_v13, %v774_v14  ;;  %v5473_v13 = vpack.c.bf16 %v1301_v12, %v1300_v10  ;;  %v1208_v14 = vld [vmem:[#allocation5 + $0x70] sm:$0xff]  ;;  %v5495_v10 = vpack.c.bf16 %v1534_v9, %v1533_v8  ;;  %v1536_v12 = vld [vmem:[#allocation5 + $0x138] sm:$0xff] }
 0x1b3   : > { %v4563_v18 = vpop.f32.mrb[0].mxu0 }
 0x1b4   : > { %5362 = vmatprep.subr.bf16.mxu0 %v5361_v15  ;;  %v4604_v16 = vpop.f32.mrb[2].mxu1  ;;  %v669_v20 = vpop.f32.mrb[1].mxu0  ;;  %5474 = vmatprep.subr.bf16.mxu1 %v5473_v13 }
 0x1b5   : > { %5364 = vmatpush3.bf16.msra.mxu0 %v5361_v15  ;;  %v784_v17 = vpop.f32.mrb[3].mxu1  ;;  %v5369_v21 = vpack.c.bf16 %v4563_v18, %v669_v20  ;;  %v1209_v15 = vld [vmem:[#allocation5 + $0x78] sm:$0xff]  ;;  %5476 = vmatpush3.bf16.msra.mxu1 %v5473_v13 }
 0x1b6   : > { %v5365_v19 = vpack.c.bf16 %v4604_v16, %v784_v17  ;;  %v1302_v16 = vld [vmem:[#allocation5 + $0xf0] sm:$0xff]  ;;  %v5445_v17 = vpack.c.bf16 %v1209_v15, %v1208_v14  ;;  %v1303_v18 = vld [vmem:[#allocation5 + $0xf8] sm:$0xff]  ;;  %v1537_v14 = vld [vmem:[#allocation5 + $0x140] sm:$0xff] }
 0x1b7   : > { %v4566_v22 = vpop.f32.mrb[2].mxu0  ;;  %v1538_v15 = vld [vmem:[#allocation5 + $0x148] sm:$0xff] }
 0x1b8   : > { %5366 = vmatprep.subr.bf16.mxu0 %v5365_v19  ;;  %v679_v24 = vpop.f32.mrb[3].mxu0 }
 0x1b9   : > { %5368 = vmatpush3.bf16.msra.mxu0 %v5365_v19  ;;  %v5373_v26 = vpack.c.bf16 %v4566_v22, %v679_v24  ;;  %v5477_v19 = vpack.c.bf16 %v1303_v18, %v1302_v16  ;;  %v5503_v16 = vpack.c.bf16 %v1538_v15, %v1537_v14  ;;  %v1540_v18 = vld [vmem:[#allocation5 + $0x158] sm:$0xff]  ;;  %v4081_v14 = vld [vmem:[%s6929_s13 + $0x1] ss:$0 sm:$0xff] }
 0x1ba   : > { %5370 = vmatprep.subr.bf16.mxu0 %v5369_v21 }
 0x1bb   : > { %5478 = vmatprep.subr.bf16.mxu1 %v5477_v19 }
 0x1bc   : > { %4614 = vmatmul.mubr.msk.f32.vlgmr.msra.gmra.mrb[4].mxu0 %vm793_vm0, %v4064_v23  ;;  %5480 = vmatpush3.bf16.msra.mxu1 %v5477_v19 }
 0x1bd   : > { %5372 = vmatpush3.bf16.msra.mxu0 %v5369_v21  ;;  %4624 = vmatprep.mubr.msk.f32.mxu0 %vm793_vm0, %v585_v25 }
 0x1be   : > { %5374 = vmatprep.subr.bf16.mxu0 %v5373_v26  ;;  %5522 = vmatprep.subr.bf16.mxu1 %v6245_v56 }
 0x1c1   : > { %5376 = vmatpush3.bf16.msra.mxu0 %v5373_v26 }
 0x1c4   : > { %4625 = vmatmul.mubr.msk.f32.vlgmr.msra.gmra.mrb[4].mxu0 %vm793_vm0, %v586_v27 }
 0x1c5   : > { %4673 = vmatprep.mubr.msk.f32.mxu0 %vm793_vm0, %v4069_v28 }
 0x1d0   : > { %v4661_v29 = vpop.f32.mrb[4].mxu1 }
 0x1d1   : > { %v1042_v30 = vpop.f32.mrb[5].mxu1 }
 0x1d2   : > { %v5409_v31 = vpack.c.bf16 %v4661_v29, %v1042_v30 }
 0x1d4   : > { %v4664_v32 = vpop.f32.mrb[6].mxu1  ;;  %5410 = vmatprep.subr.bf16.mxu0 %v5409_v31 }
 0x1d5   : > { %v1052_v33 = vpop.f32.mrb[7].mxu1  ;;  %5412 = vmatpush3.bf16.msra.mxu0 %v5409_v31 }
 0x1d6   : > { %v5413_v34 = vpack.c.bf16 %v4664_v32, %v1052_v33 }
 0x1d8   : > { %5414 = vmatprep.subr.bf16.mxu0 %v5413_v34 }
 0x1d9   : > { %5416 = vmatpush3.bf16.msra.mxu0 %v5413_v34 }
 0x1da   : > { %5418 = vmatprep.subr.bf16.mxu0 %v5417_v39 }
 0x1dc   : > { %4674 = vmatmul.mubr.msk.f32.vlgmr.msra.gmra.mrb[4].mxu0 %vm793_vm0, %v4070_v35 }
 0x1dd   : > { %5420 = vmatpush3.bf16.msra.mxu0 %v5417_v39 }
 0x1de   : > { %5422 = vmatprep.subr.bf16.mxu0 %v5421_v45 }
 0x1e1   : > { %5424 = vmatpush3.bf16.msra.mxu0 %v5421_v45 }
 0x1e2   : > { %5426 = vmatprep.subr.bf16.mxu0 %v5425_v51 }
 0x1e5   : > { %5428 = vmatpush3.bf16.msra.mxu0 %v5425_v51  ;;  %v4074_v51 = vld [vmem:[%s6930_s14] ss:$0 sm:$0xff] }
 0x1e6   : > { %5430 = vmatprep.subr.bf16.mxu0 %v5429_v57 }
 0x1e9   : > { %5432 = vmatpush3.bf16.msra.mxu0 %v5429_v57  ;;  %v6247_v57 = vmov 0.0  }
 0x1ea   : > { %5434 = vmatprep.subr.bf16.mxu0 %v5433_v63 }
 0x1ed   : > { %5436 = vmatpush3.bf16.msra.mxu0 %v5433_v63 }
 0x1ee   : > { %5438 = vmatprep.subr.bf16.mxu0 %v5437_v5 }
 0x1f1   : > { %5440 = vmatpush3.bf16.msra.mxu0 %v5437_v5  ;;  %v1532_v5 = vld [vmem:[#allocation5 + $0x118] sm:$0xff] }
 0x1f2   : > { %5442 = vmatprep.subr.bf16.mxu0 %v5441_v11  ;;  %v5491_v7 = vpack.c.bf16 %v1532_v5, %v1531_v4 }
 0x1f5   : > { %5444 = vmatpush3.bf16.msra.mxu0 %v5441_v11  ;;  %v1535_v11 = vld [vmem:[#allocation5 + $0x130] sm:$0xff] }
 0x1f6   : > { %5446 = vmatprep.subr.bf16.mxu0 %v5445_v17  ;;  %v5499_v13 = vpack.c.bf16 %v1536_v12, %v1535_v11 }
 0x1f9   : > { %5448 = vmatpush3.bf16.msra.mxu0 %v5445_v17  ;;  %v1539_v17 = vld [vmem:[#allocation5 + $0x150] sm:$0xff] }
 0x1fa   : > { %5481 = vmatprep.subr.bf16.mxu0 %v6245_v56  ;;  %v5507_v19 = vpack.c.bf16 %v1540_v18, %v1539_v17  ;;  %v1826_v17 = vld [vmem:[#allocation7 + $0x88] sm:$0xff]  ;;  %v4083_v18 = vld [vmem:[%s6930_s14 + $0x1] ss:$0 sm:$0xff] }
 0x2af   : > { %v4675_v20 = vpop.f32.mrb[4].mxu0 }
 0x2b0   : > { %vm1145_vm1 = vcmp.ge.f32.partialorder %v4675_v20, 0.0  ;;  %v1147_v21 = vmul.f32 0.2, %v4675_v20  ;;  %v1133_v22 = vpop.f32.mrb[5].mxu0 }
 0x2b1   : > { %vm1144_vm2 = vcmp.ge.f32.partialorder %v1133_v22, 0.0  ;;  %v1146_v23 = vmul.f32 0.2, %v1133_v22 }
 0x2b2   : > { %v1149_v24 = vsel %vm1145_vm1, %v4675_v20, %v1147_v21  ;;  %v1541_v20 = vld [vmem:[#allocation5 + $0x160] sm:$0xff]  ;;  %v1542_v21 = vld [vmem:[#allocation5 + $0x168] sm:$0xff] }
 0x2b3   : > { %v1148_v25 = vsel %vm1144_vm2, %v1133_v22, %v1146_v23  ;;  %v5511_v22 = vpack.c.bf16 %v1542_v21, %v1541_v20  ;;  %v1543_v23 = vld [vmem:[#allocation5 + $0x170] sm:$0xff] }
 0x2b4   : > { %v1150_v26 = vadd.f32 %v1149_v24, %v1148_v25 }
 0x2b6   : > { %v1151_v27 = vrot.slane %v1150_v26, 4 }
 0x2b8   : > { %v1152_v28 = vadd.f32 %v1151_v27, %v1150_v26 }
 0x2ba   : > { %v1153_v29 = vrot.slane %v1152_v28, 2 }
 0x2bc   : > { %v1154_v30 = vadd.f32 %v1153_v29, %v1152_v28  ;;  %v4078_v29 = vld [vmem:[%s6924_s8 + $0x10] sm:$0xff] }
 0x2be   : > { %v1155_v31 = vrot.slane %v1154_v30, 1 }
 0x2c0   : > { %v1156_v32 = vadd.f32 %v1155_v31, %v1154_v30  ;;  %v1736_v30 = vld [vmem:[#allocation7] sm:$0xff]  ;;  %v1737_v31 = vld [vmem:[#allocation7 + $0x8] sm:$0xff] }
 0x2c2   : > { %v1158_v33 = vmul.f32 0.0625, %v1156_v32  ;;  %v5523_v32 = vpack.c.bf16 %v1737_v31, %v1736_v30  ;;  %v1833_v31 = vld [vmem:[#allocation7 + $0xc0] sm:$0xff] }
 0x2c4   : > { %v1159_v34 = vsub.f32 %v1148_v25, %v1158_v33  ;;  %v1160_v35 = vsub.f32 %v1149_v24, %v1158_v33  ;;  %v1544_v24 = vld [vmem:[#allocation5 + $0x178] sm:$0xff]  ;;  %v1738_v33 = vld [vmem:[#allocation7 + $0x10] sm:$0xff] }
 0x2c5   : > { %v5515_v25 = vpack.c.bf16 %v1544_v24, %v1543_v23  ;;  %v1828_v23 = vld [vmem:[#allocation7 + $0x98] sm:$0xff] }
 0x2c6   : > { %v1161_v36 = vmul.f32 %v1159_v34, %v1159_v34  ;;  %v1162_v37 = vmul.f32 %v1160_v35, %v1160_v35 }
 0x2c8   : > { %v1163_v38 = vadd.f32 %v1162_v37, %v1161_v36  ;;  %v1740_v36 = vld [vmem:[#allocation7 + $0x20] sm:$0xff]  ;;  %v1741_v37 = vld [vmem:[#allocation7 + $0x28] sm:$0xff] }
 0x2ca   : > { %v1164_v39 = vrot.slane %v1163_v38, 4 }
 0x2cc   : > { %v1165_v40 = vadd.f32 %v1164_v39, %v1163_v38  ;;  %v5529_v38 = vpack.c.bf16 %v1741_v37, %v1740_v36  ;;  %v1742_v39 = vld [vmem:[#allocation7 + $0x30] sm:$0xff]  ;;  %v1837_v37 = vld [vmem:[#allocation7 + $0xe0] sm:$0xff] }
 0x2ce   : > { %v1166_v41 = vrot.slane %v1165_v40, 2 }
 0x2d0   : > { %v1167_v42 = vadd.f32 %v1166_v41, %v1165_v40  ;;  %v1743_v40 = vld [vmem:[#allocation7 + $0x38] sm:$0xff] }
 0x2d1   : > { %v5532_v41 = vpack.c.bf16 %v1743_v40, %v1742_v39  ;;  %v1839_v40 = vld [vmem:[#allocation7 + $0xf0] sm:$0xff] }
 0x2d2   : > { %v1168_v43 = vrot.slane %v1167_v42, 1 }
 0x2d4   : > { %v1169_v44 = vadd.f32 %v1168_v43, %v1167_v42  ;;  %v1744_v42 = vld [vmem:[#allocation7 + $0x40] sm:$0xff]  ;;  %v1745_v43 = vld [vmem:[#allocation7 + $0x48] sm:$0xff] }
 0x2d6   : > { %v1170_v45 = vmul.f32 0.0625, %v1169_v44  ;;  %v5535_v44 = vpack.c.bf16 %v1745_v43, %v1744_v42 }
 0x2d8   : > { %v1171_v46 = vadd.f32 1e-05, %v1170_v45  ;;  %v1746_v45 = vld [vmem:[#allocation7 + $0x50] sm:$0xff] }
 0x2da   : > { %5981 = vrsqrt.f32 %v1171_v46  ;;  %v1747_v46 = vld [vmem:[#allocation7 + $0x58] sm:$0xff] }
 0x2e4   : > { %v5982_v47 = vpop.eup %5981 }
 0x2e5   : > { %v1173_v49 = vmul.f32 %v5982_v47, %v1159_v34  ;;  %v1174_v50 = vmul.f32 %v5982_v47, %v1160_v35  ;;  %v1739_v34 = vld [vmem:[#allocation7 + $0x18] sm:$0xff]  ;;  %v5538_v47 = vpack.c.bf16 %v1747_v46, %v1746_v45  ;;  %v4084_v45 = vld [vmem:[%s6925_s9 + $0x8] sm:$0x1f] }
 0x2e6   : > { %v5526_v35 = vpack.c.bf16 %v1739_v34, %v1738_v33  ;;  %v1835_v34 = vld [vmem:[#allocation7 + $0xd0] sm:$0xff] }
 0x2e7   : > { %v1182_v52 = vmul.f32 %v4073_v48, %v1173_v49  ;;  %v1183_v53 = vmul.f32 %v4073_v48, %v1174_v50  ;;  %v1748_v48 = vld [vmem:[#allocation7 + $0x60] sm:$0xff]  ;;  %v1749_v49 = vld [vmem:[#allocation7 + $0x68] sm:$0xff] }
 0x2e8   : > { %v5541_v50 = vpack.c.bf16 %v1749_v49, %v1748_v48  ;;  %v2061_v48 = vld [vmem:[#allocation7 + $0x100] sm:$0xff]  ;;  %v2062_v49 = vld [vmem:[#allocation7 + $0x108] sm:$0xff] }
 0x2e9   : > { %v1191_v54 = vadd.f32 %v4074_v51, %v1182_v52  ;;  %v6605_v55 = vadd.f32 %v4074_v51, %v1183_v53  ;;  %v1750_v51 = vld [vmem:[#allocation7 + $0x70] sm:$0xff]  ;;  %v1751_v52 = vld [vmem:[#allocation7 + $0x78] sm:$0xff] }
 0x2ea   : > { %v5544_v53 = vpack.c.bf16 %v1751_v52, %v1750_v51  ;;  %v5571_v51 = vpack.c.bf16 %v2062_v49, %v2061_v48  ;;  %v2063_v52 = vld [vmem:[#allocation7 + $0x110] sm:$0xff]  ;;  %v2318_v48 = vld [vmem:[#allocation8 + $0xb8] sm:$0xff] }
 0x2eb   : > { %4708 = vmatprep.mubr.f32.mxu0 %v1191_v54  ;;  %4743 = vmatprep.mubr.f32.mxu1 %v1191_v54 }
 0x2ec   : > { %4709 = vmatmul.mubr.f32.vlgmr.msra.gmra.mrb[6].mxu0 %v6605_v55  ;;  %4744 = vmatmul.mubr.f32.vlgmr.msra.gmra.mrb[8].mxu1 %v6605_v55 }
 0x2ed   : > { %4750 = vmatprep.mubr.msk.f32.mxu0 %vm6246_vm3, %v6247_v57  ;;  %4834 = vmatprep.mubr.msk.f32.mxu1 %vm6246_vm3, %v6247_v57 }
 0x2ee   : > { %5524 = vmatpush3.bf16.msra.mxu1 %v5523_v32  ;;  %v1834_v32 = vld [vmem:[#allocation7 + $0xc8] sm:$0xff] }
 0x2ef   : > { %5525 = vmatprep.subr.bf16.mxu1 %v6245_v56  ;;  %v5559_v33 = vpack.c.bf16 %v1834_v32, %v1833_v31  ;;  %v2236_v32 = vld [vmem:[#allocation8 + $0x70] sm:$0xff] }
 0x2f2   : > { %5527 = vmatpush3.bf16.msra.mxu1 %v5526_v35  ;;  %v1836_v35 = vld [vmem:[#allocation7 + $0xd8] sm:$0xff] }
 0x2f3   : > { %5528 = vmatprep.subr.bf16.mxu1 %v6245_v56  ;;  %v5562_v36 = vpack.c.bf16 %v1836_v35, %v1835_v34  ;;  %v2311_v35 = vld [vmem:[#allocation8 + $0x80] sm:$0xff] }
 0x2f6   : > { %5530 = vmatpush3.bf16.msra.mxu1 %v5529_v38  ;;  %v1838_v38 = vld [vmem:[#allocation7 + $0xe8] sm:$0xff] }
 0x2f7   : > { %5531 = vmatprep.subr.bf16.mxu1 %v6245_v56  ;;  %v5565_v39 = vpack.c.bf16 %v1838_v38, %v1837_v37  ;;  %v4087_v37 = vld [vmem:[%s6925_s9 + $0x10] sm:$0x1f] }
 0x2fa   : > { %5533 = vmatpush3.bf16.msra.mxu1 %v5532_v41  ;;  %v1840_v41 = vld [vmem:[#allocation7 + $0xf8] sm:$0xff] }
 0x2fb   : > { %5534 = vmatprep.subr.bf16.mxu1 %v6245_v56  ;;  %v5568_v42 = vpack.c.bf16 %v1840_v41, %v1839_v40  ;;  %v2313_v40 = vld [vmem:[#allocation8 + $0x90] sm:$0xff]  ;;  %v2314_v41 = vld [vmem:[#allocation8 + $0x98] sm:$0xff] }
 0x2fe   : > { %5536 = vmatpush3.bf16.msra.mxu1 %v5535_v44 }
 0x2ff   : > { %5537 = vmatprep.subr.bf16.mxu1 %v6245_v56 }
 0x302   : > { %5539 = vmatpush3.bf16.msra.mxu1 %v5538_v47 }
 0x303   : > { %5540 = vmatprep.subr.bf16.mxu1 %v6245_v56 }
 0x306   : > { %5542 = vmatpush3.bf16.msra.mxu1 %v5541_v50  ;;  %v1735_v50 = vld [vmem:[%s6925_s9] sm:$0x1f] }
 0x307   : > { %5543 = vmatprep.subr.bf16.mxu1 %v6245_v56 }
 0x30a   : > { %5545 = vmatpush3.bf16.msra.mxu1 %v5544_v53  ;;  %v2064_v53 = vld [vmem:[#allocation7 + $0x118] sm:$0xff] }
 0x30b   : > { %5546 = vmatprep.subr.bf16.mxu1 %v6245_v56 }
 0x3bf   : > { %v4710_v58 = vpop.f32.mrb[6].mxu0  ;;  %v4745_v59 = vpop.f32.mrb[8].mxu1 }
 0x3c0   : > { %v1276_v60 = vpop.f32.mrb[7].mxu0  ;;  %v1370_v61 = vpop.f32.mrb[9].mxu1 }
 0x3c1   : > { %v5485_v62 = vpack.c.bf16 %v4710_v58, %v1276_v60  ;;  %v5482_v63 = vpack.c.bf16 %v4745_v59, %v1370_v61 }
 0x3c3   : > { %5483 = vmatpush3.bf16.msra.mxu0 %v5482_v63 }
 0x3c4   : > { %5484 = vmatprep.subr.bf16.mxu0 %v6245_v56 }
 0x3c6   : > { %4751 = vmatmul.mubr.msk.f32.vlgmr.msra.gmra.mrb[8].mxu0 %vm1379_vm4, %v4075_v2 }
 0x3c7   : > { %5486 = vmatpush3.bf16.msra.mxu0 %v5485_v62  ;;  %4757 = vmatprep.mubr.msk.f32.mxu0 %vm6246_vm3, %v6247_v57 }
 0x3c8   : > { %5488 = vmatprep.subr.bf16.mxu0 %v5487_v3 }
 0x3ce   : > { %4758 = vmatmul.mubr.msk.f32.vlgmr.msra.gmra.mrb[8].mxu0 %vm1379_vm4, %v1193_v6 }
 0x3cf   : > { %5490 = vmatpush3.bf16.msra.mxu0 %v5487_v3  ;;  %4792 = vmatprep.mubr.f32.mxu0 %v1191_v54 }
 0x3d0   : > { %5492 = vmatprep.subr.bf16.mxu0 %v5491_v7 }
 0x3d3   : > { %5494 = vmatpush3.bf16.msra.mxu0 %v5491_v7 }
 0x3d4   : > { %5496 = vmatprep.subr.bf16.mxu0 %v5495_v10 }
 0x3d7   : > { %5498 = vmatpush3.bf16.msra.mxu0 %v5495_v10 }
 0x3d8   : > { %5500 = vmatprep.subr.bf16.mxu0 %v5499_v13 }
 0x3db   : > { %5502 = vmatpush3.bf16.msra.mxu0 %v5499_v13 }
 0x3dc   : > { %5504 = vmatprep.subr.bf16.mxu0 %v5503_v16 }
 0x3df   : > { %5506 = vmatpush3.bf16.msra.mxu0 %v5503_v16  ;;  %v1825_v16 = vld [vmem:[#allocation7 + $0x80] sm:$0xff] }
 0x3e0   : > { %5508 = vmatprep.subr.bf16.mxu0 %v5507_v19  ;;  %v5547_v20 = vpack.c.bf16 %v1826_v17, %v1825_v16  ;;  %v2226_v17 = vld [vmem:[#allocation8 + $0x20] sm:$0xff] }
 0x3e3   : > { %5510 = vmatpush3.bf16.msra.mxu0 %v5507_v19 }
 0x3e4   : > { %5512 = vmatprep.subr.bf16.mxu0 %v5511_v22 }
 0x3e7   : > { %5514 = vmatpush3.bf16.msra.mxu0 %v5511_v22  ;;  %v1827_v22 = vld [vmem:[#allocation7 + $0x90] sm:$0xff] }
 0x3e8   : > { %5516 = vmatprep.subr.bf16.mxu0 %v5515_v25  ;;  %v5550_v24 = vpack.c.bf16 %v1828_v23, %v1827_v22  ;;  %v2230_v23 = vld [vmem:[#allocation8 + $0x40] sm:$0xff] }
 0x3eb   : > { %5518 = vmatpush3.bf16.msra.mxu0 %v5515_v25  ;;  %v1829_v25 = vld [vmem:[#allocation7 + $0xa0] sm:$0xff] }
 0x3ec   : > { %5519 = vmatprep.subr.bf16.mxu0 %v6245_v56 }
 0x3ee   : > { %4793 = vmatmul.mubr.f32.vlgmr.msra.gmra.mrb[10].mxu0 %v6605_v55 }
 0x3ef   : > { %4799 = vmatprep.mubr.msk.f32.mxu0 %vm6246_vm3, %v6247_v57 }
 0x4c1   : > { %v4794_v26 = vpop.f32.mrb[10].mxu0 }
 0x4c2   : > { %v1611_v27 = vpop.f32.mrb[11].mxu0 }
 0x4c3   : > { %v5520_v28 = vpack.c.bf16 %v4794_v26, %v1611_v27  ;;  %v1830_v26 = vld [vmem:[#allocation7 + $0xa8] sm:$0xff] }
 0x4c4   : > { %v5553_v27 = vpack.c.bf16 %v1830_v26, %v1829_v25  ;;  %v2232_v26 = vld [vmem:[#allocation8 + $0x50] sm:$0xff] }
 0x4c5   : > { %5521 = vmatpush3.bf16.msra.mxu0 %v5520_v28  ;;  %v1831_v28 = vld [vmem:[#allocation7 + $0xb0] sm:$0xff] }
 0x4c6   : > { %4872 = vmatprep.subr.mxu0 %v6247_v57 }
 0x4c8   : > { %4800 = vmatmul.mubr.msk.f32.vlgmr.msra.gmra.mrb[8].mxu0 %vm1379_vm4, %v4078_v29  ;;  %v1832_v29 = vld [vmem:[#allocation7 + $0xb8] sm:$0xff] }
 0x4c9   : > { %4874 = vmatprep.mubr.msk.f32.mxu0 %vm6246_vm3, %v6247_v57  ;;  %v5556_v30 = vpack.c.bf16 %v1832_v29, %v1831_v28  ;;  %v2234_v29 = vld [vmem:[#allocation8 + $0x60] sm:$0xff] }
 0x59b   : > { %v1689_v54 = vpop.f32.mrb[8].mxu0 }
 0x59c   : > { %vm1694_vm5 = vcmp.ge.f32.partialorder %v1689_v54, 0.0  ;;  %v1695_v55 = vmul.f32 0.01, %v1689_v54  ;;  %v4801_v58 = vpop.f32.mrb[9].mxu0 }
 0x59d   : > { %v2066_v58 = vld [vmem:[#allocation7 + $0x128] sm:$0xff] }
 0x59e   : > { %v1696_v59 = vsel %vm1694_vm5, %v1689_v54, %v1695_v55  ;;  %v5574_v54 = vpack.c.bf16 %v2064_v53, %v2063_v52  ;;  %v2065_v55 = vld [vmem:[#allocation7 + $0x120] sm:$0xff]  ;;  %v2321_v53 = vld [vmem:[#allocation8 + $0xd0] sm:$0xff] }
 0x59f   : > { %v1697_v60 = vrot.slane %v1696_v59, 4 }
 0x5a1   : > { %v1698_v61 = vadd.f32 %v1697_v60, %v1696_v59  ;;  %v2067_v60 = vld [vmem:[#allocation7 + $0x130] sm:$0xff] }
 0x5a3   : > { %v1699_v62 = vrot.slane %v1698_v61, 2 }
 0x5a5   : > { %v1700_v63 = vadd.f32 %v1699_v62, %v1698_v61  ;;  %v2068_v61 = vld [vmem:[#allocation7 + $0x138] sm:$0xff] }
 0x5a6   : > { %v5580_v62 = vpack.c.bf16 %v2068_v61, %v2067_v60  ;;  %v2325_v61 = vld [vmem:[#allocation8 + $0xf0] sm:$0xff] }
 0x5a7   : > { %v1701_v0 = vrot.slane %v1700_v63, 1 }
 0x5a9   : > { %v1702_v1 = vadd.f32 %v1701_v0, %v1700_v63  ;;  %v2069_v63 = vld [vmem:[#allocation7 + $0x140] sm:$0xff]  ;;  %v2070_v0 = vld [vmem:[#allocation7 + $0x148] sm:$0xff] }
 0x5ab   : > { %v1704_v2 = vmul.f32 0.125, %v1702_v1  ;;  %v5583_v1 = vpack.c.bf16 %v2070_v0, %v2069_v63 }
 0x5ad   : > { %v1705_v3 = vsub.f32 %v1696_v59, %v1704_v2  ;;  %v5577_v59 = vpack.c.bf16 %v2066_v58, %v2065_v55  ;;  %v2071_v2 = vld [vmem:[#allocation7 + $0x150] sm:$0xff]  ;;  %v2323_v58 = vld [vmem:[#allocation8 + $0xe0] sm:$0xff] }
 0x5af   : > { %v1706_v4 = vmul.f32 %v1705_v3, %v1705_v3 }
 0x5b1   : > { %v1707_v5 = vrot.slane %v1706_v4, 4 }
 0x5b3   : > { %v1708_v6 = vadd.f32 %v1707_v5, %v1706_v4  ;;  %v2073_v5 = vld [vmem:[#allocation7 + $0x160] sm:$0xff] }
 0x5b5   : > { %v1709_v7 = vrot.slane %v1708_v6, 2 }
 0x5b7   : > { %v1710_v8 = vadd.f32 %v1709_v7, %v1708_v6  ;;  %v2074_v6 = vld [vmem:[#allocation7 + $0x168] sm:$0xff] }
 0x5b8   : > { %v5589_v7 = vpack.c.bf16 %v2074_v6, %v2073_v5 }
 0x5b9   : > { %v1711_v9 = vrot.slane %v1710_v8, 1 }
 0x5bb   : > { %v1712_v10 = vadd.f32 %v1711_v9, %v1710_v8  ;;  %v2075_v8 = vld [vmem:[#allocation7 + $0x170] sm:$0xff]  ;;  %v2076_v9 = vld [vmem:[#allocation7 + $0x178] sm:$0xff] }
 0x5bd   : > { %v1713_v11 = vmul.f32 0.125, %v1712_v10  ;;  %v5592_v10 = vpack.c.bf16 %v2076_v9, %v2075_v8  ;;  %v2555_v8 = vld [vmem:[#allocation8 + $0x108] sm:$0xff]  ;;  %v2221_v9 = vld [vmem:[%s6926_s10] sm:$0xff] }
 0x5bf   : > { %v1714_v12 = vadd.f32 1e-05, %v1713_v11  ;;  %v2222_v11 = vld [vmem:[#allocation8] sm:$0xff] }
 0x5c1   : > { %5983 = vrsqrt.f32 %v1714_v12  ;;  %v2223_v12 = vld [vmem:[#allocation8 + $0x8] sm:$0xff] }
 0x5cb   : > { %v5984_v13 = vpop.eup %5983 }
 0x5cc   : > { %v1716_v15 = vmul.f32 %v5984_v13, %v1705_v3  ;;  %v2072_v3 = vld [vmem:[#allocation7 + $0x158] sm:$0xff]  ;;  %v5595_v13 = vpack.c.bf16 %v2223_v12, %v2222_v11  ;;  %v2556_v11 = vld [vmem:[#allocation8 + $0x110] sm:$0xff] }
 0x5cd   : > { %v5586_v4 = vpack.c.bf16 %v2072_v3, %v2071_v2  ;;  %v4089_v2 = vld [vmem:[%s6926_s10 + $0x8] sm:$0xff]  ;;  %v2557_v12 = vld [vmem:[#allocation8 + $0x118] sm:$0xff] }
 0x5ce   : > { %v1725_v19 = vmul.f32 %v4081_v14, %v1716_v15  ;;  %v2224_v14 = vld [vmem:[#allocation8 + $0x10] sm:$0xff]  ;;  %v2225_v15 = vld [vmem:[#allocation8 + $0x18] sm:$0xff] }
 0x5cf   : > { %v5598_v16 = vpack.c.bf16 %v2225_v15, %v2224_v14  ;;  %v2558_v14 = vld [vmem:[#allocation8 + $0x120] sm:$0xff]  ;;  %v2559_v15 = vld [vmem:[#allocation8 + $0x128] sm:$0xff] }
 0x5d0   : > { %v6651_v21 = vadd.f32 %v4083_v18, %v1725_v19  ;;  %v2227_v18 = vld [vmem:[#allocation8 + $0x28] sm:$0xff] }
 0x5d1   : > { %v5601_v19 = vpack.c.bf16 %v2227_v18, %v2226_v17  ;;  %v2560_v17 = vld [vmem:[#allocation8 + $0x130] sm:$0xff]  ;;  %v2561_v18 = vld [vmem:[#allocation8 + $0x138] sm:$0xff] }
 0x5d2   : > { %4835 = vmatmul.mubr.f32.vlgmr.msra.gmra.mrb[10].mxu1 %v6651_v21 }
 0x5d3   : > { %5548 = vmatpush3.bf16.msra.mxu1 %v5547_v20  ;;  %4869 = vmatprep.mubr.msk.f32.mxu1 %vm6246_vm3, %v6247_v57  ;;  %v2228_v20 = vld [vmem:[#allocation8 + $0x30] sm:$0xff] }
 0x5d4   : > { %5549 = vmatprep.subr.bf16.mxu1 %v6245_v56 }
 0x5d7   : > { %5551 = vmatpush3.bf16.msra.mxu1 %v5550_v24  ;;  %v2231_v24 = vld [vmem:[#allocation8 + $0x48] sm:$0xff] }
 0x5d8   : > { %5552 = vmatprep.subr.bf16.mxu1 %v6245_v56  ;;  %v5607_v25 = vpack.c.bf16 %v2231_v24, %v2230_v23  ;;  %v2564_v23 = vld [vmem:[#allocation8 + $0x150] sm:$0xff]  ;;  %v2565_v24 = vld [vmem:[#allocation8 + $0x158] sm:$0xff] }
 0x5db   : > { %5554 = vmatpush3.bf16.msra.mxu1 %v5553_v27  ;;  %v2233_v27 = vld [vmem:[#allocation8 + $0x58] sm:$0xff] }
 0x5dc   : > { %5555 = vmatprep.subr.bf16.mxu1 %v6245_v56  ;;  %v5610_v28 = vpack.c.bf16 %v2233_v27, %v2232_v26  ;;  %v2566_v26 = vld [vmem:[#allocation8 + $0x160] sm:$0xff]  ;;  %v2567_v27 = vld [vmem:[#allocation8 + $0x168] sm:$0xff] }
 0x5df   : > { %5557 = vmatpush3.bf16.msra.mxu1 %v5556_v30  ;;  %v2235_v30 = vld [vmem:[#allocation8 + $0x68] sm:$0xff] }
 0x5e0   : > { %5558 = vmatprep.subr.bf16.mxu1 %v6245_v56  ;;  %v5613_v31 = vpack.c.bf16 %v2235_v30, %v2234_v29  ;;  %v2568_v29 = vld [vmem:[#allocation8 + $0x170] sm:$0xff]  ;;  %v2569_v30 = vld [vmem:[#allocation8 + $0x178] sm:$0xff] }
 0x5e3   : > { %5560 = vmatpush3.bf16.msra.mxu1 %v5559_v33  ;;  %v2237_v33 = vld [vmem:[#allocation8 + $0x78] sm:$0xff] }
 0x5e4   : > { %5561 = vmatprep.subr.bf16.mxu1 %v6245_v56  ;;  %v5616_v34 = vpack.c.bf16 %v2237_v33, %v2236_v32  ;;  %v4094_v32 = vld [vmem:[%s6926_s10 + $0x10] sm:$0xff] }
 0x5e7   : > { %5563 = vmatpush3.bf16.msra.mxu1 %v5562_v36  ;;  %v2312_v36 = vld [vmem:[#allocation8 + $0x88] sm:$0xff] }
 0x5e8   : > { %5564 = vmatprep.subr.bf16.mxu1 %v6245_v56  ;;  %v5619_v38 = vpack.c.bf16 %v2312_v36, %v2311_v35  ;;  %v2759_v35 = vld [vmem:[#allocation10] sm:$0xff]  ;;  %v2760_v36 = vld [vmem:[#allocation10 + $0x8] sm:$0xff] }
 0x5eb   : > { %5566 = vmatpush3.bf16.msra.mxu1 %v5565_v39 }
 0x5ec   : > { %5567 = vmatprep.subr.bf16.mxu1 %v6245_v56 }
 0x5ef   : > { %5569 = vmatpush3.bf16.msra.mxu1 %v5568_v42 }
 0x5f0   : > { %5594 = vmatprep.subr.bf16.mxu1 %v6245_v56 }
 0x5f2   : > { %4870 = vmatmul.mubr.f32.vlgmr.msra.gmra.mrb[12].mxu1 %v6651_v21 }
 0x5f3   : > { %4954 = vmatprep.mubr.msk.f32.mxu1 %vm6246_vm3, %v6247_v57  ;;  %5596 = vmatpush3.bf16.msra.mxu1 %v5595_v13  ;;  %v5646_v13 = vpack.c.bf16 %v2557_v12, %v2556_v11  ;;  %v2861_v11 = vld [vmem:[#allocation10 + $0xe0] sm:$0xff] }
 0x5f4   : > { %5597 = vmatprep.subr.bf16.mxu1 %v6245_v56 }
 0x5f7   : > { %5599 = vmatpush3.bf16.msra.mxu1 %v5598_v16  ;;  %v5649_v16 = vpack.c.bf16 %v2559_v15, %v2558_v14  ;;  %v2773_v15 = vld [vmem:[#allocation10 + $0x70] sm:$0xff] }
 0x5f8   : > { %5600 = vmatprep.subr.bf16.mxu1 %v6245_v56 }
 0x5fb   : > { %5602 = vmatpush3.bf16.msra.mxu1 %v5601_v19  ;;  %v5652_v19 = vpack.c.bf16 %v2561_v18, %v2560_v17  ;;  %v2863_v17 = vld [vmem:[#allocation10 + $0xf0] sm:$0xff] }
 0x5fc   : > { %5603 = vmatprep.subr.bf16.mxu1 %v6245_v56 }
 0x6a5   : > { %v1818_v43 = vpop.f32.mrb[10].mxu1 }
 0x6a6   : > { %v4836_v44 = vpop.f32.mrb[11].mxu1 }
 0x6a7   : > { %v2315_v44 = vld [vmem:[#allocation8 + $0xa0] sm:$0xff] }
 0x6c5   : > { %v1907_v46 = vpop.f32.mrb[12].mxu1 }
 0x6c6   : > { %v4871_v47 = vpop.f32.mrb[13].mxu1  ;;  %4873 = vmatpush3.msra.mxu0 %v1907_v46 }
 0x6c7   : > { %4875 = vmatmul.mubr.msk.f32.vlgmr.msra.gmra.mrb[12].mxu0 %vm1911_vm6, %v4084_v45  ;;  %4877 = vmatprep.subr.mxu0 %v6247_v57  ;;  %v2316_v45 = vld [vmem:[#allocation8 + $0xa8] sm:$0xff]  ;;  %v2317_v47 = vld [vmem:[#allocation8 + $0xb0] sm:$0xff] }
 0x6c8   : > { %4878 = vmatpush3.msra.mxu0 %v1818_v43  ;;  %4879 = vmatprep.mubr.msk.f32.mxu0 %vm6246_vm3, %v6247_v57  ;;  %v5622_v43 = vpack.c.bf16 %v2314_v41, %v2313_v40  ;;  %v5625_v46 = vpack.c.bf16 %v2316_v45, %v2315_v44  ;;  %v5628_v49 = vpack.c.bf16 %v2318_v48, %v2317_v47  ;;  %v2761_v41 = vld [vmem:[#allocation10 + $0x10] sm:$0xff]  ;;  %v2852_v45 = vld [vmem:[#allocation10 + $0x98] sm:$0xff]  ;;  %v2763_v47 = vld [vmem:[#allocation10 + $0x20] sm:$0xff] }
 0x6c9   : > { %5570 = vmatprep.subr.bf16.mxu0 %v6245_v56  ;;  %v2764_v48 = vld [vmem:[#allocation10 + $0x28] sm:$0xff] }
 0x6cf   : > { %4880 = vmatmul.mubr.msk.f32.vlgmr.msra.gmra.mrb[12].mxu0 %vm1911_vm6, %v1735_v50  ;;  %v2319_v50 = vld [vmem:[#allocation8 + $0xc0] sm:$0xff] }
 0x6d0   : > { %5572 = vmatpush3.bf16.msra.mxu0 %v5571_v51  ;;  %4914 = vmatprep.mubr.msk.f32.mxu0 %vm6246_vm3, %v6247_v57  ;;  %v2320_v51 = vld [vmem:[#allocation8 + $0xc8] sm:$0xff] }
 0x6d1   : > { %5573 = vmatprep.subr.bf16.mxu0 %v6245_v56  ;;  %v5631_v52 = vpack.c.bf16 %v2320_v51, %v2319_v50  ;;  %v5673_v50 = vpack.c.bf16 %v2764_v48, %v2763_v47  ;;  %v2854_v51 = vld [vmem:[#allocation10 + $0xa8] sm:$0xff]  ;;  %v4101_v48 = vld [vmem:[%s6974_s21 + $0x10] sm:$0xff]  ;;  %s6976_s21 = sld [smem:[#allocation29_spill]] }
 0x6d4   : > { %5575 = vmatpush3.bf16.msra.mxu0 %v5574_v54  ;;  %v2322_v54 = vld [vmem:[#allocation8 + $0xd8] sm:$0xff] }
 0x6d5   : > { %5576 = vmatprep.subr.bf16.mxu0 %v6245_v56  ;;  %v5634_v55 = vpack.c.bf16 %v2322_v54, %v2321_v53  ;;  %v2765_v53 = vld [vmem:[#allocation10 + $0x30] sm:$0xff]  ;;  %v2766_v54 = vld [vmem:[#allocation10 + $0x38] sm:$0xff] }
 0x6d7   : > { %s6977_s29 = smov %s6976_s21 }
 0x6d8   : > { %5578 = vmatpush3.bf16.msra.mxu0 %v5577_v59  ;;  %v2324_v59 = vld [vmem:[#allocation8 + $0xe8] sm:$0xff] }
 0x6d9   : > { %5579 = vmatprep.subr.bf16.mxu0 %v6245_v56  ;;  %v5637_v60 = vpack.c.bf16 %v2324_v59, %v2323_v58  ;;  %v5676_v58 = vpack.c.bf16 %v2766_v54, %v2765_v53  ;;  %v2856_v59 = vld [vmem:[#allocation10 + $0xb8] sm:$0xff]  ;;  %v2757_v54 = vld [vmem:[%s6975_s17] sm:$0xff] }
 0x6dc   : > { %5581 = vmatpush3.bf16.msra.mxu0 %v5580_v62  ;;  %v2326_v62 = vld [vmem:[#allocation8 + $0xf8] sm:$0xff] }
 0x6dd   : > { %5582 = vmatprep.subr.bf16.mxu0 %v6245_v56  ;;  %v5640_v63 = vpack.c.bf16 %v2326_v62, %v2325_v61  ;;  %v2767_v61 = vld [vmem:[#allocation10 + $0x40] sm:$0xff]  ;;  %v2768_v62 = vld [vmem:[#allocation10 + $0x48] sm:$0xff] }
 0x6e0   : > { %5584 = vmatpush3.bf16.msra.mxu0 %v5583_v1 }
 0x6e1   : > { %5585 = vmatprep.subr.bf16.mxu0 %v6245_v56 }
 0x6e4   : > { %5587 = vmatpush3.bf16.msra.mxu0 %v5586_v4 }
 0x6e5   : > { %5588 = vmatprep.subr.bf16.mxu0 %v6245_v56 }
 0x6e8   : > { %5590 = vmatpush3.bf16.msra.mxu0 %v5589_v7  ;;  %v2554_v7 = vld [vmem:[#allocation8 + $0x100] sm:$0xff] }
 0x6e9   : > { %5591 = vmatprep.subr.bf16.mxu0 %v6245_v56 }
 0x6ec   : > { %5593 = vmatpush3.bf16.msra.mxu0 %v5592_v10  ;;  %v5643_v10 = vpack.c.bf16 %v2555_v8, %v2554_v7  ;;  %v2860_v7 = vld [vmem:[#allocation10 + $0xd8] sm:$0xff] }
 0x6ed   : > { %4917 = vmatprep.subr.mxu0 %v6247_v57 }
 0x6ef   : > { %4915 = vmatmul.mubr.f32.vlgmr.msra.gmra.mrb[14].mxu0 %v6651_v21  ;;  %v2229_v21 = vld [vmem:[#allocation8 + $0x38] sm:$0xff] }
 0x6f0   : > { %4919 = vmatprep.mubr.msk.f32.mxu0 %vm6246_vm3, %v6247_v57  ;;  %v5604_v22 = vpack.c.bf16 %v2229_v21, %v2228_v20  ;;  %v2562_v20 = vld [vmem:[#allocation8 + $0x140] sm:$0xff]  ;;  %v2563_v21 = vld [vmem:[#allocation8 + $0x148] sm:$0xff] }
 0x6f2   : > { %5605 = vmatpush3.bf16.msra.mxu1 %v5604_v22  ;;  %v5655_v22 = vpack.c.bf16 %v2563_v21, %v2562_v20 }
 0x6f3   : > { %5606 = vmatprep.subr.bf16.mxu1 %v6245_v56 }
 0x6f6   : > { %5608 = vmatpush3.bf16.msra.mxu1 %v5607_v25  ;;  %v5658_v25 = vpack.c.bf16 %v2565_v24, %v2564_v23 }
 0x6f7   : > { %5609 = vmatprep.subr.bf16.mxu1 %v6245_v56 }
 0x6fa   : > { %5611 = vmatpush3.bf16.msra.mxu1 %v5610_v28  ;;  %v5661_v28 = vpack.c.bf16 %v2567_v27, %v2566_v26 }
 0x6fb   : > { %5612 = vmatprep.subr.bf16.mxu1 %v6245_v56 }
 0x6fe   : > { %5614 = vmatpush3.bf16.msra.mxu1 %v5613_v31  ;;  %v5664_v31 = vpack.c.bf16 %v2569_v30, %v2568_v29 }
 0x6ff   : > { %5615 = vmatprep.subr.bf16.mxu1 %v6245_v56 }
 0x702   : > { %5617 = vmatpush3.bf16.msra.mxu1 %v5616_v34 }
 0x703   : > { %4992 = vmatprep.subr.mxu1 %v6247_v57 }
 0x7c2   : > { %v2143_v39 = vpop.f32.mrb[14].mxu0 }
 0x7c3   : > { %v4916_v42 = vpop.f32.mrb[15].mxu0  ;;  %4918 = vmatpush3.msra.mxu0 %v2143_v39  ;;  %v2850_v39 = vld [vmem:[#allocation10 + $0x88] sm:$0xff] }
 0x7c4   : > { %4920 = vmatmul.mubr.msk.f32.vlgmr.msra.gmra.mrb[12].mxu0 %vm1911_vm6, %v4087_v37  ;;  %5618 = vmatprep.subr.bf16.mxu0 %v6245_v56  ;;  %v2849_v37 = vld [vmem:[#allocation10 + $0x80] sm:$0xff]  ;;  %v2762_v42 = vld [vmem:[#allocation10 + $0x18] sm:$0xff] }
 0x7c5   : > { %5620 = vmatpush3.bf16.msra.mxu0 %v5619_v38  ;;  %4989 = vmatprep.mubr.msk.f32.mxu0 %vm6246_vm3, %v6247_v57  ;;  %v5667_v38 = vpack.c.bf16 %v2760_v36, %v2759_v35  ;;  %v5691_v40 = vpack.c.bf16 %v2850_v39, %v2849_v37  ;;  %v5670_v44 = vpack.c.bf16 %v2762_v42, %v2761_v41 }
 0x7c6   : > { %5621 = vmatprep.subr.bf16.mxu0 %v6245_v56 }
 0x7c9   : > { %5623 = vmatpush3.bf16.msra.mxu0 %v5622_v43  ;;  %v2851_v43 = vld [vmem:[#allocation10 + $0x90] sm:$0xff] }
 0x7ca   : > { %5624 = vmatprep.subr.bf16.mxu0 %v6245_v56 }
 0x7cd   : > { %5626 = vmatpush3.bf16.msra.mxu0 %v5625_v46  ;;  %v5694_v46 = vpack.c.bf16 %v2852_v45, %v2851_v43  ;;  %v4098_v43 = vld [vmem:[%s6929_s13 + $0x2] ss:$0 sm:$0xff] }
 0x7ce   : > { %5627 = vmatprep.subr.bf16.mxu0 %v6245_v56  ;;  %v4100_v45 = vld [vmem:[%s6930_s14 + $0x2] ss:$0 sm:$0xff] }
 0x7d1   : > { %5629 = vmatpush3.bf16.msra.mxu0 %v5628_v49  ;;  %v2853_v49 = vld [vmem:[#allocation10 + $0xa0] sm:$0xff] }
 0x7d2   : > { %5630 = vmatprep.subr.bf16.mxu0 %v6245_v56 }
 0x7d5   : > { %5632 = vmatpush3.bf16.msra.mxu0 %v5631_v52  ;;  %v5697_v52 = vpack.c.bf16 %v2854_v51, %v2853_v49  ;;  %v4102_v51 = vld [vmem:[%s6975_s17 + $0x18] sm:$0xff] }
 0x7d6   : > { %5633 = vmatprep.subr.bf16.mxu0 %v6245_v56 }
 0x7d9   : > { %5635 = vmatpush3.bf16.msra.mxu0 %v5634_v55  ;;  %v2855_v55 = vld [vmem:[#allocation10 + $0xb0] sm:$0xff] }
 0x7da   : > { %5636 = vmatprep.subr.bf16.mxu0 %v6245_v56 }
 0x7dd   : > { %5638 = vmatpush3.bf16.msra.mxu0 %v5637_v60  ;;  %v5700_v60 = vpack.c.bf16 %v2856_v59, %v2855_v55  ;;  %v3101_v55 = vld [vmem:[#allocation10 + $0x100] sm:$0xff]  ;;  %v2758_v59 = vld [vmem:[%s6975_s17 + $0x8] sm:$0xff] }
 0x7de   : > { %5639 = vmatprep.subr.bf16.mxu0 %v6245_v56 }
 0x7e1   : > { %5641 = vmatpush3.bf16.msra.mxu0 %v5640_v63  ;;  %v2857_v63 = vld [vmem:[#allocation10 + $0xc0] sm:$0xff] }
 0x7e2   : > { %5666 = vmatprep.subr.bf16.mxu0 %v6245_v56 }
 0x897   : > { %v2216_v0 = vpop.f32.mrb[12].mxu0 }
 0x898   : > { %v4921_v1 = vpop.f32.mrb[13].mxu0  ;;  %4955 = vmatmul.mubr.f32.vlgmr.msra.gmra.mrb[14].mxu1 %v2216_v0  ;;  %4990 = vmatmul.mubr.f32.vlgmr.msra.gmra.mrb[16].mxu0 %v2216_v0 }
 0x899   : > { %4994 = vmatprep.mubr.msk.f32.mxu1 %vm6246_vm3, %v6247_v57  ;;  %5074 = vmatprep.mubr.msk.f32.mxu0 %vm6246_vm3, %v6247_v57  ;;  %v2858_v1 = vld [vmem:[#allocation10 + $0xc8] sm:$0xff] }
 0x89a   : > { %5668 = vmatpush3.bf16.msra.mxu0 %v5667_v38 }
 0x89b   : > { %5669 = vmatprep.subr.bf16.mxu0 %v6245_v56 }
 0x89e   : > { %5671 = vmatpush3.bf16.msra.mxu0 %v5670_v44 }
 0x89f   : > { %5672 = vmatprep.subr.bf16.mxu0 %v6245_v56 }
 0x8a2   : > { %5674 = vmatpush3.bf16.msra.mxu0 %v5673_v50 }
 0x8a3   : > { %5675 = vmatprep.subr.bf16.mxu0 %v6245_v56 }
 0x8a6   : > { %5677 = vmatpush3.bf16.msra.mxu0 %v5676_v58  ;;  %v3102_v58 = vld [vmem:[#allocation10 + $0x108] sm:$0xff] }
 0x8a7   : > { %5678 = vmatprep.subr.bf16.mxu0 %v6245_v56 }
 0x96b   : > { %v2304_v3 = vpop.f32.mrb[14].mxu1  ;;  %v2393_v4 = vpop.f32.mrb[16].mxu0 }
 0x96c   : > { %v4956_v5 = vpop.f32.mrb[15].mxu1  ;;  %v4991_v6 = vpop.f32.mrb[17].mxu0  ;;  %4993 = vmatpush3.msk.msra.mxu1 %vm2401_vm7, %v2393_v4  ;;  %v2770_v4 = vld [vmem:[#allocation10 + $0x58] sm:$0xff] }
 0x96d   : > { %4995 = vmatmul.mubr.msk.f32.vlgmr.msra.gmra.mrb[16].mxu1 %vm2397_vm8, %v4089_v2  ;;  %4997 = vmatprep.subr.mxu1 %v6247_v57  ;;  %v5703_v2 = vpack.c.bf16 %v2858_v1, %v2857_v63  ;;  %v2859_v5 = vld [vmem:[#allocation10 + $0xd0] sm:$0xff]  ;;  %v3106_v1 = vld [vmem:[#allocation10 + $0x128] sm:$0xff] }
 0x96e   : > { %4998 = vmatpush3.msk.msra.mxu1 %vm2401_vm7, %v2304_v3  ;;  %4999 = vmatprep.mubr.msk.f32.mxu1 %vm6246_vm3, %v6247_v57  ;;  %v2769_v3 = vld [vmem:[#allocation10 + $0x50] sm:$0xff]  ;;  %v5706_v8 = vpack.c.bf16 %v2860_v7, %v2859_v5  ;;  %v3110_v7 = vld [vmem:[#allocation10 + $0x148] sm:$0xff] }
 0x96f   : > { %5642 = vmatprep.subr.bf16.mxu1 %v6245_v56  ;;  %v5682_v6 = vpack.c.bf16 %v2770_v4, %v2769_v3  ;;  %v3107_v3 = vld [vmem:[#allocation10 + $0x130] sm:$0xff]  ;;  %v3108_v4 = vld [vmem:[#allocation10 + $0x138] sm:$0xff] }
 0x970   : > { %v5724_v5 = vpack.c.bf16 %v3108_v4, %v3107_v3  ;;  %v3436_v4 = vld [vmem:[#allocation11 + $0xf8] sm:$0xff] }
 0x975   : > { %5000 = vmatmul.mubr.msk.f32.vlgmr.msra.gmra.mrb[16].mxu1 %vm2397_vm8, %v2221_v9  ;;  %v2771_v9 = vld [vmem:[#allocation10 + $0x60] sm:$0xff] }
 0x976   : > { %5644 = vmatpush3.bf16.msra.mxu1 %v5643_v10  ;;  %5034 = vmatprep.mubr.msk.f32.mxu1 %vm6246_vm3, %v6247_v57  ;;  %v2772_v10 = vld [vmem:[#allocation10 + $0x68] sm:$0xff] }
 0x977   : > { %5645 = vmatprep.subr.bf16.mxu1 %v6245_v56  ;;  %v5685_v12 = vpack.c.bf16 %v2772_v10, %v2771_v9  ;;  %v3112_v9 = vld [vmem:[#allocation10 + $0x158] sm:$0xff] }
 0x97a   : > { %5647 = vmatpush3.bf16.msra.mxu1 %v5646_v13  ;;  %v2862_v13 = vld [vmem:[#allocation10 + $0xe8] sm:$0xff] }
 0x97b   : > { %5648 = vmatprep.subr.bf16.mxu1 %v6245_v56  ;;  %v5709_v14 = vpack.c.bf16 %v2862_v13, %v2861_v11  ;;  %v3113_v11 = vld [vmem:[#allocation10 + $0x160] sm:$0xff] }
 0x97e   : > { %5650 = vmatpush3.bf16.msra.mxu1 %v5649_v16  ;;  %v2774_v16 = vld [vmem:[#allocation10 + $0x78] sm:$0xff] }
 0x97f   : > { %5651 = vmatprep.subr.bf16.mxu1 %v6245_v56  ;;  %v5688_v18 = vpack.c.bf16 %v2774_v16, %v2773_v15  ;;  %v3116_v15 = vld [vmem:[#allocation10 + $0x178] sm:$0xff] }
 0x982   : > { %5653 = vmatpush3.bf16.msra.mxu1 %v5652_v19  ;;  %v2864_v19 = vld [vmem:[#allocation10 + $0xf8] sm:$0xff] }
 0x983   : > { %5654 = vmatprep.subr.bf16.mxu1 %v6245_v56  ;;  %v5712_v20 = vpack.c.bf16 %v2864_v19, %v2863_v17  ;;  %v4107_v17 = vld [vmem:[%s6975_s17 + $0x20] sm:$0xff]  ;;  %v4108_v19 = vld [vmem:[%s6975_s17 + $0x28] sm:$0xff] }
 0x986   : > { %5656 = vmatpush3.bf16.msra.mxu1 %v5655_v22 }
 0x987   : > { %5657 = vmatprep.subr.bf16.mxu1 %v6245_v56 }
 0x98a   : > { %5659 = vmatpush3.bf16.msra.mxu1 %v5658_v25 }
 0x98b   : > { %5660 = vmatprep.subr.bf16.mxu1 %v6245_v56 }
 0x98e   : > { %5662 = vmatpush3.bf16.msra.mxu1 %v5661_v28 }
 0x98f   : > { %5663 = vmatprep.subr.bf16.mxu1 %v6245_v56 }
 0x992   : > { %5665 = vmatpush3.bf16.msra.mxu1 %v5664_v31 }
 0x993   : > { %5037 = vmatprep.subr.mxu1 %v6247_v57 }
 0x995   : > { %5035 = vmatmul.mubr.f32.vlgmr.msra.gmra.mrb[18].mxu1 %v2216_v0  ;;  %v5679_v0 = vpack.c.bf16 %v2768_v62, %v2767_v61  ;;  %v3103_v61 = vld [vmem:[#allocation10 + $0x110] sm:$0xff]  ;;  %v3104_v62 = vld [vmem:[#allocation10 + $0x118] sm:$0xff] }
 0x996   : > { %5039 = vmatprep.mubr.msk.f32.mxu1 %vm6246_vm3, %v6247_v57  ;;  %v5718_v63 = vpack.c.bf16 %v3104_v62, %v3103_v61  ;;  %v3434_v62 = vld [vmem:[#allocation11 + $0xe8] sm:$0xff] }
 0x997   : > { %5680 = vmatpush3.bf16.msra.mxu0 %v5679_v0  ;;  %v3105_v0 = vld [vmem:[#allocation10 + $0x120] sm:$0xff] }
 0x998   : > { %5681 = vmatprep.subr.bf16.mxu0 %v6245_v56 }
 0x99b   : > { %5683 = vmatpush3.bf16.msra.mxu0 %v5682_v6  ;;  %v3109_v6 = vld [vmem:[#allocation10 + $0x140] sm:$0xff] }
 0x99c   : > { %5684 = vmatprep.subr.bf16.mxu0 %v6245_v56 }
 0x99f   : > { %5686 = vmatpush3.bf16.msra.mxu0 %v5685_v12  ;;  %v3114_v12 = vld [vmem:[#allocation10 + $0x168] sm:$0xff] }
 0x9a0   : > { %5687 = vmatprep.subr.bf16.mxu0 %v6245_v56  ;;  %v5733_v13 = vpack.c.bf16 %v3114_v12, %v3113_v11 }
 0x9a3   : > { %5689 = vmatpush3.bf16.msra.mxu0 %v5688_v18 }
 0xa68   : > { %v2636_v33 = vpop.f32.mrb[18].mxu1 }
 0xa69   : > { %v5036_v34 = vpop.f32.mrb[19].mxu1  ;;  %5038 = vmatpush3.msk.msra.mxu1 %vm2401_vm7, %v2636_v33 }
 0xa6a   : > { %5040 = vmatmul.mubr.msk.f32.vlgmr.msra.gmra.mrb[16].mxu1 %vm2397_vm8, %v4094_v32  ;;  %5690 = vmatprep.subr.bf16.mxu1 %v6245_v56 }
 0xa6b   : > { %5109 = vmatprep.mubr.msk.f32.mxu1 %vm6246_vm3, %v6247_v57  ;;  %5692 = vmatpush3.bf16.msra.mxu1 %v5691_v40 }
 0xa6c   : > { %5693 = vmatprep.subr.bf16.mxu1 %v6245_v56 }
 0xa6f   : > { %5695 = vmatpush3.bf16.msra.mxu1 %v5694_v46 }
 0xa70   : > { %5696 = vmatprep.subr.bf16.mxu1 %v6245_v56 }
 0xa73   : > { %5698 = vmatpush3.bf16.msra.mxu1 %v5697_v52 }
 0xa74   : > { %5699 = vmatprep.subr.bf16.mxu1 %v6245_v56 }
 0xa77   : > { %5701 = vmatpush3.bf16.msra.mxu1 %v5700_v60  ;;  %v5715_v60 = vpack.c.bf16 %v3102_v58, %v3101_v55  ;;  %v3336_v58 = vld [vmem:[#allocation11 + $0x60] sm:$0xff] }
 0xa78   : > { %5702 = vmatprep.subr.bf16.mxu1 %v6245_v56 }
 0xa7b   : > { %5704 = vmatpush3.bf16.msra.mxu1 %v5703_v2  ;;  %v5721_v2 = vpack.c.bf16 %v3106_v1, %v3105_v0  ;;  %v3338_v0 = vld [vmem:[#allocation11 + $0x70] sm:$0xff]  ;;  %v3339_v1 = vld [vmem:[#allocation11 + $0x78] sm:$0xff] }
 0xa7c   : > { %5705 = vmatprep.subr.bf16.mxu1 %v6245_v56  ;;  %v5766_v3 = vpack.c.bf16 %v3339_v1, %v3338_v0  ;;  %v3718_v1 = vld [vmem:[#allocation11 + $0x130] sm:$0xff] }
 0xa7f   : > { %5707 = vmatpush3.bf16.msra.mxu1 %v5706_v8  ;;  %v5727_v8 = vpack.c.bf16 %v3110_v7, %v3109_v6 }
 0xa80   : > { %5708 = vmatprep.subr.bf16.mxu1 %v6245_v56 }
 0xa83   : > { %5710 = vmatpush3.bf16.msra.mxu1 %v5709_v14  ;;  %v3115_v14 = vld [vmem:[#allocation10 + $0x170] sm:$0xff] }
 0xa84   : > { %5711 = vmatprep.subr.bf16.mxu1 %v6245_v56  ;;  %v5736_v16 = vpack.c.bf16 %v3116_v15, %v3115_v14 }
 0xa87   : > { %5713 = vmatpush3.bf16.msra.mxu1 %v5712_v20 }
 0xb3d   : > { %v2712_v21 = vpop.f32.mrb[16].mxu1 }
 0xb3e   : > { %vm2717_vm9 = vcmp.ge.f32.partialorder %v2712_v21, 0.0  ;;  %v2718_v22 = vmul.f32 0.0, %v2712_v21  ;;  %v5041_v23 = vpop.f32.mrb[17].mxu1 }
 0xb40   : > { %v2719_v24 = vsel %vm2717_vm9, %v2712_v21, %v2718_v22  ;;  %v3324_v21 = vld [vmem:[#allocation11] sm:$0xff] }
 0xb41   : > { %v2720_v25 = vrot.slane %v2719_v24, 4  ;;  %v3421_v22 = vld [vmem:[#allocation11 + $0x80] sm:$0xff] }
 0xb43   : > { %v2721_v26 = vadd.f32 %v2720_v25, %v2719_v24 }
 0xb45   : > { %v2722_v27 = vrot.slane %v2721_v26, 2 }
 0xb47   : > { %v2723_v28 = vadd.f32 %v2722_v27, %v2721_v26  ;;  %v3326_v26 = vld [vmem:[#allocation11 + $0x10] sm:$0xff]  ;;  %v3327_v27 = vld [vmem:[#allocation11 + $0x18] sm:$0xff] }
 0xb49   : > { %v2724_v29 = vrot.slane %v2723_v28, 1 }
 0xb4b   : > { %v2725_v30 = vadd.f32 %v2724_v29, %v2723_v28  ;;  %v3423_v28 = vld [vmem:[#allocation11 + $0x90] sm:$0xff]  ;;  %v5742_v29 = vpack.c.bf16 %v3327_v27, %v3326_v26 }
 0xb4d   : > { %v2726_v31 = vmul.f32 0.125, %v2725_v30  ;;  %v3424_v30 = vld [vmem:[#allocation11 + $0x98] sm:$0xff] }
 0xb4f   : > { %v2727_v32 = vsub.f32 %v2719_v24, %v2726_v31  ;;  %v3422_v24 = vld [vmem:[#allocation11 + $0x88] sm:$0xff]  ;;  %v5774_v31 = vpack.c.bf16 %v3424_v30, %v3423_v28 }
 0xb50   : > { %v5770_v25 = vpack.c.bf16 %v3422_v24, %v3421_v22 }
 0xb51   : > { %v2728_v33 = vmul.f32 %v2727_v32, %v2727_v32 }
 0xb53   : > { %v2729_v34 = vrot.slane %v2728_v33, 4 }
 0xb55   : > { %v2730_v35 = vadd.f32 %v2729_v34, %v2728_v33  ;;  %v3329_v33 = vld [vmem:[#allocation11 + $0x28] sm:$0xff]  ;;  %v3425_v34 = vld [vmem:[#allocation11 + $0xa0] sm:$0xff] }
 0xb57   : > { %v2731_v36 = vrot.slane %v2730_v35, 2 }
 0xb59   : > { %v2732_v37 = vadd.f32 %v2731_v36, %v2730_v35  ;;  %v3426_v36 = vld [vmem:[#allocation11 + $0xa8] sm:$0xff] }
 0xb5b   : > { %v2733_v38 = vrot.slane %v2732_v37, 1 }
 0xb5d   : > { %v2734_v39 = vadd.f32 %v2733_v38, %v2732_v37  ;;  %v5778_v37 = vpack.c.bf16 %v3426_v36, %v3425_v34  ;;  %v3330_v38 = vld [vmem:[#allocation11 + $0x30] sm:$0xff] }
 0xb5f   : > { %v2735_v40 = vmul.f32 0.125, %v2734_v39  ;;  %v3331_v39 = vld [vmem:[#allocation11 + $0x38] sm:$0xff] }
 0xb61   : > { %v2736_v41 = vadd.f32 1e-05, %v2735_v40  ;;  %v3427_v40 = vld [vmem:[#allocation11 + $0xb0] sm:$0xff] }
 0xb63   : > { %5985 = vrsqrt.f32 %v2736_v41  ;;  %v5750_v41 = vpack.c.bf16 %v3331_v39, %v3330_v38 }
 0xb6d   : > { %v5986_v42 = vpop.eup %5985 }
 0xb6e   : > { %v2738_v44 = vmul.f32 %v5986_v42, %v2727_v32  ;;  %v3328_v32 = vld [vmem:[#allocation11 + $0x20] sm:$0xff]  ;;  %v3428_v42 = vld [vmem:[#allocation11 + $0xb8] sm:$0xff] }
 0xb6f   : > { %v5746_v35 = vpack.c.bf16 %v3329_v33, %v3328_v32  ;;  %v4112_v32 = vld [vmem:[%s6929_s13 + $0x3] ss:$0 sm:$0xff] }
 0xb70   : > { %v2747_v46 = vmul.f32 %v4098_v43, %v2738_v44  ;;  %v5782_v43 = vpack.c.bf16 %v3428_v42, %v3427_v40  ;;  %v3332_v44 = vld [vmem:[#allocation11 + $0x40] sm:$0xff] }
 0xb71   : > { %v4115_v40 = vld [vmem:[%s6976_s21 + $0x20] sm:$0xff]  ;;  %s6980_s21 = sld [smem:[#allocation30_spill]] }
 0xb72   : > { %v2756_v47 = vadd.f32 %v4100_v45, %v2747_v46  ;;  %v3333_v45 = vld [vmem:[#allocation11 + $0x48] sm:$0xff]  ;;  %v3429_v46 = vld [vmem:[#allocation11 + $0xc0] sm:$0xff] }
 0xb73   : > { %v3712_v42 = vld [vmem:[#allocation11 + $0x100] sm:$0xff] }
 0xb74   : > { %5075 = vmatmul.mubr.f32.vlgmr.msra.gmra.mrb[18].mxu0 %v2756_v47  ;;  %5110 = vmatmul.mubr.f32.vlgmr.msra.gmra.mrb[20].mxu1 %v2756_v47 }
 0xb75   : > { %5114 = vmatprep.mubr.msk.f32.mxu0 %vm1911_vm6, %v4101_v48  ;;  %v3430_v48 = vld [vmem:[#allocation11 + $0xc8] sm:$0xff] }
 0xb77   : > { %s6981_s26 = smov %s6980_s21  ;;  %s6873_s19 = scalar_lea.hbm %s6980_s21, %s4141_s16 }
 0xc47   : > { %v2841_v49 = vpop.f32.mrb[18].mxu0  ;;  %v2931_v50 = vpop.f32.mrb[20].mxu1 }
 0xc48   : > { %v5076_v52 = vpop.f32.mrb[19].mxu0  ;;  %v5111_v53 = vpop.f32.mrb[21].mxu1  ;;  %5112 = vmatprep.subr.mxu0 %v2931_v50 }
 0xc49   : > { %5113 = vmatpush3.msra.mxu0 %v2931_v50  ;;  %v3334_v50 = vld [vmem:[#allocation11 + $0x50] sm:$0xff] }
 0xc4a   : > { %5115 = vmatmul.mubr.msk.f32.vlgmr.msra.gmra.mrb[20].mxu0 %vm1911_vm6, %v4102_v51  ;;  %5117 = vmatprep.subr.mxu0 %v2841_v49  ;;  %v3335_v51 = vld [vmem:[#allocation11 + $0x58] sm:$0xff]  ;;  %v3431_v52 = vld [vmem:[#allocation11 + $0xd0] sm:$0xff] }
 0xc4b   : > { %5118 = vmatpush3.msra.mxu0 %v2841_v49  ;;  %5119 = vmatprep.mubr.msk.f32.mxu0 %vm1911_vm6, %v2757_v54  ;;  %v5786_v49 = vpack.c.bf16 %v3430_v48, %v3429_v46  ;;  %v5758_v53 = vpack.c.bf16 %v3335_v51, %v3334_v50  ;;  %v3432_v54 = vld [vmem:[#allocation11 + $0xd8] sm:$0xff]  ;;  %v3714_v51 = vld [vmem:[#allocation11 + $0x110] sm:$0xff] }
 0xc4c   : > { %5714 = vmatprep.subr.bf16.mxu0 %v6245_v56  ;;  %v5790_v55 = vpack.c.bf16 %v3432_v54, %v3431_v52  ;;  %v3715_v52 = vld [vmem:[#allocation11 + $0x118] sm:$0xff]  ;;  %v3321_v54 = vld [vmem:[%s6977_s29 + $0x8] sm:$0xff] }
 0xc52   : > { %5120 = vmatmul.mubr.msk.f32.vlgmr.msra.gmra.mrb[20].mxu0 %vm1911_vm6, %v2758_v59  ;;  %v3337_v59 = vld [vmem:[#allocation11 + $0x68] sm:$0xff] }
 0xc53   : > { %5716 = vmatpush3.bf16.msra.mxu0 %v5715_v60  ;;  %5154 = vmatprep.mubr.msk.f32.mxu0 %vm6246_vm3, %v6247_v57  ;;  %v3111_v57 = vld [vmem:[#allocation10 + $0x150] sm:$0xff]  ;;  %v3433_v60 = vld [vmem:[#allocation11 + $0xe0] sm:$0xff]  ;;  %v5762_v61 = vpack.c.bf16 %v3337_v59, %v3336_v58  ;;  %v5814_v58 = vpack.c.bf16 %v3715_v52, %v3714_v51 }
 0xc54   : > { %5717 = vmatprep.subr.bf16.mxu0 %v6245_v56  ;;  %v5730_v10 = vpack.c.bf16 %v3112_v9, %v3111_v57  ;;  %v3716_v59 = vld [vmem:[#allocation11 + $0x120] sm:$0xff] }
 0xc57   : > { %5719 = vmatpush3.bf16.msra.mxu0 %v5718_v63  ;;  %v5794_v63 = vpack.c.bf16 %v3434_v62, %v3433_v60  ;;  %v3717_v60 = vld [vmem:[#allocation11 + $0x128] sm:$0xff]  ;;  %v3323_v62 = vld [vmem:[%s6977_s29 + $0x18] sm:$0xff] }
 0xc58   : > { %5720 = vmatprep.subr.bf16.mxu0 %v6245_v56  ;;  %v5818_v0 = vpack.c.bf16 %v3717_v60, %v3716_v59 }
 0xc5b   : > { %5722 = vmatpush3.bf16.msra.mxu0 %v5721_v2  ;;  %v3435_v2 = vld [vmem:[#allocation11 + $0xf0] sm:$0xff] }
 0xc5c   : > { %5723 = vmatprep.subr.bf16.mxu0 %v6245_v56 }
 0xc5f   : > { %5725 = vmatpush3.bf16.msra.mxu0 %v5724_v5  ;;  %v5798_v5 = vpack.c.bf16 %v3436_v4, %v3435_v2  ;;  %v3719_v2 = vld [vmem:[#allocation11 + $0x138] sm:$0xff]  ;;  %v3720_v4 = vld [vmem:[#allocation11 + $0x140] sm:$0xff] }
 0xc60   : > { %5726 = vmatprep.subr.bf16.mxu0 %v6245_v56 }
 0xc63   : > { %5728 = vmatpush3.bf16.msra.mxu0 %v5727_v8 }
 0xc64   : > { %5729 = vmatprep.subr.bf16.mxu0 %v6245_v56 }
 0xc67   : > { %5731 = vmatpush3.bf16.msra.mxu0 %v5730_v10 }
 0xc68   : > { %5732 = vmatprep.subr.bf16.mxu0 %v6245_v56 }
 0xc6b   : > { %5734 = vmatpush3.bf16.msra.mxu0 %v5733_v13 }
 0xc6c   : > { %5735 = vmatprep.subr.bf16.mxu0 %v6245_v56  ;;  %v3325_v56 = vld [vmem:[#allocation11 + $0x8] sm:$0xff] }
 0xc6d   : > { %v5738_v23 = vpack.c.bf16 %v3325_v56, %v3324_v21 }
 0xc6f   : > { %5737 = vmatpush3.bf16.msra.mxu0 %v5736_v16  ;;  %5739 = vmatprep.subr.bf16.mxu1 %v5738_v23 }
 0xc70   : > { %5741 = vmatpush3.bf16.msra.mxu1 %v5738_v23 }
 0xc71   : > { %5743 = vmatprep.subr.bf16.mxu1 %v5742_v29 }
 0xc72   : > { %5155 = vmatmul.mubr.f32.vlgmr.msra.gmra.mrb[22].mxu0 %v2756_v47  ;;  %v5754_v47 = vpack.c.bf16 %v3333_v45, %v3332_v44 }
 0xc73   : > { %5159 = vmatprep.mubr.msk.f32.mxu0 %vm1911_vm6, %v4107_v17 }
 0xc74   : > { %5745 = vmatpush3.bf16.msra.mxu1 %v5742_v29 }
 0xc75   : > { %5747 = vmatprep.subr.bf16.mxu1 %v5746_v35 }
 0xc78   : > { %5749 = vmatpush3.bf16.msra.mxu1 %v5746_v35  ;;  %v4114_v35 = vld [vmem:[%s6930_s14 + $0x3] ss:$0 sm:$0xff] }
 0xc79   : > { %5751 = vmatprep.subr.bf16.mxu1 %v5750_v41 }
 0xc7c   : > { %5753 = vmatpush3.bf16.msra.mxu1 %v5750_v41  ;;  %v3320_v41 = vld [vmem:[%s6977_s29] sm:$0xff] }
 0xc7d   : > { %5755 = vmatprep.subr.bf16.mxu1 %v5754_v47 }
 0xc80   : > { %5757 = vmatpush3.bf16.msra.mxu1 %v5754_v47 }
 0xc81   : > { %5759 = vmatprep.subr.bf16.mxu1 %v5758_v53 }
 0xc84   : > { %5761 = vmatpush3.bf16.msra.mxu1 %v5758_v53  ;;  %v4116_v53 = vld [vmem:[%s6977_s29 + $0x28] sm:$0xff] }
 0xc85   : > { %5763 = vmatprep.subr.bf16.mxu1 %v5762_v61 }
 0xc88   : > { %5765 = vmatpush3.bf16.msra.mxu1 %v5762_v61  ;;  %v4117_v61 = vld [vmem:[%s6977_s29 + $0x30] sm:$0xff] }
 0xc89   : > { %5767 = vmatprep.subr.bf16.mxu1 %v5766_v3 }
 0xc8c   : > { %5769 = vmatpush3.bf16.msra.mxu1 %v5766_v3  ;;  %v5822_v3 = vpack.c.bf16 %v3719_v2, %v3718_v1 }
 0xd45   : > { %v3183_v18 = vpop.f32.mrb[22].mxu0 }
 0xd46   : > { %v5156_v20 = vpop.f32.mrb[23].mxu0  ;;  %5157 = vmatprep.subr.mxu0 %v3183_v18 }
 0xd47   : > { %5158 = vmatpush3.msra.mxu0 %v3183_v18 }
 0xd48   : > { %5160 = vmatmul.mubr.msk.f32.vlgmr.msra.gmra.mrb[20].mxu0 %vm1911_vm6, %v4108_v19  ;;  %5771 = vmatprep.subr.bf16.mxu0 %v5770_v25 }
 0xd49   : > { %5773 = vmatpush3.bf16.msra.mxu0 %v5770_v25 }
 0xd4a   : > { %5775 = vmatprep.subr.bf16.mxu0 %v5774_v31 }
 0xd4d   : > { %5777 = vmatpush3.bf16.msra.mxu0 %v5774_v31 }
 0xd4e   : > { %5779 = vmatprep.subr.bf16.mxu0 %v5778_v37 }
 0xd51   : > { %5781 = vmatpush3.bf16.msra.mxu0 %v5778_v37 }
 0xd52   : > { %5783 = vmatprep.subr.bf16.mxu0 %v5782_v43 }
 0xd55   : > { %5785 = vmatpush3.bf16.msra.mxu0 %v5782_v43  ;;  %v3713_v43 = vld [vmem:[#allocation11 + $0x108] sm:$0xff] }
 0xd56   : > { %5787 = vmatprep.subr.bf16.mxu0 %v5786_v49  ;;  %v5810_v50 = vpack.c.bf16 %v3713_v43, %v3712_v42 }
 0xd59   : > { %5789 = vmatpush3.bf16.msra.mxu0 %v5786_v49 }
 0xd5a   : > { %5791 = vmatprep.subr.bf16.mxu0 %v5790_v55 }
 0xd5d   : > { %5793 = vmatpush3.bf16.msra.mxu0 %v5790_v55  ;;  %v3322_v55 = vld [vmem:[%s6977_s29 + $0x10] sm:$0xff] }
 0xd5e   : > { %5795 = vmatprep.subr.bf16.mxu0 %v5794_v63 }
 0xd61   : > { %5797 = vmatpush3.bf16.msra.mxu0 %v5794_v63  ;;  %v4118_v63 = vld [vmem:[%s6977_s29 + $0x38] sm:$0xff] }
 0xd62   : > { %5799 = vmatprep.subr.bf16.mxu0 %v5798_v5 }
 0xd65   : > { %5801 = vmatpush3.bf16.msra.mxu0 %v5798_v5  ;;  %v3721_v5 = vld [vmem:[#allocation11 + $0x148] sm:$0xff] }
 0xe1b   : > { %v5161_v6 = vpop.f32.mrb[20].mxu0 }
 0xe1c   : > { %vm3271_vm10 = vcmp.ge.f32.partialorder %v5161_v6, 0.0  ;;  %v3273_v7 = vmul.f32 0.0, %v5161_v6  ;;  %v3259_v8 = vpop.f32.mrb[21].mxu0 }
 0xe1d   : > { %vm3270_vm11 = vcmp.ge.f32.partialorder %v3259_v8, 0.0  ;;  %v3272_v57 = vmul.f32 0.0, %v3259_v8 }
 0xe1e   : > { %v3275_v9 = vsel %vm3271_vm10, %v5161_v6, %v3273_v7  ;;  %v5826_v6 = vpack.c.bf16 %v3721_v5, %v3720_v4  ;;  %v3722_v7 = vld [vmem:[#allocation11 + $0x150] sm:$0xff] }
 0xe1f   : > { %v3274_v10 = vsel %vm3270_vm11, %v3259_v8, %v3272_v57  ;;  %v3723_v8 = vld [vmem:[#allocation11 + $0x158] sm:$0xff] }
 0xe20   : > { %v3276_v11 = vadd.f32 %v3275_v9, %v3274_v10  ;;  %v5830_v57 = vpack.c.bf16 %v3723_v8, %v3722_v7 }
 0xe22   : > { %v3277_v12 = vrot.slane %v3276_v11, 4 }
 0xe24   : > { %v3278_v13 = vadd.f32 %v3277_v12, %v3276_v11  ;;  %v3726_v12 = vld [vmem:[#allocation11 + $0x170] sm:$0xff] }
 0xe26   : > { %v3279_v14 = vrot.slane %v3278_v13, 2 }
 0xe28   : > { %v3280_v15 = vadd.f32 %v3279_v14, %v3278_v13  ;;  %v3727_v13 = vld [vmem:[#allocation11 + $0x178] sm:$0xff] }
 0xe29   : > { %v5838_v14 = vpack.c.bf16 %v3727_v13, %v3726_v12 }
 0xe2a   : > { %v3281_v16 = vrot.slane %v3280_v15, 1 }
 0xe2c   : > { %v3282_v17 = vadd.f32 %v3281_v16, %v3280_v15  ;;  %v4127_v15 = vld [vmem:[%s6977_s29 + $0x40] sm:$0xff] }
 0xe2e   : > { %v3283_v18 = vmul.f32 0.0625, %v3282_v17 }
 0xe30   : > { %v3284_v19 = vsub.f32 %v3274_v10, %v3283_v18  ;;  %v3285_v20 = vsub.f32 %v3275_v9, %v3283_v18  ;;  %v3724_v9 = vld [vmem:[#allocation11 + $0x160] sm:$0xff]  ;;  %v3725_v10 = vld [vmem:[#allocation11 + $0x168] sm:$0xff] }
 0xe31   : > { %v5834_v11 = vpack.c.bf16 %v3725_v10, %v3724_v9 }
 0xe32   : > { %v3286_v21 = vmul.f32 %v3284_v19, %v3284_v19  ;;  %v3287_v56 = vmul.f32 %v3285_v20, %v3285_v20 }
 0xe34   : > { %v3288_v22 = vadd.f32 %v3287_v56, %v3286_v21 }
 0xe36   : > { %v3289_v23 = vrot.slane %v3288_v22, 4 }
 0xe38   : > { %v3290_v24 = vadd.f32 %v3289_v23, %v3288_v22 }
 0xe3a   : > { %v3291_v25 = vrot.slane %v3290_v24, 2 }
 0xe3c   : > { %v3292_v26 = vadd.f32 %v3291_v25, %v3290_v24 }
 0xe3e   : > { %v3293_v27 = vrot.slane %v3292_v26, 1 }
 0xe40   : > { %v3294_v28 = vadd.f32 %v3293_v27, %v3292_v26 }
 0xe42   : > { %v3295_v29 = vmul.f32 0.0625, %v3294_v28 }
 0xe44   : > { %v3296_v30 = vadd.f32 1e-05, %v3295_v29 }
 0xe46   : > { %5987 = vrsqrt.f32 %v3296_v30  ;;  %v4128_v30 = vld [vmem:[%s6977_s29 + $0x48] sm:$0xff] }
 0xe50   : > { %v5988_v31 = vpop.eup %5987 }
 0xe51   : > { %v3298_v33 = vmul.f32 %v5988_v31, %v3284_v19  ;;  %v3299_v34 = vmul.f32 %v5988_v31, %v3285_v20  ;;  %v4129_v31 = vld [vmem:[%s6977_s29 + $0x50] sm:$0xff] }
 0xe53   : > { %v3308_v36 = vmul.f32 %v4112_v32, %v3298_v33  ;;  %v3309_v37 = vmul.f32 %v4112_v32, %v3299_v34  ;;  %v4130_v32 = vld [vmem:[%s6977_s29 + $0x58] sm:$0xff] }
 0xe55   : > { %v3318_v38 = vadd.f32 %v4114_v35, %v3308_v36  ;;  %v6813_v39 = vadd.f32 %v4114_v35, %v3309_v37 }
 0xe57   : > { %5194 = vmatprep.mubr.f32.mxu1 %v3318_v38  ;;  %5229 = vmatprep.mubr.f32.mxu0 %v3318_v38 }
 0xe58   : > { %5195 = vmatmul.mubr.f32.vlgmr.msra.gmra.mrb[22].mxu1 %v6813_v39  ;;  %5230 = vmatmul.mubr.f32.vlgmr.msra.gmra.mrb[24].mxu0 %v6813_v39 }
 0xe59   : > { %5236 = vmatprep.mubr.msk.f32.mxu0 %vm1379_vm4, %v4115_v40  ;;  %5246 = vmatprep.mubr.msk.f32.mxu1 %vm1379_vm4, %v3320_v41 }
 0xf2b   : > { %v5196_v44 = vpop.f32.mrb[22].mxu1  ;;  %v5231_v45 = vpop.f32.mrb[24].mxu0 }
 0xf2c   : > { %v3406_v46 = vpop.f32.mrb[23].mxu1  ;;  %v3503_v47 = vpop.f32.mrb[25].mxu0 }
 0xf2d   : > { %v5806_v48 = vpack.c.bf16 %v5196_v44, %v3406_v46  ;;  %v5802_v49 = vpack.c.bf16 %v5231_v45, %v3503_v47 }
 0xf2f   : > { %5803 = vmatprep.subr.bf16.mxu0 %v5802_v49  ;;  %5807 = vmatprep.subr.bf16.mxu1 %v5806_v48 }
 0xf30   : > { %5805 = vmatpush3.bf16.msra.mxu0 %v5802_v49  ;;  %5809 = vmatpush3.bf16.msra.mxu1 %v5806_v48 }
 0xf31   : > { %5811 = vmatprep.subr.bf16.mxu1 %v5810_v50 }
 0xf33   : > { %5237 = vmatmul.mubr.msk.f32.vlgmr.msra.gmra.mrb[26].mxu0 %vm1379_vm4, %v4116_v53  ;;  %5247 = vmatmul.mubr.msk.f32.vlgmr.msra.gmra.mrb[24].mxu1 %vm1379_vm4, %v3321_v54 }
 0xf34   : > { %5813 = vmatpush3.bf16.msra.mxu1 %v5810_v50  ;;  %5249 = vmatprep.mubr.msk.f32.mxu1 %vm1379_vm4, %v3322_v55 }
 0xf35   : > { %5815 = vmatprep.subr.bf16.mxu1 %v5814_v58  ;;  %5239 = vmatprep.mubr.msk.f32.mxu0 %vm1379_vm4, %v4117_v61 }
 0xf37   : > { %5250 = vmatmul.mubr.msk.f32.gmra.mrb[26].mxu1 %vm1379_vm4, %v3323_v62  ;;  %5240 = vmatmul.mubr.msk.f32.gmra.mrb[28].mxu0 %vm1379_vm4, %v4118_v63 }
 0xf38   : > { %5817 = vmatpush3.bf16.msra.mxu1 %v5814_v58  ;;  %5284 = vmatprep.mubr.f32.mxu1 %v3318_v38 }
 0xf39   : > { %5819 = vmatprep.subr.bf16.mxu1 %v5818_v0  ;;  %5291 = vmatprep.mubr.msk.f32.mxu0 %vm1379_vm4, %v4127_v15 }
 0xf3c   : > { %5821 = vmatpush3.bf16.msra.mxu1 %v5818_v0 }
 0xf3d   : > { %5823 = vmatprep.subr.bf16.mxu1 %v5822_v3 }
 0xf40   : > { %5825 = vmatpush3.bf16.msra.mxu1 %v5822_v3 }
 0xf41   : > { %5827 = vmatprep.subr.bf16.mxu1 %v5826_v6 }
 0xf44   : > { %5829 = vmatpush3.bf16.msra.mxu1 %v5826_v6 }
 0xf45   : > { %5831 = vmatprep.subr.bf16.mxu1 %v5830_v57 }
 0xf48   : > { %5833 = vmatpush3.bf16.msra.mxu1 %v5830_v57 }
 0xf49   : > { %5835 = vmatprep.subr.bf16.mxu1 %v5834_v11 }
 0xf4c   : > { %5837 = vmatpush3.bf16.msra.mxu1 %v5834_v11 }
 0xf4d   : > { %5839 = vmatprep.subr.bf16.mxu1 %v5838_v14 }
 0xf50   : > { %5841 = vmatpush3.bf16.msra.mxu1 %v5838_v14 }
 0xf53   : > { %5285 = vmatmul.mubr.f32.vlgmr.msra.gmra.mrb[28].mxu1 %v6813_v39 }
0x1006   : > { %v5238_v16 = vpop.f32.mrb[26].mxu0  ;;  %v5248_v17 = vpop.f32.mrb[24].mxu1 }
0x1007   : > { %v3693_v18 = vadd.f32 %v5248_v17, %v5238_v16  ;;  %v3590_v19 = vpop.f32.mrb[27].mxu0  ;;  %v3687_v20 = vpop.f32.mrb[25].mxu1 }
0x1008   : > { %v3688_v21 = vadd.f32 %v3687_v20, %v3590_v19 }
0x100a   : > { %v5241_v56 = vpop.f32.mrb[28].mxu0  ;;  %v5251_v22 = vpop.f32.mrb[26].mxu1 }
0x100b   : > { %v3703_v23 = vadd.f32 %v5251_v22, %v5241_v56  ;;  %v3600_v24 = vpop.f32.mrb[29].mxu0  ;;  %v3697_v25 = vpop.f32.mrb[27].mxu1 }
0x100c   : > { %v3698_v26 = vadd.f32 %v3697_v25, %v3600_v24 }
0x1026   : > { %v5286_v27 = vpop.f32.mrb[28].mxu1 }
0x1027   : > { %v3794_v28 = vpop.f32.mrb[29].mxu1 }
0x1028   : > { %v5842_v29 = vpack.c.bf16 %v5286_v27, %v3794_v28 }
0x102a   : > { %5843 = vmatprep.subr.bf16.mxu0 %v5842_v29 }
0x102b   : > { %5845 = vmatpush3.bf16.msra.mxu0 %v5842_v29 }
0x102e   : > { %5292 = vmatmul.mubr.msk.f32.vlgmr.msra.gmra.mrb[30].mxu0 %vm1379_vm4, %v4128_v30 }
0x102f   : > { %5294 = vmatprep.mubr.msk.f32.mxu0 %vm1379_vm4, %v4129_v31 }
0x1032   : > { %5295 = vmatmul.mubr.msk.f32.gmra.mrb[32].mxu0 %vm1379_vm4, %v4130_v32 }
0x1101   : > { %v5293_v33 = vpop.f32.mrb[30].mxu0 }
0x1102   : > { %v3901_v34 = vadd.f32 %v5293_v33, %v3693_v18  ;;  %v3881_v35 = vpop.f32.mrb[31].mxu0 }
0x1103   : > { %v3900_v36 = vadd.f32 %v3881_v35, %v3688_v21 }
0x1104   : > { %3905 = vst [vmem:[%s575_s11 + $0x8] sm:$0xff] %v3901_v34 }
0x1105   : > { %3904 = vst [vmem:[%s575_s11] sm:$0xff] %v3900_v36  ;;  %v5296_v37 = vpop.f32.mrb[32].mxu0 }
0x1106   : > { %v3903_v38 = vadd.f32 %v5296_v37, %v3703_v23  ;;  %v3891_v39 = vpop.f32.mrb[33].mxu0 }
0x1107   : > { %v3902_v40 = vadd.f32 %v3891_v39, %v3698_v26 }
0x1108   : > { %3907 = vst [vmem:[%s575_s11 + $0x18] sm:$0xff] %v3903_v38 }
0x1109   : > { %3906 = vst [vmem:[%s575_s11 + $0x10] sm:$0xff] %v3902_v40 }
0x110a   : > { %6170 = shalt.err (!%p6167_p2)
}
0x110b   : > { %s6171_s18 = scalar_lea.hbm %s6873_s19, 512  ;;  %s6175_s11 = scalar_lea.hbm %s6981_s26, 1024 }
0x110c   : > { %p6172_p3 = scmp.ne.s32.totalorder %s6873_s19, %s6171_s18  ;;  %p6176_p7 = scmp.lt.u32.totalorder %s6873_s19, %s6981_s26 }
0x110d   : > { %p6177_p8 = scmp.lt.u32.totalorder %s6175_s11, %s6171_s18  ;;  %p6179_p13 = scmp.lt.u32.totalorder %s6171_s18, %s6873_s19 }
0x110e   : > { %p6173_p4 = pnand %p6172_p3, %p6982_p1 }
0x110f   : > { %p6178_p11 = por %p6177_p8, %p6176_p7 }
0x1110   : > { %p6174_p12 = pneg %p6173_p4 }
0x1111   : > { %p6180_p6 = por %p6179_p13, %p6178_p11 }
0x1113   : > { %p6181_p9 = pnand %p6180_p6, %p6174_p12 }
0x1115   : > { %6184 = shalt.err (!%p6181_p9)
}
0x1116   : > { %s6249_s27 = smov 128   ;;  %s6250_s21 = smov 8  }
0x1117   : > { %5898 = dma.vmem_to_hbm [thread:$0]  (%p6982_p1), %s6868_s12, 512, %s6873_s19, %s6875_s15, %s6249_s27, %s6249_s27, %s6250_s21  }
0x1118 PF: > { %s6983_s22 = sld [smem:[#allocation22_spill]]  ;;  %s6984_s30 = sld [smem:[#allocation19_spill]] }
0x1119   : > { %s6985_s23 = sld [smem:[#allocation26_spill]] }
0x111e   : > { %p5935_p5 = scmp.ge.s32.totalorder %s6983_s22, 2  ;;  %s3937_s24 = sand.u32 1, %s6984_s30  }
0x111f   : > { %p6986_p0 = scmp.ne.s32.totalorder %s6985_s23, 0  ;;  %s3938_s18 = scalar_lea.sflag [#allocation4], %s3937_s24 }
0x1121   : > { %p5920_p10 = pnand %p5935_p5, %p6986_p0 }
0x1123   : > { %6218 = dma.done.wait (!%p5920_p10), %s3938_s18, 512  }
0x1124   : > { %6220 = vsyncadd (!%p5920_p10), %s3938_s18, 4294966784  ;;  %s6987_s21 = sld [smem:[#allocation23_spill]]  ;;  %s6988_s18 = sld [smem:[#allocation20_spill]] }
0x1125   : > { %s6989_s19 = sld [smem:[#allocation21_spill]]  ;;  %s6990_s20 = sld [smem:[#allocation24_spill]] }
0x112a   : > { %p29_p2 = scmp.ge.s32.totalorder %s6987_s21, 4  }
0x112c   :  { %31 = sbr.rel (!%p29_p2) target bundleno = 12 (0xc), region = 170 }
0x1133   :  { %3943 = vsyncpa [#allocation3], 1 }
0x1134   :  { %3945 = vsyncpa [#allocation3 + $0x1], 1 }
0x1135   :  { %3946 = vsyncpa [#allocation6], 1 }
0x1136   :  { %3947 = vsyncpa [#allocation9], 1 }
0x1137   :  { %3948 = vsyncpa [#allocation12], 1 }
0x1138   :  { %3949 = vsyncpa [#allocation4], 1 }
0x1139   :  { %3951 = vsyncpa [#allocation4 + $0x1], 1 }

</bundles_post_ra>
